<compile_context>
chip_gen: v5e
topology: v5e:2x2
jax: 0.10.0
libtpu: 0.0.40
codegen_flags: <defaults>
</compile_context>

<pallas_src>
import functools

import jax
import jax.numpy as jnp
from jax import lax
from jax.experimental import pallas as pl
from jax.experimental.pallas import tpu as pltpu

_VMEM_LIMIT = 32 * 1024 * 1024          # stay well under v7x's 64 MiB VMEM
_BF16 = jnp.bfloat16


def _silu(x):
    return x * jax.nn.sigmoid(x)


def _dot(a, b):
    # bf16 operands, f32 accumulation: native single-pass MXU path.
    return jnp.dot(a.astype(_BF16), b.astype(_BF16),
                   preferred_element_type=jnp.float32)


# ----------------------------- fused Pallas kernel ---------------------------

def _down_kernel(xph_ref, w1_ref, b1_ref, wa_ref, ba_ref, wb_ref, bb_ref,
                 wb1_ref, bb1_ref, wb2_ref, bb2_ref,
                 wca_ref, wcb_ref, bc_ref,
                 o_ref, hpad_ref, *, Ho, Wo, n_btl):
    """Whole Down block for one image, all intermediates resident in VMEM.

    xph_ref: (2, 2, Hq, Wq, Cin) = 2x2 stride-phase split of the padded image so
    every tap of the stride-2 3x3 conv is a plain static slice (fused im2col).
    """
    cin = xph_ref.shape[-1]
    P = Ho * Wo

    # --- conv1: 3x3 stride-2 conv + folded BN + SiLU (9-tap accumulation) -----
    acc = None
    for dy in range(3):
        for dx in range(3):
            sub = xph_ref[dy % 2, dx % 2,
                          dy // 2:dy // 2 + Ho, dx // 2:dx // 2 + Wo, :]
            t = _dot(sub.reshape(P, cin), w1_ref[dy, dx, :, :])
            acc = t if acc is None else acc + t
    y = _silu(acc + b1_ref[...])                      # (P, Cout)  -- VMEM only

    # --- C3 head: cv1 / cv2 (1x1) ---------------------------------------------
    a = _silu(_dot(y, wa_ref[...]) + ba_ref[...])     # (P, c_)
    b = _silu(_dot(y, wb_ref[...]) + bb_ref[...])     # (P, c_)
    c_ = a.shape[-1]

    # --- n Bottlenecks: a = a + SiLU(conv3x3(SiLU(a@W1+b1)) + b2) -------------
    hpad_ref[...] = jnp.zeros_like(hpad_ref)          # zero halo once
    for i in range(n_btl):
        h = _silu(_dot(a, wb1_ref[i]) + bb1_ref[i])   # 1x1 cv1, stays on-chip
        hpad_ref[1:Ho + 1, 1:Wo + 1, :] = (
            h.reshape(Ho, Wo, c_).astype(hpad_ref.dtype))
        acc2 = None
        for dy in range(3):
            for dx in range(3):
                sub = hpad_ref[dy:dy + Ho, dx:dx + Wo, :]
                t = _dot(sub.reshape(P, c_), wb2_ref[i * 9 + dy * 3 + dx])
                acc2 = t if acc2 is None else acc2 + t
        a = a + _silu(acc2 + bb2_ref[i])

    # --- cv3 over concat(a, b) as split GEMM (no concat materialized) ---------
    out = _silu(_dot(a, wca_ref[...]) + _dot(b, wcb_ref[...]) + bc_ref[...])
    o_ref[...] = out.astype(o_ref.dtype)


# ------------------------------ JAX glue --------------------------------------

def fold_bn(p, eps=1e-5):
    """Fold eval-mode BatchNorm into conv weight/bias (PyTorch eps default)."""
    scale = p["gamma"] / jnp.sqrt(p["var"] + eps)
    w_eff = p["w"] * scale[:, None, None, None]
    b_eff = p["beta"] - p["mean"] * scale
    return w_eff, b_eff


def _phase_split(x_nhwc):
    """Pad (p=1) and split into 2x2 stride phases: (N, 2, 2, Hq, Wq, C)."""
    N, H, W, C = x_nhwc.shape
    Ho = (H - 1) // 2 + 1
    Wo = (W - 1) // 2 + 1
    Hp = ((H + 3) // 2) * 2                 # H + 2 rounded up to even
    Wp = ((W + 3) // 2) * 2
    xp = jnp.pad(x_nhwc, ((0, 0), (1, Hp - H - 1), (1, Wp - W - 1), (0, 0)))
    xph = xp.reshape(N, Hp // 2, 2, Wp // 2, 2, C).transpose(0, 2, 4, 1, 3, 5)
    return xph, Ho, Wo


def down_forward_pallas(x_nchw, params):
    x = jnp.transpose(x_nchw, (0, 2, 3, 1))                     # NCHW -> NHWC
    N, H, W, Cin = x.shape
    xph, Ho, Wo = _phase_split(x)
    Hq, Wq = xph.shape[3], xph.shape[4]
    P = Ho * Wo

    # ---- fold BN into weights, lay out for GEMM, pre-cast weights to bf16 ----
    w1_eff, b1_eff = fold_bn(params["conv1"])
    Cout = w1_eff.shape[0]
    w1 = jnp.transpose(w1_eff, (2, 3, 1, 0)).astype(_BF16)      # (3,3,Cin,Cout)
    b1 = b1_eff.reshape(1, Cout)

    wa_eff, ba_eff = fold_bn(params["c3_cv1"])
    wb_eff, bb_eff = fold_bn(params["c3_cv2"])
    c_ = wa_eff.shape[0]
    wa = wa_eff.reshape(c_, Cout).T.astype(_BF16)               # (Cout, c_)
    wb = wb_eff.reshape(c_, Cout).T.astype(_BF16)
    ba = ba_eff.reshape(1, c_)
    bb = bb_eff.reshape(1, c_)

    n_btl = len(params["bottlenecks"])
    wb1_l, bb1_l, wb2_l, bb2_l = [], [], [], []
    for bp in params["bottlenecks"]:
        w1b, b1b = fold_bn(bp["cv1"])
        w2b, b2b = fold_bn(bp["cv2"])
        wb1_l.append(w1b.reshape(c_, c_).T)                     # (c_, c_)
        bb1_l.append(b1b.reshape(1, c_))
        wb2_l.append(jnp.transpose(w2b, (2, 3, 1, 0)))          # (3,3,c_,c_)
        bb2_l.append(b2b.reshape(1, c_))
    wb1 = jnp.stack(wb1_l).astype(_BF16)                        # (n, c_, c_)
    bb1 = jnp.stack(bb1_l)                                      # (n, 1, c_)
    wb2 = jnp.stack(wb2_l).reshape(n_btl * 9, c_, c_).astype(_BF16)  # (9n, c_, c_)
    bb2 = jnp.stack(bb2_l)                                      # (n, 1, c_)

    wc_eff, bc_eff = fold_bn(params["c3_cv3"])
    wc = wc_eff.reshape(Cout, 2 * c_).T.astype(_BF16)           # (2c_, Cout)
    wca, wcb = wc[:c_], wc[c_:]
    bc = bc_eff.reshape(1, Cout)

    kernel = functools.partial(_down_kernel, Ho=Ho, Wo=Wo, n_btl=n_btl)
    y = pl.pallas_call(
        kernel,
        out_shape=jax.ShapeDtypeStruct((N, P, Cout), jnp.float32),
        grid=(N,),
        in_specs=[
            pl.BlockSpec((None, 2, 2, Hq, Wq, Cin), lambda n: (n, 0, 0, 0, 0, 0)),
            pl.BlockSpec((3, 3, Cin, Cout), lambda n: (0, 0, 0, 0)),
            pl.BlockSpec((1, Cout), lambda n: (0, 0)),
            pl.BlockSpec((Cout, c_), lambda n: (0, 0)),
            pl.BlockSpec((1, c_), lambda n: (0, 0)),
            pl.BlockSpec((Cout, c_), lambda n: (0, 0)),
            pl.BlockSpec((1, c_), lambda n: (0, 0)),
            pl.BlockSpec((n_btl, c_, c_), lambda n: (0, 0, 0)),
            pl.BlockSpec((n_btl, 1, c_), lambda n: (0, 0, 0)),
            pl.BlockSpec((n_btl * 9, c_, c_), lambda n: (0, 0, 0)),
            pl.BlockSpec((n_btl, 1, c_), lambda n: (0, 0, 0)),
            pl.BlockSpec((c_, Cout), lambda n: (0, 0)),
            pl.BlockSpec((c_, Cout), lambda n: (0, 0)),
            pl.BlockSpec((1, Cout), lambda n: (0, 0)),
        ],
        out_specs=pl.BlockSpec((None, P, Cout), lambda n: (n, 0, 0)),
        scratch_shapes=[pltpu.VMEM((Ho + 2, Wo + 2, c_), jnp.float32)],
        compiler_params=pltpu.CompilerParams(
            dimension_semantics=("parallel",),
            vmem_limit_bytes=_VMEM_LIMIT),
    )(xph, w1, b1, wa, ba, wb, bb, wb1, bb1, wb2, bb2, wca, wcb, bc)

    y = y.reshape(N, Ho, Wo, Cout)
    return jnp.transpose(y, (0, 3, 1, 2))                        # NHWC -> NCHW


# ---------------------- parameter init (deterministic) ------------------------

def init_conv_params(key, c_in, c_out, k):
    k1, k2, k3, k4, k5 = jax.random.split(key, 5)
    w = jax.random.normal(k1, (c_out, c_in, k, k), jnp.float32)
    w = w / jnp.sqrt(float(c_in * k * k))
    gamma = 1.0 + 0.1 * jax.random.normal(k2, (c_out,), jnp.float32)
    beta = 0.1 * jax.random.normal(k3, (c_out,), jnp.float32)
    mean = 0.1 * jax.random.normal(k4, (c_out,), jnp.float32)
    var = 0.5 + 0.5 * jnp.abs(jax.random.normal(k5, (c_out,), jnp.float32))
    return dict(w=w, gamma=gamma, beta=beta, mean=mean, var=var)


def init_down_params(key, in_ch, out_ch, n=3):
    c_ = int(out_ch * 0.5)
    keys = jax.random.split(key, 4 + 2 * n)
    params = {
        "conv1": init_conv_params(keys[0], in_ch, out_ch, 3),   # k=3,s=2,p=1
        "c3_cv1": init_conv_params(keys[1], out_ch, c_, 1),
        "c3_cv2": init_conv_params(keys[2], out_ch, c_, 1),
        "c3_cv3": init_conv_params(keys[3], 2 * c_, out_ch, 1),
        "bottlenecks": [],
    }
    for i in range(n):
        params["bottlenecks"].append({
            "cv1": init_conv_params(keys[4 + 2 * i], c_, c_, 1),
            "cv2": init_conv_params(keys[5 + 2 * i], c_, c_, 3),
        })
    return params


# ------------------------ pure-JAX reference (f32 HIGHEST) ---------------------

def _conv_ref(x_nhwc, p, k, s, pad):
    w_eff, b_eff = fold_bn(p)
    w_hwio = jnp.transpose(w_eff, (2, 3, 1, 0))
    y = lax.conv_general_dilated(
        x_nhwc, w_hwio, (s, s), [(pad, pad), (pad, pad)],
        dimension_numbers=("NHWC", "HWIO", "NHWC"),
        precision=lax.Precision.HIGHEST)
    y = y + b_eff
    return y * jax.nn.sigmoid(y)


def down_forward_ref(x_nchw, params):
    x = jnp.transpose(x_nchw, (0, 2, 3, 1))
    x = _conv_ref(x, params["conv1"], 3, 2, 1)
    a = _conv_ref(x, params["c3_cv1"], 1, 1, 0)
    b = _conv_ref(x, params["c3_cv2"], 1, 1, 0)
    for bp in params["bottlenecks"]:
        a = a + _conv_ref(_conv_ref(a, bp["cv1"], 1, 1, 0), bp["cv2"], 3, 1, 1)
    y = _conv_ref(jnp.concatenate([a, b], axis=-1), params["c3_cv3"], 1, 1, 0)
    return jnp.transpose(y, (0, 3, 1, 2))


if __name__ == "__main__":
    key = jax.random.PRNGKey(0)
    kx, kp = jax.random.split(key)
    in_ch, out_ch = 4, 8
    x = jax.random.normal(kx, (2, in_ch, 16, 16), jnp.float32)   # NCHW
    params = init_down_params(kp, in_ch, out_ch, n=3)

    fwd = jax.jit(down_forward_pallas)
    out = jax.block_until_ready(fwd(x, params))
    ref = jax.block_until_ready(down_forward_ref(x, params))

    assert out.shape == (2, out_ch, 8, 8), out.shape
    assert bool(jnp.all(jnp.isfinite(out)))
    max_err = float(jnp.max(jnp.abs(out - ref)))
    mean_err = float(jnp.mean(jnp.abs(out - ref)))
    # Kernel GEMMs use bf16 operands (f32 accumulation); reference is f32 HIGHEST.
    assert bool(jnp.allclose(out, ref, atol=5e-2, rtol=5e-2)), (max_err, mean_err)
    assert mean_err < 1e-2, (max_err, mean_err)
    print("KERNEL_OK")
</pallas_src>

<mosaic_0001>
module attributes {stable_mosaic.version = 11 : i64} {
  func.func @_down_kernel(%arg0: i32, %arg1: memref<1x2x2x9x9x4xf32, #tpu.memory_space<vmem>>, %arg2: memref<3x3x4x8xbf16, #tpu.memory_space<vmem>>, %arg3: memref<1x8xf32, #tpu.memory_space<vmem>>, %arg4: memref<8x4xbf16, #tpu.memory_space<vmem>>, %arg5: memref<1x4xf32, #tpu.memory_space<vmem>>, %arg6: memref<8x4xbf16, #tpu.memory_space<vmem>>, %arg7: memref<1x4xf32, #tpu.memory_space<vmem>>, %arg8: memref<3x4x4xbf16, #tpu.memory_space<vmem>>, %arg9: memref<3x1x4xf32, #tpu.memory_space<vmem>>, %arg10: memref<27x4x4xbf16, #tpu.memory_space<vmem>>, %arg11: memref<3x1x4xf32, #tpu.memory_space<vmem>>, %arg12: memref<4x8xbf16, #tpu.memory_space<vmem>>, %arg13: memref<4x8xbf16, #tpu.memory_space<vmem>>, %arg14: memref<1x8xf32, #tpu.memory_space<vmem>>, %arg15: memref<1x64x8xf32, #tpu.memory_space<vmem>>, %arg16: memref<10x10x4xf32, #tpu.memory_space<vmem>>) attributes {dimension_semantics = [#tpu.dimension_semantics<parallel>], iteration_bounds = array<i64: 2>, scalar_prefetch = 0 : i64, scratch_operands = 1 : i64, tpu.core_type = #tpu.core_type<tc>, window_params = [{transform_indices = @transform_0, window_bounds = array<i64: 1, 2, 2, 9, 9, 4>}, {pipeline_mode = #tpu.pipeline_mode<synchronous>, transform_indices = @transform_1, window_bounds = array<i64: 3, 3, 4, 8>}, {pipeline_mode = #tpu.pipeline_mode<synchronous>, transform_indices = @transform_2, window_bounds = array<i64: 1, 8>}, {pipeline_mode = #tpu.pipeline_mode<synchronous>, transform_indices = @transform_3, window_bounds = array<i64: 8, 4>}, {pipeline_mode = #tpu.pipeline_mode<synchronous>, transform_indices = @transform_4, window_bounds = array<i64: 1, 4>}, {pipeline_mode = #tpu.pipeline_mode<synchronous>, transform_indices = @transform_5, window_bounds = array<i64: 8, 4>}, {pipeline_mode = #tpu.pipeline_mode<synchronous>, transform_indices = @transform_6, window_bounds = array<i64: 1, 4>}, {pipeline_mode = #tpu.pipeline_mode<synchronous>, transform_indices = @transform_7, window_bounds = array<i64: 3, 4, 4>}, {pipeline_mode = #tpu.pipeline_mode<synchronous>, transform_indices = @transform_8, window_bounds = array<i64: 3, 1, 4>}, {pipeline_mode = #tpu.pipeline_mode<synchronous>, transform_indices = @transform_9, window_bounds = array<i64: 27, 4, 4>}, {pipeline_mode = #tpu.pipeline_mode<synchronous>, transform_indices = @transform_10, window_bounds = array<i64: 3, 1, 4>}, {pipeline_mode = #tpu.pipeline_mode<synchronous>, transform_indices = @transform_11, window_bounds = array<i64: 4, 8>}, {pipeline_mode = #tpu.pipeline_mode<synchronous>, transform_indices = @transform_12, window_bounds = array<i64: 4, 8>}, {pipeline_mode = #tpu.pipeline_mode<synchronous>, transform_indices = @transform_13, window_bounds = array<i64: 1, 8>}, {transform_indices = @transform_14, window_bounds = array<i64: 1, 64, 8>}]} {
    %c0 = arith.constant 0 : index
    %c0_0 = arith.constant 0 : index
    %c0_1 = arith.constant 0 : index
    %c0_2 = arith.constant 0 : index
    %c0_3 = arith.constant 0 : index
    %c0_4 = arith.constant 0 : index
    %0 = vector.load %arg1[%c0, %c0_0, %c0_1, %c0_2, %c0_3, %c0_4] : memref<1x2x2x9x9x4xf32, #tpu.memory_space<vmem>>, vector<1x1x1x8x8x4xf32>
    %1 = vector.shape_cast %0 : vector<1x1x1x8x8x4xf32> to vector<8x8x4xf32>
    %2 = vector.shape_cast %1 : vector<8x8x4xf32> to vector<64x4xf32>
    %c0_5 = arith.constant 0 : index
    %c0_6 = arith.constant 0 : index
    %c0_7 = arith.constant 0 : index
    %c0_8 = arith.constant 0 : index
    %3 = vector.load %arg2[%c0_5, %c0_6, %c0_7, %c0_8] : memref<3x3x4x8xbf16, #tpu.memory_space<vmem>>, vector<1x1x4x8xbf16>
    %4 = vector.shape_cast %3 : vector<1x1x4x8xbf16> to vector<4x8xbf16>
    %5 = arith.truncf %2 : vector<64x4xf32> to vector<64x4xbf16>
    %cst = arith.constant dense<0.000000e+00> : vector<64x8xf32>
    %6 = tpu.matmul %5, %4, %cst {dimension_numbers = #tpu.dot_dimension_numbers<[1], [0], [0], [1], [0, 0, 1, 1], [], []>} : vector<64x4xbf16>, vector<4x8xbf16>, vector<64x8xf32> -> vector<64x8xf32>
    %c0_9 = arith.constant 0 : index
    %c0_10 = arith.constant 0 : index
    %c1 = arith.constant 1 : index
    %c0_11 = arith.constant 0 : index
    %c0_12 = arith.constant 0 : index
    %c0_13 = arith.constant 0 : index
    %7 = vector.load %arg1[%c0_9, %c0_10, %c1, %c0_11, %c0_12, %c0_13] : memref<1x2x2x9x9x4xf32, #tpu.memory_space<vmem>>, vector<1x1x1x8x8x4xf32>
    %8 = vector.shape_cast %7 : vector<1x1x1x8x8x4xf32> to vector<8x8x4xf32>
    %9 = vector.shape_cast %8 : vector<8x8x4xf32> to vector<64x4xf32>
    %c0_14 = arith.constant 0 : index
    %c1_15 = arith.constant 1 : index
    %c0_16 = arith.constant 0 : index
    %c0_17 = arith.constant 0 : index
    %10 = vector.load %arg2[%c0_14, %c1_15, %c0_16, %c0_17] : memref<3x3x4x8xbf16, #tpu.memory_space<vmem>>, vector<1x1x4x8xbf16>
    %11 = vector.shape_cast %10 : vector<1x1x4x8xbf16> to vector<4x8xbf16>
    %12 = arith.truncf %9 : vector<64x4xf32> to vector<64x4xbf16>
    %cst_18 = arith.constant dense<0.000000e+00> : vector<64x8xf32>
    %13 = tpu.matmul %12, %11, %cst_18 {dimension_numbers = #tpu.dot_dimension_numbers<[1], [0], [0], [1], [0, 0, 1, 1], [], []>} : vector<64x4xbf16>, vector<4x8xbf16>, vector<64x8xf32> -> vector<64x8xf32>
    %14 = arith.addf %6, %13 : vector<64x8xf32>
    %c0_19 = arith.constant 0 : index
    %c0_20 = arith.constant 0 : index
    %c0_21 = arith.constant 0 : index
    %c0_22 = arith.constant 0 : index
    %c1_23 = arith.constant 1 : index
    %c0_24 = arith.constant 0 : index
    %15 = vector.load %arg1[%c0_19, %c0_20, %c0_21, %c0_22, %c1_23, %c0_24] : memref<1x2x2x9x9x4xf32, #tpu.memory_space<vmem>>, vector<1x1x1x8x8x4xf32>
    %16 = vector.shape_cast %15 : vector<1x1x1x8x8x4xf32> to vector<8x8x4xf32>
    %17 = vector.shape_cast %16 : vector<8x8x4xf32> to vector<64x4xf32>
    %c0_25 = arith.constant 0 : index
    %c2 = arith.constant 2 : index
    %c0_26 = arith.constant 0 : index
    %c0_27 = arith.constant 0 : index
    %18 = vector.load %arg2[%c0_25, %c2, %c0_26, %c0_27] : memref<3x3x4x8xbf16, #tpu.memory_space<vmem>>, vector<1x1x4x8xbf16>
    %19 = vector.shape_cast %18 : vector<1x1x4x8xbf16> to vector<4x8xbf16>
    %20 = arith.truncf %17 : vector<64x4xf32> to vector<64x4xbf16>
    %cst_28 = arith.constant dense<0.000000e+00> : vector<64x8xf32>
    %21 = tpu.matmul %20, %19, %cst_28 {dimension_numbers = #tpu.dot_dimension_numbers<[1], [0], [0], [1], [0, 0, 1, 1], [], []>} : vector<64x4xbf16>, vector<4x8xbf16>, vector<64x8xf32> -> vector<64x8xf32>
    %22 = arith.addf %14, %21 : vector<64x8xf32>
    %c0_29 = arith.constant 0 : index
    %c1_30 = arith.constant 1 : index
    %c0_31 = arith.constant 0 : index
    %c0_32 = arith.constant 0 : index
    %c0_33 = arith.constant 0 : index
    %c0_34 = arith.constant 0 : index
    %23 = vector.load %arg1[%c0_29, %c1_30, %c0_31, %c0_32, %c0_33, %c0_34] : memref<1x2x2x9x9x4xf32, #tpu.memory_space<vmem>>, vector<1x1x1x8x8x4xf32>
    %24 = vector.shape_cast %23 : vector<1x1x1x8x8x4xf32> to vector<8x8x4xf32>
    %25 = vector.shape_cast %24 : vector<8x8x4xf32> to vector<64x4xf32>
    %c1_35 = arith.constant 1 : index
    %c0_36 = arith.constant 0 : index
    %c0_37 = arith.constant 0 : index
    %c0_38 = arith.constant 0 : index
    %26 = vector.load %arg2[%c1_35, %c0_36, %c0_37, %c0_38] : memref<3x3x4x8xbf16, #tpu.memory_space<vmem>>, vector<1x1x4x8xbf16>
    %27 = vector.shape_cast %26 : vector<1x1x4x8xbf16> to vector<4x8xbf16>
    %28 = arith.truncf %25 : vector<64x4xf32> to vector<64x4xbf16>
    %cst_39 = arith.constant dense<0.000000e+00> : vector<64x8xf32>
    %29 = tpu.matmul %28, %27, %cst_39 {dimension_numbers = #tpu.dot_dimension_numbers<[1], [0], [0], [1], [0, 0, 1, 1], [], []>} : vector<64x4xbf16>, vector<4x8xbf16>, vector<64x8xf32> -> vector<64x8xf32>
    %30 = arith.addf %22, %29 : vector<64x8xf32>
    %c0_40 = arith.constant 0 : index
    %c1_41 = arith.constant 1 : index
    %c1_42 = arith.constant 1 : index
    %c0_43 = arith.constant 0 : index
    %c0_44 = arith.constant 0 : index
    %c0_45 = arith.constant 0 : index
    %31 = vector.load %arg1[%c0_40, %c1_41, %c1_42, %c0_43, %c0_44, %c0_45] : memref<1x2x2x9x9x4xf32, #tpu.memory_space<vmem>>, vector<1x1x1x8x8x4xf32>
    %32 = vector.shape_cast %31 : vector<1x1x1x8x8x4xf32> to vector<8x8x4xf32>
    %33 = vector.shape_cast %32 : vector<8x8x4xf32> to vector<64x4xf32>
    %c1_46 = arith.constant 1 : index
    %c1_47 = arith.constant 1 : index
    %c0_48 = arith.constant 0 : index
    %c0_49 = arith.constant 0 : index
    %34 = vector.load %arg2[%c1_46, %c1_47, %c0_48, %c0_49] : memref<3x3x4x8xbf16, #tpu.memory_space<vmem>>, vector<1x1x4x8xbf16>
    %35 = vector.shape_cast %34 : vector<1x1x4x8xbf16> to vector<4x8xbf16>
    %36 = arith.truncf %33 : vector<64x4xf32> to vector<64x4xbf16>
    %cst_50 = arith.constant dense<0.000000e+00> : vector<64x8xf32>
    %37 = tpu.matmul %36, %35, %cst_50 {dimension_numbers = #tpu.dot_dimension_numbers<[1], [0], [0], [1], [0, 0, 1, 1], [], []>} : vector<64x4xbf16>, vector<4x8xbf16>, vector<64x8xf32> -> vector<64x8xf32>
    %38 = arith.addf %30, %37 : vector<64x8xf32>
    %c0_51 = arith.constant 0 : index
    %c1_52 = arith.constant 1 : index
    %c0_53 = arith.constant 0 : index
    %c0_54 = arith.constant 0 : index
    %c1_55 = arith.constant 1 : index
    %c0_56 = arith.constant 0 : index
    %39 = vector.load %arg1[%c0_51, %c1_52, %c0_53, %c0_54, %c1_55, %c0_56] : memref<1x2x2x9x9x4xf32, #tpu.memory_space<vmem>>, vector<1x1x1x8x8x4xf32>
    %40 = vector.shape_cast %39 : vector<1x1x1x8x8x4xf32> to vector<8x8x4xf32>
    %41 = vector.shape_cast %40 : vector<8x8x4xf32> to vector<64x4xf32>
    %c1_57 = arith.constant 1 : index
    %c2_58 = arith.constant 2 : index
    %c0_59 = arith.constant 0 : index
    %c0_60 = arith.constant 0 : index
    %42 = vector.load %arg2[%c1_57, %c2_58, %c0_59, %c0_60] : memref<3x3x4x8xbf16, #tpu.memory_space<vmem>>, vector<1x1x4x8xbf16>
    %43 = vector.shape_cast %42 : vector<1x1x4x8xbf16> to vector<4x8xbf16>
    %44 = arith.truncf %41 : vector<64x4xf32> to vector<64x4xbf16>
    %cst_61 = arith.constant dense<0.000000e+00> : vector<64x8xf32>
    %45 = tpu.matmul %44, %43, %cst_61 {dimension_numbers = #tpu.dot_dimension_numbers<[1], [0], [0], [1], [0, 0, 1, 1], [], []>} : vector<64x4xbf16>, vector<4x8xbf16>, vector<64x8xf32> -> vector<64x8xf32>
    %46 = arith.addf %38, %45 : vector<64x8xf32>
    %c0_62 = arith.constant 0 : index
    %c0_63 = arith.constant 0 : index
    %c0_64 = arith.constant 0 : index
    %c1_65 = arith.constant 1 : index
    %c0_66 = arith.constant 0 : index
    %c0_67 = arith.constant 0 : index
    %47 = vector.load %arg1[%c0_62, %c0_63, %c0_64, %c1_65, %c0_66, %c0_67] : memref<1x2x2x9x9x4xf32, #tpu.memory_space<vmem>>, vector<1x1x1x8x8x4xf32>
    %48 = vector.shape_cast %47 : vector<1x1x1x8x8x4xf32> to vector<8x8x4xf32>
    %49 = vector.shape_cast %48 : vector<8x8x4xf32> to vector<64x4xf32>
    %c2_68 = arith.constant 2 : index
    %c0_69 = arith.constant 0 : index
    %c0_70 = arith.constant 0 : index
    %c0_71 = arith.constant 0 : index
    %50 = vector.load %arg2[%c2_68, %c0_69, %c0_70, %c0_71] : memref<3x3x4x8xbf16, #tpu.memory_space<vmem>>, vector<1x1x4x8xbf16>
    %51 = vector.shape_cast %50 : vector<1x1x4x8xbf16> to vector<4x8xbf16>
    %52 = arith.truncf %49 : vector<64x4xf32> to vector<64x4xbf16>
    %cst_72 = arith.constant dense<0.000000e+00> : vector<64x8xf32>
    %53 = tpu.matmul %52, %51, %cst_72 {dimension_numbers = #tpu.dot_dimension_numbers<[1], [0], [0], [1], [0, 0, 1, 1], [], []>} : vector<64x4xbf16>, vector<4x8xbf16>, vector<64x8xf32> -> vector<64x8xf32>
    %54 = arith.addf %46, %53 : vector<64x8xf32>
    %c0_73 = arith.constant 0 : index
    %c0_74 = arith.constant 0 : index
    %c1_75 = arith.constant 1 : index
    %c1_76 = arith.constant 1 : index
    %c0_77 = arith.constant 0 : index
    %c0_78 = arith.constant 0 : index
    %55 = vector.load %arg1[%c0_73, %c0_74, %c1_75, %c1_76, %c0_77, %c0_78] : memref<1x2x2x9x9x4xf32, #tpu.memory_space<vmem>>, vector<1x1x1x8x8x4xf32>
    %56 = vector.shape_cast %55 : vector<1x1x1x8x8x4xf32> to vector<8x8x4xf32>
    %57 = vector.shape_cast %56 : vector<8x8x4xf32> to vector<64x4xf32>
    %c2_79 = arith.constant 2 : index
    %c1_80 = arith.constant 1 : index
    %c0_81 = arith.constant 0 : index
    %c0_82 = arith.constant 0 : index
    %58 = vector.load %arg2[%c2_79, %c1_80, %c0_81, %c0_82] : memref<3x3x4x8xbf16, #tpu.memory_space<vmem>>, vector<1x1x4x8xbf16>
    %59 = vector.shape_cast %58 : vector<1x1x4x8xbf16> to vector<4x8xbf16>
    %60 = arith.truncf %57 : vector<64x4xf32> to vector<64x4xbf16>
    %cst_83 = arith.constant dense<0.000000e+00> : vector<64x8xf32>
    %61 = tpu.matmul %60, %59, %cst_83 {dimension_numbers = #tpu.dot_dimension_numbers<[1], [0], [0], [1], [0, 0, 1, 1], [], []>} : vector<64x4xbf16>, vector<4x8xbf16>, vector<64x8xf32> -> vector<64x8xf32>
    %62 = arith.addf %54, %61 : vector<64x8xf32>
    %c0_84 = arith.constant 0 : index
    %c0_85 = arith.constant 0 : index
    %c0_86 = arith.constant 0 : index
    %c1_87 = arith.constant 1 : index
    %c1_88 = arith.constant 1 : index
    %c0_89 = arith.constant 0 : index
    %63 = vector.load %arg1[%c0_84, %c0_85, %c0_86, %c1_87, %c1_88, %c0_89] : memref<1x2x2x9x9x4xf32, #tpu.memory_space<vmem>>, vector<1x1x1x8x8x4xf32>
    %64 = vector.shape_cast %63 : vector<1x1x1x8x8x4xf32> to vector<8x8x4xf32>
    %65 = vector.shape_cast %64 : vector<8x8x4xf32> to vector<64x4xf32>
    %c2_90 = arith.constant 2 : index
    %c2_91 = arith.constant 2 : index
    %c0_92 = arith.constant 0 : index
    %c0_93 = arith.constant 0 : index
    %66 = vector.load %arg2[%c2_90, %c2_91, %c0_92, %c0_93] : memref<3x3x4x8xbf16, #tpu.memory_space<vmem>>, vector<1x1x4x8xbf16>
    %67 = vector.shape_cast %66 : vector<1x1x4x8xbf16> to vector<4x8xbf16>
    %68 = arith.truncf %65 : vector<64x4xf32> to vector<64x4xbf16>
    %cst_94 = arith.constant dense<0.000000e+00> : vector<64x8xf32>
    %69 = tpu.matmul %68, %67, %cst_94 {dimension_numbers = #tpu.dot_dimension_numbers<[1], [0], [0], [1], [0, 0, 1, 1], [], []>} : vector<64x4xbf16>, vector<4x8xbf16>, vector<64x8xf32> -> vector<64x8xf32>
    %70 = arith.addf %62, %69 : vector<64x8xf32>
    %c0_95 = arith.constant 0 : index
    %c0_96 = arith.constant 0 : index
    %71 = vector.load %arg3[%c0_95, %c0_96] : memref<1x8xf32, #tpu.memory_space<vmem>>, vector<1x8xf32>
    %72 = vector.broadcast %71 : vector<1x8xf32> to vector<64x8xf32>
    %73 = arith.addf %70, %72 : vector<64x8xf32>
    %74 = arith.negf %73 : vector<64x8xf32>
    %75 = math.exp %74 : vector<64x8xf32>
    %cst_97 = arith.constant 1.000000e+00 : f32
    %76 = vector.broadcast %cst_97 : f32 to vector<64x8xf32>
    %77 = arith.addf %76, %75 : vector<64x8xf32>
    %78 = arith.divf %76, %77 : vector<64x8xf32>
    %79 = arith.mulf %73, %78 : vector<64x8xf32>
    %c0_98 = arith.constant 0 : index
    %c0_99 = arith.constant 0 : index
    %80 = vector.load %arg4[%c0_98, %c0_99] : memref<8x4xbf16, #tpu.memory_space<vmem>>, vector<8x4xbf16>
    %81 = arith.truncf %79 : vector<64x8xf32> to vector<64x8xbf16>
    %cst_100 = arith.constant dense<0.000000e+00> : vector<64x4xf32>
    %82 = tpu.matmul %81, %80, %cst_100 {dimension_numbers = #tpu.dot_dimension_numbers<[1], [0], [0], [1], [0, 0, 1, 1], [], []>} : vector<64x8xbf16>, vector<8x4xbf16>, vector<64x4xf32> -> vector<64x4xf32>
    %c0_101 = arith.constant 0 : index
    %c0_102 = arith.constant 0 : index
    %83 = vector.load %arg5[%c0_101, %c0_102] : memref<1x4xf32, #tpu.memory_space<vmem>>, vector<1x4xf32>
    %84 = vector.broadcast %83 : vector<1x4xf32> to vector<64x4xf32>
    %85 = arith.addf %82, %84 : vector<64x4xf32>
    %86 = arith.negf %85 : vector<64x4xf32>
    %87 = math.exp %86 : vector<64x4xf32>
    %cst_103 = arith.constant 1.000000e+00 : f32
    %88 = vector.broadcast %cst_103 : f32 to vector<64x4xf32>
    %89 = arith.addf %88, %87 : vector<64x4xf32>
    %90 = arith.divf %88, %89 : vector<64x4xf32>
    %91 = arith.mulf %85, %90 : vector<64x4xf32>
    %c0_104 = arith.constant 0 : index
    %c0_105 = arith.constant 0 : index
    %92 = vector.load %arg6[%c0_104, %c0_105] : memref<8x4xbf16, #tpu.memory_space<vmem>>, vector<8x4xbf16>
    %93 = arith.truncf %79 : vector<64x8xf32> to vector<64x8xbf16>
    %cst_106 = arith.constant dense<0.000000e+00> : vector<64x4xf32>
    %94 = tpu.matmul %93, %92, %cst_106 {dimension_numbers = #tpu.dot_dimension_numbers<[1], [0], [0], [1], [0, 0, 1, 1], [], []>} : vector<64x8xbf16>, vector<8x4xbf16>, vector<64x4xf32> -> vector<64x4xf32>
    %c0_107 = arith.constant 0 : index
    %c0_108 = arith.constant 0 : index
    %95 = vector.load %arg7[%c0_107, %c0_108] : memref<1x4xf32, #tpu.memory_space<vmem>>, vector<1x4xf32>
    %96 = vector.broadcast %95 : vector<1x4xf32> to vector<64x4xf32>
    %97 = arith.addf %94, %96 : vector<64x4xf32>
    %98 = arith.negf %97 : vector<64x4xf32>
    %99 = math.exp %98 : vector<64x4xf32>
    %cst_109 = arith.constant 1.000000e+00 : f32
    %100 = vector.broadcast %cst_109 : f32 to vector<64x4xf32>
    %101 = arith.addf %100, %99 : vector<64x4xf32>
    %102 = arith.divf %100, %101 : vector<64x4xf32>
    %103 = arith.mulf %97, %102 : vector<64x4xf32>
    %cst_110 = arith.constant 0.000000e+00 : f32
    %104 = vector.broadcast %cst_110 : f32 to vector<10x10x4xf32>
    %c0_111 = arith.constant 0 : index
    %c0_112 = arith.constant 0 : index
    %c0_113 = arith.constant 0 : index
    %105 = vector.load %arg16[%c0_111, %c0_112, %c0_113] : memref<10x10x4xf32, #tpu.memory_space<vmem>>, vector<10x10x4xf32>
    tpu.vector_store %arg16[%c0_111, %c0_112, %c0_113], %104 {strides = array<i32>} : memref<10x10x4xf32, #tpu.memory_space<vmem>>, vector<10x10x4xf32>,
    %c0_114 = arith.constant 0 : index
    %c0_115 = arith.constant 0 : index
    %c0_116 = arith.constant 0 : index
    %106 = vector.load %arg8[%c0_114, %c0_115, %c0_116] : memref<3x4x4xbf16, #tpu.memory_space<vmem>>, vector<1x4x4xbf16>
    %107 = vector.shape_cast %106 : vector<1x4x4xbf16> to vector<4x4xbf16>
    %108 = arith.truncf %91 : vector<64x4xf32> to vector<64x4xbf16>
    %cst_117 = arith.constant dense<0.000000e+00> : vector<64x4xf32>
    %109 = tpu.matmul %108, %107, %cst_117 {dimension_numbers = #tpu.dot_dimension_numbers<[1], [0], [0], [1], [0, 0, 1, 1], [], []>} : vector<64x4xbf16>, vector<4x4xbf16>, vector<64x4xf32> -> vector<64x4xf32>
    %c0_118 = arith.constant 0 : index
    %c0_119 = arith.constant 0 : index
    %c0_120 = arith.constant 0 : index
    %110 = vector.load %arg9[%c0_118, %c0_119, %c0_120] : memref<3x1x4xf32, #tpu.memory_space<vmem>>, vector<1x1x4xf32>
    %111 = vector.shape_cast %110 : vector<1x1x4xf32> to vector<1x4xf32>
    %112 = vector.broadcast %111 : vector<1x4xf32> to vector<64x4xf32>
    %113 = arith.addf %109, %112 : vector<64x4xf32>
    %114 = arith.negf %113 : vector<64x4xf32>
    %115 = math.exp %114 : vector<64x4xf32>
    %cst_121 = arith.constant 1.000000e+00 : f32
    %116 = vector.broadcast %cst_121 : f32 to vector<64x4xf32>
    %117 = arith.addf %116, %115 : vector<64x4xf32>
    %118 = arith.divf %116, %117 : vector<64x4xf32>
    %119 = arith.mulf %113, %118 : vector<64x4xf32>
    %120 = vector.shape_cast %119 : vector<64x4xf32> to vector<8x8x4xf32>
    %c1_122 = arith.constant 1 : index
    %c1_123 = arith.constant 1 : index
    %c0_124 = arith.constant 0 : index
    %121 = vector.load %arg16[%c1_122, %c1_123, %c0_124] : memref<10x10x4xf32, #tpu.memory_space<vmem>>, vector<8x8x4xf32>
    tpu.vector_store %arg16[%c1_122, %c1_123, %c0_124], %120 {strides = array<i32>} : memref<10x10x4xf32, #tpu.memory_space<vmem>>, vector<8x8x4xf32>,
    %c0_125 = arith.constant 0 : index
    %c0_126 = arith.constant 0 : index
    %c0_127 = arith.constant 0 : index
    %122 = vector.load %arg16[%c0_125, %c0_126, %c0_127] : memref<10x10x4xf32, #tpu.memory_space<vmem>>, vector<8x8x4xf32>
    %123 = vector.shape_cast %122 : vector<8x8x4xf32> to vector<64x4xf32>
    %c0_128 = arith.constant 0 : index
    %c0_129 = arith.constant 0 : index
    %c0_130 = arith.constant 0 : index
    %124 = vector.load %arg10[%c0_128, %c0_129, %c0_130] : memref<27x4x4xbf16, #tpu.memory_space<vmem>>, vector<1x4x4xbf16>
    %125 = vector.shape_cast %124 : vector<1x4x4xbf16> to vector<4x4xbf16>
    %126 = arith.truncf %123 : vector<64x4xf32> to vector<64x4xbf16>
    %cst_131 = arith.constant dense<0.000000e+00> : vector<64x4xf32>
    %127 = tpu.matmul %126, %125, %cst_131 {dimension_numbers = #tpu.dot_dimension_numbers<[1], [0], [0], [1], [0, 0, 1, 1], [], []>} : vector<64x4xbf16>, vector<4x4xbf16>, vector<64x4xf32> -> vector<64x4xf32>
    %c0_132 = arith.constant 0 : index
    %c1_133 = arith.constant 1 : index
    %c0_134 = arith.constant 0 : index
    %128 = vector.load %arg16[%c0_132, %c1_133, %c0_134] : memref<10x10x4xf32, #tpu.memory_space<vmem>>, vector<8x8x4xf32>
    %129 = vector.shape_cast %128 : vector<8x8x4xf32> to vector<64x4xf32>
    %c1_135 = arith.constant 1 : index
    %c0_136 = arith.constant 0 : index
    %c0_137 = arith.constant 0 : index
    %130 = vector.load %arg10[%c1_135, %c0_136, %c0_137] : memref<27x4x4xbf16, #tpu.memory_space<vmem>>, vector<1x4x4xbf16>
    %131 = vector.shape_cast %130 : vector<1x4x4xbf16> to vector<4x4xbf16>
    %132 = arith.truncf %129 : vector<64x4xf32> to vector<64x4xbf16>
    %cst_138 = arith.constant dense<0.000000e+00> : vector<64x4xf32>
    %133 = tpu.matmul %132, %131, %cst_138 {dimension_numbers = #tpu.dot_dimension_numbers<[1], [0], [0], [1], [0, 0, 1, 1], [], []>} : vector<64x4xbf16>, vector<4x4xbf16>, vector<64x4xf32> -> vector<64x4xf32>
    %134 = arith.addf %127, %133 : vector<64x4xf32>
    %c0_139 = arith.constant 0 : index
    %c2_140 = arith.constant 2 : index
    %c0_141 = arith.constant 0 : index
    %135 = vector.load %arg16[%c0_139, %c2_140, %c0_141] : memref<10x10x4xf32, #tpu.memory_space<vmem>>, vector<8x8x4xf32>
    %136 = vector.shape_cast %135 : vector<8x8x4xf32> to vector<64x4xf32>
    %c2_142 = arith.constant 2 : index
    %c0_143 = arith.constant 0 : index
    %c0_144 = arith.constant 0 : index
    %137 = vector.load %arg10[%c2_142, %c0_143, %c0_144] : memref<27x4x4xbf16, #tpu.memory_space<vmem>>, vector<1x4x4xbf16>
    %138 = vector.shape_cast %137 : vector<1x4x4xbf16> to vector<4x4xbf16>
    %139 = arith.truncf %136 : vector<64x4xf32> to vector<64x4xbf16>
    %cst_145 = arith.constant dense<0.000000e+00> : vector<64x4xf32>
    %140 = tpu.matmul %139, %138, %cst_145 {dimension_numbers = #tpu.dot_dimension_numbers<[1], [0], [0], [1], [0, 0, 1, 1], [], []>} : vector<64x4xbf16>, vector<4x4xbf16>, vector<64x4xf32> -> vector<64x4xf32>
    %141 = arith.addf %134, %140 : vector<64x4xf32>
    %c1_146 = arith.constant 1 : index
    %c0_147 = arith.constant 0 : index
    %c0_148 = arith.constant 0 : index
    %142 = vector.load %arg16[%c1_146, %c0_147, %c0_148] : memref<10x10x4xf32, #tpu.memory_space<vmem>>, vector<8x8x4xf32>
    %143 = vector.shape_cast %142 : vector<8x8x4xf32> to vector<64x4xf32>
    %c3 = arith.constant 3 : index
    %c0_149 = arith.constant 0 : index
    %c0_150 = arith.constant 0 : index
    %144 = vector.load %arg10[%c3, %c0_149, %c0_150] : memref<27x4x4xbf16, #tpu.memory_space<vmem>>, vector<1x4x4xbf16>
    %145 = vector.shape_cast %144 : vector<1x4x4xbf16> to vector<4x4xbf16>
    %146 = arith.truncf %143 : vector<64x4xf32> to vector<64x4xbf16>
    %cst_151 = arith.constant dense<0.000000e+00> : vector<64x4xf32>
    %147 = tpu.matmul %146, %145, %cst_151 {dimension_numbers = #tpu.dot_dimension_numbers<[1], [0], [0], [1], [0, 0, 1, 1], [], []>} : vector<64x4xbf16>, vector<4x4xbf16>, vector<64x4xf32> -> vector<64x4xf32>
    %148 = arith.addf %141, %147 : vector<64x4xf32>
    %c1_152 = arith.constant 1 : index
    %c1_153 = arith.constant 1 : index
    %c0_154 = arith.constant 0 : index
    %149 = vector.load %arg16[%c1_152, %c1_153, %c0_154] : memref<10x10x4xf32, #tpu.memory_space<vmem>>, vector<8x8x4xf32>
    %150 = vector.shape_cast %149 : vector<8x8x4xf32> to vector<64x4xf32>
    %c4 = arith.constant 4 : index
    %c0_155 = arith.constant 0 : index
    %c0_156 = arith.constant 0 : index
    %151 = vector.load %arg10[%c4, %c0_155, %c0_156] : memref<27x4x4xbf16, #tpu.memory_space<vmem>>, vector<1x4x4xbf16>
    %152 = vector.shape_cast %151 : vector<1x4x4xbf16> to vector<4x4xbf16>
    %153 = arith.truncf %150 : vector<64x4xf32> to vector<64x4xbf16>
    %cst_157 = arith.constant dense<0.000000e+00> : vector<64x4xf32>
    %154 = tpu.matmul %153, %152, %cst_157 {dimension_numbers = #tpu.dot_dimension_numbers<[1], [0], [0], [1], [0, 0, 1, 1], [], []>} : vector<64x4xbf16>, vector<4x4xbf16>, vector<64x4xf32> -> vector<64x4xf32>
    %155 = arith.addf %148, %154 : vector<64x4xf32>
    %c1_158 = arith.constant 1 : index
    %c2_159 = arith.constant 2 : index
    %c0_160 = arith.constant 0 : index
    %156 = vector.load %arg16[%c1_158, %c2_159, %c0_160] : memref<10x10x4xf32, #tpu.memory_space<vmem>>, vector<8x8x4xf32>
    %157 = vector.shape_cast %156 : vector<8x8x4xf32> to vector<64x4xf32>
    %c5 = arith.constant 5 : index
    %c0_161 = arith.constant 0 : index
    %c0_162 = arith.constant 0 : index
    %158 = vector.load %arg10[%c5, %c0_161, %c0_162] : memref<27x4x4xbf16, #tpu.memory_space<vmem>>, vector<1x4x4xbf16>
    %159 = vector.shape_cast %158 : vector<1x4x4xbf16> to vector<4x4xbf16>
    %160 = arith.truncf %157 : vector<64x4xf32> to vector<64x4xbf16>
    %cst_163 = arith.constant dense<0.000000e+00> : vector<64x4xf32>
    %161 = tpu.matmul %160, %159, %cst_163 {dimension_numbers = #tpu.dot_dimension_numbers<[1], [0], [0], [1], [0, 0, 1, 1], [], []>} : vector<64x4xbf16>, vector<4x4xbf16>, vector<64x4xf32> -> vector<64x4xf32>
    %162 = arith.addf %155, %161 : vector<64x4xf32>
    %c2_164 = arith.constant 2 : index
    %c0_165 = arith.constant 0 : index
    %c0_166 = arith.constant 0 : index
    %163 = vector.load %arg16[%c2_164, %c0_165, %c0_166] : memref<10x10x4xf32, #tpu.memory_space<vmem>>, vector<8x8x4xf32>
    %164 = vector.shape_cast %163 : vector<8x8x4xf32> to vector<64x4xf32>
    %c6 = arith.constant 6 : index
    %c0_167 = arith.constant 0 : index
    %c0_168 = arith.constant 0 : index
    %165 = vector.load %arg10[%c6, %c0_167, %c0_168] : memref<27x4x4xbf16, #tpu.memory_space<vmem>>, vector<1x4x4xbf16>
    %166 = vector.shape_cast %165 : vector<1x4x4xbf16> to vector<4x4xbf16>
    %167 = arith.truncf %164 : vector<64x4xf32> to vector<64x4xbf16>
    %cst_169 = arith.constant dense<0.000000e+00> : vector<64x4xf32>
    %168 = tpu.matmul %167, %166, %cst_169 {dimension_numbers = #tpu.dot_dimension_numbers<[1], [0], [0], [1], [0, 0, 1, 1], [], []>} : vector<64x4xbf16>, vector<4x4xbf16>, vector<64x4xf32> -> vector<64x4xf32>
    %169 = arith.addf %162, %168 : vector<64x4xf32>
    %c2_170 = arith.constant 2 : index
    %c1_171 = arith.constant 1 : index
    %c0_172 = arith.constant 0 : index
    %170 = vector.load %arg16[%c2_170, %c1_171, %c0_172] : memref<10x10x4xf32, #tpu.memory_space<vmem>>, vector<8x8x4xf32>
    %171 = vector.shape_cast %170 : vector<8x8x4xf32> to vector<64x4xf32>
    %c7 = arith.constant 7 : index
    %c0_173 = arith.constant 0 : index
    %c0_174 = arith.constant 0 : index
    %172 = vector.load %arg10[%c7, %c0_173, %c0_174] : memref<27x4x4xbf16, #tpu.memory_space<vmem>>, vector<1x4x4xbf16>
    %173 = vector.shape_cast %172 : vector<1x4x4xbf16> to vector<4x4xbf16>
    %174 = arith.truncf %171 : vector<64x4xf32> to vector<64x4xbf16>
    %cst_175 = arith.constant dense<0.000000e+00> : vector<64x4xf32>
    %175 = tpu.matmul %174, %173, %cst_175 {dimension_numbers = #tpu.dot_dimension_numbers<[1], [0], [0], [1], [0, 0, 1, 1], [], []>} : vector<64x4xbf16>, vector<4x4xbf16>, vector<64x4xf32> -> vector<64x4xf32>
    %176 = arith.addf %169, %175 : vector<64x4xf32>
    %c2_176 = arith.constant 2 : index
    %c2_177 = arith.constant 2 : index
    %c0_178 = arith.constant 0 : index
    %177 = vector.load %arg16[%c2_176, %c2_177, %c0_178] : memref<10x10x4xf32, #tpu.memory_space<vmem>>, vector<8x8x4xf32>
    %178 = vector.shape_cast %177 : vector<8x8x4xf32> to vector<64x4xf32>
    %c8 = arith.constant 8 : index
    %c0_179 = arith.constant 0 : index
    %c0_180 = arith.constant 0 : index
    %179 = vector.load %arg10[%c8, %c0_179, %c0_180] : memref<27x4x4xbf16, #tpu.memory_space<vmem>>, vector<1x4x4xbf16>
    %180 = vector.shape_cast %179 : vector<1x4x4xbf16> to vector<4x4xbf16>
    %181 = arith.truncf %178 : vector<64x4xf32> to vector<64x4xbf16>
    %cst_181 = arith.constant dense<0.000000e+00> : vector<64x4xf32>
    %182 = tpu.matmul %181, %180, %cst_181 {dimension_numbers = #tpu.dot_dimension_numbers<[1], [0], [0], [1], [0, 0, 1, 1], [], []>} : vector<64x4xbf16>, vector<4x4xbf16>, vector<64x4xf32> -> vector<64x4xf32>
    %183 = arith.addf %176, %182 : vector<64x4xf32>
    %c0_182 = arith.constant 0 : index
    %c0_183 = arith.constant 0 : index
    %c0_184 = arith.constant 0 : index
    %184 = vector.load %arg11[%c0_182, %c0_183, %c0_184] : memref<3x1x4xf32, #tpu.memory_space<vmem>>, vector<1x1x4xf32>
    %185 = vector.shape_cast %184 : vector<1x1x4xf32> to vector<1x4xf32>
    %186 = vector.broadcast %185 : vector<1x4xf32> to vector<64x4xf32>
    %187 = arith.addf %183, %186 : vector<64x4xf32>
    %188 = arith.negf %187 : vector<64x4xf32>
    %189 = math.exp %188 : vector<64x4xf32>
    %cst_185 = arith.constant 1.000000e+00 : f32
    %190 = vector.broadcast %cst_185 : f32 to vector<64x4xf32>
    %191 = arith.addf %190, %189 : vector<64x4xf32>
    %192 = arith.divf %190, %191 : vector<64x4xf32>
    %193 = arith.mulf %187, %192 : vector<64x4xf32>
    %194 = arith.addf %91, %193 : vector<64x4xf32>
    %c1_186 = arith.constant 1 : index
    %c0_187 = arith.constant 0 : index
    %c0_188 = arith.constant 0 : index
    %195 = vector.load %arg8[%c1_186, %c0_187, %c0_188] : memref<3x4x4xbf16, #tpu.memory_space<vmem>>, vector<1x4x4xbf16>
    %196 = vector.shape_cast %195 : vector<1x4x4xbf16> to vector<4x4xbf16>
    %197 = arith.truncf %194 : vector<64x4xf32> to vector<64x4xbf16>
    %cst_189 = arith.constant dense<0.000000e+00> : vector<64x4xf32>
    %198 = tpu.matmul %197, %196, %cst_189 {dimension_numbers = #tpu.dot_dimension_numbers<[1], [0], [0], [1], [0, 0, 1, 1], [], []>} : vector<64x4xbf16>, vector<4x4xbf16>, vector<64x4xf32> -> vector<64x4xf32>
    %c1_190 = arith.constant 1 : index
    %c0_191 = arith.constant 0 : index
    %c0_192 = arith.constant 0 : index
    %199 = vector.load %arg9[%c1_190, %c0_191, %c0_192] : memref<3x1x4xf32, #tpu.memory_space<vmem>>, vector<1x1x4xf32>
    %200 = vector.shape_cast %199 : vector<1x1x4xf32> to vector<1x4xf32>
    %201 = vector.broadcast %200 : vector<1x4xf32> to vector<64x4xf32>
    %202 = arith.addf %198, %201 : vector<64x4xf32>
    %203 = arith.negf %202 : vector<64x4xf32>
    %204 = math.exp %203 : vector<64x4xf32>
    %cst_193 = arith.constant 1.000000e+00 : f32
    %205 = vector.broadcast %cst_193 : f32 to vector<64x4xf32>
    %206 = arith.addf %205, %204 : vector<64x4xf32>
    %207 = arith.divf %205, %206 : vector<64x4xf32>
    %208 = arith.mulf %202, %207 : vector<64x4xf32>
    %209 = vector.shape_cast %208 : vector<64x4xf32> to vector<8x8x4xf32>
    %c1_194 = arith.constant 1 : index
    %c1_195 = arith.constant 1 : index
    %c0_196 = arith.constant 0 : index
    %210 = vector.load %arg16[%c1_194, %c1_195, %c0_196] : memref<10x10x4xf32, #tpu.memory_space<vmem>>, vector<8x8x4xf32>
    tpu.vector_store %arg16[%c1_194, %c1_195, %c0_196], %209 {strides = array<i32>} : memref<10x10x4xf32, #tpu.memory_space<vmem>>, vector<8x8x4xf32>,
    %c0_197 = arith.constant 0 : index
    %c0_198 = arith.constant 0 : index
    %c0_199 = arith.constant 0 : index
    %211 = vector.load %arg16[%c0_197, %c0_198, %c0_199] : memref<10x10x4xf32, #tpu.memory_space<vmem>>, vector<8x8x4xf32>
    %212 = vector.shape_cast %211 : vector<8x8x4xf32> to vector<64x4xf32>
    %c9 = arith.constant 9 : index
    %c0_200 = arith.constant 0 : index
    %c0_201 = arith.constant 0 : index
    %213 = vector.load %arg10[%c9, %c0_200, %c0_201] : memref<27x4x4xbf16, #tpu.memory_space<vmem>>, vector<1x4x4xbf16>
    %214 = vector.shape_cast %213 : vector<1x4x4xbf16> to vector<4x4xbf16>
    %215 = arith.truncf %212 : vector<64x4xf32> to vector<64x4xbf16>
    %cst_202 = arith.constant dense<0.000000e+00> : vector<64x4xf32>
    %216 = tpu.matmul %215, %214, %cst_202 {dimension_numbers = #tpu.dot_dimension_numbers<[1], [0], [0], [1], [0, 0, 1, 1], [], []>} : vector<64x4xbf16>, vector<4x4xbf16>, vector<64x4xf32> -> vector<64x4xf32>
    %c0_203 = arith.constant 0 : index
    %c1_204 = arith.constant 1 : index
    %c0_205 = arith.constant 0 : index
    %217 = vector.load %arg16[%c0_203, %c1_204, %c0_205] : memref<10x10x4xf32, #tpu.memory_space<vmem>>, vector<8x8x4xf32>
    %218 = vector.shape_cast %217 : vector<8x8x4xf32> to vector<64x4xf32>
    %c10 = arith.constant 10 : index
    %c0_206 = arith.constant 0 : index
    %c0_207 = arith.constant 0 : index
    %219 = vector.load %arg10[%c10, %c0_206, %c0_207] : memref<27x4x4xbf16, #tpu.memory_space<vmem>>, vector<1x4x4xbf16>
    %220 = vector.shape_cast %219 : vector<1x4x4xbf16> to vector<4x4xbf16>
    %221 = arith.truncf %218 : vector<64x4xf32> to vector<64x4xbf16>
    %cst_208 = arith.constant dense<0.000000e+00> : vector<64x4xf32>
    %222 = tpu.matmul %221, %220, %cst_208 {dimension_numbers = #tpu.dot_dimension_numbers<[1], [0], [0], [1], [0, 0, 1, 1], [], []>} : vector<64x4xbf16>, vector<4x4xbf16>, vector<64x4xf32> -> vector<64x4xf32>
    %223 = arith.addf %216, %222 : vector<64x4xf32>
    %c0_209 = arith.constant 0 : index
    %c2_210 = arith.constant 2 : index
    %c0_211 = arith.constant 0 : index
    %224 = vector.load %arg16[%c0_209, %c2_210, %c0_211] : memref<10x10x4xf32, #tpu.memory_space<vmem>>, vector<8x8x4xf32>
    %225 = vector.shape_cast %224 : vector<8x8x4xf32> to vector<64x4xf32>
    %c11 = arith.constant 11 : index
    %c0_212 = arith.constant 0 : index
    %c0_213 = arith.constant 0 : index
    %226 = vector.load %arg10[%c11, %c0_212, %c0_213] : memref<27x4x4xbf16, #tpu.memory_space<vmem>>, vector<1x4x4xbf16>
    %227 = vector.shape_cast %226 : vector<1x4x4xbf16> to vector<4x4xbf16>
    %228 = arith.truncf %225 : vector<64x4xf32> to vector<64x4xbf16>
    %cst_214 = arith.constant dense<0.000000e+00> : vector<64x4xf32>
    %229 = tpu.matmul %228, %227, %cst_214 {dimension_numbers = #tpu.dot_dimension_numbers<[1], [0], [0], [1], [0, 0, 1, 1], [], []>} : vector<64x4xbf16>, vector<4x4xbf16>, vector<64x4xf32> -> vector<64x4xf32>
    %230 = arith.addf %223, %229 : vector<64x4xf32>
    %c1_215 = arith.constant 1 : index
    %c0_216 = arith.constant 0 : index
    %c0_217 = arith.constant 0 : index
    %231 = vector.load %arg16[%c1_215, %c0_216, %c0_217] : memref<10x10x4xf32, #tpu.memory_space<vmem>>, vector<8x8x4xf32>
    %232 = vector.shape_cast %231 : vector<8x8x4xf32> to vector<64x4xf32>
    %c12 = arith.constant 12 : index
    %c0_218 = arith.constant 0 : index
    %c0_219 = arith.constant 0 : index
    %233 = vector.load %arg10[%c12, %c0_218, %c0_219] : memref<27x4x4xbf16, #tpu.memory_space<vmem>>, vector<1x4x4xbf16>
    %234 = vector.shape_cast %233 : vector<1x4x4xbf16> to vector<4x4xbf16>
    %235 = arith.truncf %232 : vector<64x4xf32> to vector<64x4xbf16>
    %cst_220 = arith.constant dense<0.000000e+00> : vector<64x4xf32>
    %236 = tpu.matmul %235, %234, %cst_220 {dimension_numbers = #tpu.dot_dimension_numbers<[1], [0], [0], [1], [0, 0, 1, 1], [], []>} : vector<64x4xbf16>, vector<4x4xbf16>, vector<64x4xf32> -> vector<64x4xf32>
    %237 = arith.addf %230, %236 : vector<64x4xf32>
    %c1_221 = arith.constant 1 : index
    %c1_222 = arith.constant 1 : index
    %c0_223 = arith.constant 0 : index
    %238 = vector.load %arg16[%c1_221, %c1_222, %c0_223] : memref<10x10x4xf32, #tpu.memory_space<vmem>>, vector<8x8x4xf32>
    %239 = vector.shape_cast %238 : vector<8x8x4xf32> to vector<64x4xf32>
    %c13 = arith.constant 13 : index
    %c0_224 = arith.constant 0 : index
    %c0_225 = arith.constant 0 : index
    %240 = vector.load %arg10[%c13, %c0_224, %c0_225] : memref<27x4x4xbf16, #tpu.memory_space<vmem>>, vector<1x4x4xbf16>
    %241 = vector.shape_cast %240 : vector<1x4x4xbf16> to vector<4x4xbf16>
    %242 = arith.truncf %239 : vector<64x4xf32> to vector<64x4xbf16>
    %cst_226 = arith.constant dense<0.000000e+00> : vector<64x4xf32>
    %243 = tpu.matmul %242, %241, %cst_226 {dimension_numbers = #tpu.dot_dimension_numbers<[1], [0], [0], [1], [0, 0, 1, 1], [], []>} : vector<64x4xbf16>, vector<4x4xbf16>, vector<64x4xf32> -> vector<64x4xf32>
    %244 = arith.addf %237, %243 : vector<64x4xf32>
    %c1_227 = arith.constant 1 : index
    %c2_228 = arith.constant 2 : index
    %c0_229 = arith.constant 0 : index
    %245 = vector.load %arg16[%c1_227, %c2_228, %c0_229] : memref<10x10x4xf32, #tpu.memory_space<vmem>>, vector<8x8x4xf32>
    %246 = vector.shape_cast %245 : vector<8x8x4xf32> to vector<64x4xf32>
    %c14 = arith.constant 14 : index
    %c0_230 = arith.constant 0 : index
    %c0_231 = arith.constant 0 : index
    %247 = vector.load %arg10[%c14, %c0_230, %c0_231] : memref<27x4x4xbf16, #tpu.memory_space<vmem>>, vector<1x4x4xbf16>
    %248 = vector.shape_cast %247 : vector<1x4x4xbf16> to vector<4x4xbf16>
    %249 = arith.truncf %246 : vector<64x4xf32> to vector<64x4xbf16>
    %cst_232 = arith.constant dense<0.000000e+00> : vector<64x4xf32>
    %250 = tpu.matmul %249, %248, %cst_232 {dimension_numbers = #tpu.dot_dimension_numbers<[1], [0], [0], [1], [0, 0, 1, 1], [], []>} : vector<64x4xbf16>, vector<4x4xbf16>, vector<64x4xf32> -> vector<64x4xf32>
    %251 = arith.addf %244, %250 : vector<64x4xf32>
    %c2_233 = arith.constant 2 : index
    %c0_234 = arith.constant 0 : index
    %c0_235 = arith.constant 0 : index
    %252 = vector.load %arg16[%c2_233, %c0_234, %c0_235] : memref<10x10x4xf32, #tpu.memory_space<vmem>>, vector<8x8x4xf32>
    %253 = vector.shape_cast %252 : vector<8x8x4xf32> to vector<64x4xf32>
    %c15 = arith.constant 15 : index
    %c0_236 = arith.constant 0 : index
    %c0_237 = arith.constant 0 : index
    %254 = vector.load %arg10[%c15, %c0_236, %c0_237] : memref<27x4x4xbf16, #tpu.memory_space<vmem>>, vector<1x4x4xbf16>
    %255 = vector.shape_cast %254 : vector<1x4x4xbf16> to vector<4x4xbf16>
    %256 = arith.truncf %253 : vector<64x4xf32> to vector<64x4xbf16>
    %cst_238 = arith.constant dense<0.000000e+00> : vector<64x4xf32>
    %257 = tpu.matmul %256, %255, %cst_238 {dimension_numbers = #tpu.dot_dimension_numbers<[1], [0], [0], [1], [0, 0, 1, 1], [], []>} : vector<64x4xbf16>, vector<4x4xbf16>, vector<64x4xf32> -> vector<64x4xf32>
    %258 = arith.addf %251, %257 : vector<64x4xf32>
    %c2_239 = arith.constant 2 : index
    %c1_240 = arith.constant 1 : index
    %c0_241 = arith.constant 0 : index
    %259 = vector.load %arg16[%c2_239, %c1_240, %c0_241] : memref<10x10x4xf32, #tpu.memory_space<vmem>>, vector<8x8x4xf32>
    %260 = vector.shape_cast %259 : vector<8x8x4xf32> to vector<64x4xf32>
    %c16 = arith.constant 16 : index
    %c0_242 = arith.constant 0 : index
    %c0_243 = arith.constant 0 : index
    %261 = vector.load %arg10[%c16, %c0_242, %c0_243] : memref<27x4x4xbf16, #tpu.memory_space<vmem>>, vector<1x4x4xbf16>
    %262 = vector.shape_cast %261 : vector<1x4x4xbf16> to vector<4x4xbf16>
    %263 = arith.truncf %260 : vector<64x4xf32> to vector<64x4xbf16>
    %cst_244 = arith.constant dense<0.000000e+00> : vector<64x4xf32>
    %264 = tpu.matmul %263, %262, %cst_244 {dimension_numbers = #tpu.dot_dimension_numbers<[1], [0], [0], [1], [0, 0, 1, 1], [], []>} : vector<64x4xbf16>, vector<4x4xbf16>, vector<64x4xf32> -> vector<64x4xf32>
    %265 = arith.addf %258, %264 : vector<64x4xf32>
    %c2_245 = arith.constant 2 : index
    %c2_246 = arith.constant 2 : index
    %c0_247 = arith.constant 0 : index
    %266 = vector.load %arg16[%c2_245, %c2_246, %c0_247] : memref<10x10x4xf32, #tpu.memory_space<vmem>>, vector<8x8x4xf32>
    %267 = vector.shape_cast %266 : vector<8x8x4xf32> to vector<64x4xf32>
    %c17 = arith.constant 17 : index
    %c0_248 = arith.constant 0 : index
    %c0_249 = arith.constant 0 : index
    %268 = vector.load %arg10[%c17, %c0_248, %c0_249] : memref<27x4x4xbf16, #tpu.memory_space<vmem>>, vector<1x4x4xbf16>
    %269 = vector.shape_cast %268 : vector<1x4x4xbf16> to vector<4x4xbf16>
    %270 = arith.truncf %267 : vector<64x4xf32> to vector<64x4xbf16>
    %cst_250 = arith.constant dense<0.000000e+00> : vector<64x4xf32>
    %271 = tpu.matmul %270, %269, %cst_250 {dimension_numbers = #tpu.dot_dimension_numbers<[1], [0], [0], [1], [0, 0, 1, 1], [], []>} : vector<64x4xbf16>, vector<4x4xbf16>, vector<64x4xf32> -> vector<64x4xf32>
    %272 = arith.addf %265, %271 : vector<64x4xf32>
    %c1_251 = arith.constant 1 : index
    %c0_252 = arith.constant 0 : index
    %c0_253 = arith.constant 0 : index
    %273 = vector.load %arg11[%c1_251, %c0_252, %c0_253] : memref<3x1x4xf32, #tpu.memory_space<vmem>>, vector<1x1x4xf32>
    %274 = vector.shape_cast %273 : vector<1x1x4xf32> to vector<1x4xf32>
    %275 = vector.broadcast %274 : vector<1x4xf32> to vector<64x4xf32>
    %276 = arith.addf %272, %275 : vector<64x4xf32>
    %277 = arith.negf %276 : vector<64x4xf32>
    %278 = math.exp %277 : vector<64x4xf32>
    %cst_254 = arith.constant 1.000000e+00 : f32
    %279 = vector.broadcast %cst_254 : f32 to vector<64x4xf32>
    %280 = arith.addf %279, %278 : vector<64x4xf32>
    %281 = arith.divf %279, %280 : vector<64x4xf32>
    %282 = arith.mulf %276, %281 : vector<64x4xf32>
    %283 = arith.addf %194, %282 : vector<64x4xf32>
    %c2_255 = arith.constant 2 : index
    %c0_256 = arith.constant 0 : index
    %c0_257 = arith.constant 0 : index
    %284 = vector.load %arg8[%c2_255, %c0_256, %c0_257] : memref<3x4x4xbf16, #tpu.memory_space<vmem>>, vector<1x4x4xbf16>
    %285 = vector.shape_cast %284 : vector<1x4x4xbf16> to vector<4x4xbf16>
    %286 = arith.truncf %283 : vector<64x4xf32> to vector<64x4xbf16>
    %cst_258 = arith.constant dense<0.000000e+00> : vector<64x4xf32>
    %287 = tpu.matmul %286, %285, %cst_258 {dimension_numbers = #tpu.dot_dimension_numbers<[1], [0], [0], [1], [0, 0, 1, 1], [], []>} : vector<64x4xbf16>, vector<4x4xbf16>, vector<64x4xf32> -> vector<64x4xf32>
    %c2_259 = arith.constant 2 : index
    %c0_260 = arith.constant 0 : index
    %c0_261 = arith.constant 0 : index
    %288 = vector.load %arg9[%c2_259, %c0_260, %c0_261] : memref<3x1x4xf32, #tpu.memory_space<vmem>>, vector<1x1x4xf32>
    %289 = vector.shape_cast %288 : vector<1x1x4xf32> to vector<1x4xf32>
    %290 = vector.broadcast %289 : vector<1x4xf32> to vector<64x4xf32>
    %291 = arith.addf %287, %290 : vector<64x4xf32>
    %292 = arith.negf %291 : vector<64x4xf32>
    %293 = math.exp %292 : vector<64x4xf32>
    %cst_262 = arith.constant 1.000000e+00 : f32
    %294 = vector.broadcast %cst_262 : f32 to vector<64x4xf32>
    %295 = arith.addf %294, %293 : vector<64x4xf32>
    %296 = arith.divf %294, %295 : vector<64x4xf32>
    %297 = arith.mulf %291, %296 : vector<64x4xf32>
    %298 = vector.shape_cast %297 : vector<64x4xf32> to vector<8x8x4xf32>
    %c1_263 = arith.constant 1 : index
    %c1_264 = arith.constant 1 : index
    %c0_265 = arith.constant 0 : index
    %299 = vector.load %arg16[%c1_263, %c1_264, %c0_265] : memref<10x10x4xf32, #tpu.memory_space<vmem>>, vector<8x8x4xf32>
    tpu.vector_store %arg16[%c1_263, %c1_264, %c0_265], %298 {strides = array<i32>} : memref<10x10x4xf32, #tpu.memory_space<vmem>>, vector<8x8x4xf32>,
    %c0_266 = arith.constant 0 : index
    %c0_267 = arith.constant 0 : index
    %c0_268 = arith.constant 0 : index
    %300 = vector.load %arg16[%c0_266, %c0_267, %c0_268] : memref<10x10x4xf32, #tpu.memory_space<vmem>>, vector<8x8x4xf32>
    %301 = vector.shape_cast %300 : vector<8x8x4xf32> to vector<64x4xf32>
    %c18 = arith.constant 18 : index
    %c0_269 = arith.constant 0 : index
    %c0_270 = arith.constant 0 : index
    %302 = vector.load %arg10[%c18, %c0_269, %c0_270] : memref<27x4x4xbf16, #tpu.memory_space<vmem>>, vector<1x4x4xbf16>
    %303 = vector.shape_cast %302 : vector<1x4x4xbf16> to vector<4x4xbf16>
    %304 = arith.truncf %301 : vector<64x4xf32> to vector<64x4xbf16>
    %cst_271 = arith.constant dense<0.000000e+00> : vector<64x4xf32>
    %305 = tpu.matmul %304, %303, %cst_271 {dimension_numbers = #tpu.dot_dimension_numbers<[1], [0], [0], [1], [0, 0, 1, 1], [], []>} : vector<64x4xbf16>, vector<4x4xbf16>, vector<64x4xf32> -> vector<64x4xf32>
    %c0_272 = arith.constant 0 : index
    %c1_273 = arith.constant 1 : index
    %c0_274 = arith.constant 0 : index
    %306 = vector.load %arg16[%c0_272, %c1_273, %c0_274] : memref<10x10x4xf32, #tpu.memory_space<vmem>>, vector<8x8x4xf32>
    %307 = vector.shape_cast %306 : vector<8x8x4xf32> to vector<64x4xf32>
    %c19 = arith.constant 19 : index
    %c0_275 = arith.constant 0 : index
    %c0_276 = arith.constant 0 : index
    %308 = vector.load %arg10[%c19, %c0_275, %c0_276] : memref<27x4x4xbf16, #tpu.memory_space<vmem>>, vector<1x4x4xbf16>
    %309 = vector.shape_cast %308 : vector<1x4x4xbf16> to vector<4x4xbf16>
    %310 = arith.truncf %307 : vector<64x4xf32> to vector<64x4xbf16>
    %cst_277 = arith.constant dense<0.000000e+00> : vector<64x4xf32>
    %311 = tpu.matmul %310, %309, %cst_277 {dimension_numbers = #tpu.dot_dimension_numbers<[1], [0], [0], [1], [0, 0, 1, 1], [], []>} : vector<64x4xbf16>, vector<4x4xbf16>, vector<64x4xf32> -> vector<64x4xf32>
    %312 = arith.addf %305, %311 : vector<64x4xf32>
    %c0_278 = arith.constant 0 : index
    %c2_279 = arith.constant 2 : index
    %c0_280 = arith.constant 0 : index
    %313 = vector.load %arg16[%c0_278, %c2_279, %c0_280] : memref<10x10x4xf32, #tpu.memory_space<vmem>>, vector<8x8x4xf32>
    %314 = vector.shape_cast %313 : vector<8x8x4xf32> to vector<64x4xf32>
    %c20 = arith.constant 20 : index
    %c0_281 = arith.constant 0 : index
    %c0_282 = arith.constant 0 : index
    %315 = vector.load %arg10[%c20, %c0_281, %c0_282] : memref<27x4x4xbf16, #tpu.memory_space<vmem>>, vector<1x4x4xbf16>
    %316 = vector.shape_cast %315 : vector<1x4x4xbf16> to vector<4x4xbf16>
    %317 = arith.truncf %314 : vector<64x4xf32> to vector<64x4xbf16>
    %cst_283 = arith.constant dense<0.000000e+00> : vector<64x4xf32>
    %318 = tpu.matmul %317, %316, %cst_283 {dimension_numbers = #tpu.dot_dimension_numbers<[1], [0], [0], [1], [0, 0, 1, 1], [], []>} : vector<64x4xbf16>, vector<4x4xbf16>, vector<64x4xf32> -> vector<64x4xf32>
    %319 = arith.addf %312, %318 : vector<64x4xf32>
    %c1_284 = arith.constant 1 : index
    %c0_285 = arith.constant 0 : index
    %c0_286 = arith.constant 0 : index
    %320 = vector.load %arg16[%c1_284, %c0_285, %c0_286] : memref<10x10x4xf32, #tpu.memory_space<vmem>>, vector<8x8x4xf32>
    %321 = vector.shape_cast %320 : vector<8x8x4xf32> to vector<64x4xf32>
    %c21 = arith.constant 21 : index
    %c0_287 = arith.constant 0 : index
    %c0_288 = arith.constant 0 : index
    %322 = vector.load %arg10[%c21, %c0_287, %c0_288] : memref<27x4x4xbf16, #tpu.memory_space<vmem>>, vector<1x4x4xbf16>
    %323 = vector.shape_cast %322 : vector<1x4x4xbf16> to vector<4x4xbf16>
    %324 = arith.truncf %321 : vector<64x4xf32> to vector<64x4xbf16>
    %cst_289 = arith.constant dense<0.000000e+00> : vector<64x4xf32>
    %325 = tpu.matmul %324, %323, %cst_289 {dimension_numbers = #tpu.dot_dimension_numbers<[1], [0], [0], [1], [0, 0, 1, 1], [], []>} : vector<64x4xbf16>, vector<4x4xbf16>, vector<64x4xf32> -> vector<64x4xf32>
    %326 = arith.addf %319, %325 : vector<64x4xf32>
    %c1_290 = arith.constant 1 : index
    %c1_291 = arith.constant 1 : index
    %c0_292 = arith.constant 0 : index
    %327 = vector.load %arg16[%c1_290, %c1_291, %c0_292] : memref<10x10x4xf32, #tpu.memory_space<vmem>>, vector<8x8x4xf32>
    %328 = vector.shape_cast %327 : vector<8x8x4xf32> to vector<64x4xf32>
    %c22 = arith.constant 22 : index
    %c0_293 = arith.constant 0 : index
    %c0_294 = arith.constant 0 : index
    %329 = vector.load %arg10[%c22, %c0_293, %c0_294] : memref<27x4x4xbf16, #tpu.memory_space<vmem>>, vector<1x4x4xbf16>
    %330 = vector.shape_cast %329 : vector<1x4x4xbf16> to vector<4x4xbf16>
    %331 = arith.truncf %328 : vector<64x4xf32> to vector<64x4xbf16>
    %cst_295 = arith.constant dense<0.000000e+00> : vector<64x4xf32>
    %332 = tpu.matmul %331, %330, %cst_295 {dimension_numbers = #tpu.dot_dimension_numbers<[1], [0], [0], [1], [0, 0, 1, 1], [], []>} : vector<64x4xbf16>, vector<4x4xbf16>, vector<64x4xf32> -> vector<64x4xf32>
    %333 = arith.addf %326, %332 : vector<64x4xf32>
    %c1_296 = arith.constant 1 : index
    %c2_297 = arith.constant 2 : index
    %c0_298 = arith.constant 0 : index
    %334 = vector.load %arg16[%c1_296, %c2_297, %c0_298] : memref<10x10x4xf32, #tpu.memory_space<vmem>>, vector<8x8x4xf32>
    %335 = vector.shape_cast %334 : vector<8x8x4xf32> to vector<64x4xf32>
    %c23 = arith.constant 23 : index
    %c0_299 = arith.constant 0 : index
    %c0_300 = arith.constant 0 : index
    %336 = vector.load %arg10[%c23, %c0_299, %c0_300] : memref<27x4x4xbf16, #tpu.memory_space<vmem>>, vector<1x4x4xbf16>
    %337 = vector.shape_cast %336 : vector<1x4x4xbf16> to vector<4x4xbf16>
    %338 = arith.truncf %335 : vector<64x4xf32> to vector<64x4xbf16>
    %cst_301 = arith.constant dense<0.000000e+00> : vector<64x4xf32>
    %339 = tpu.matmul %338, %337, %cst_301 {dimension_numbers = #tpu.dot_dimension_numbers<[1], [0], [0], [1], [0, 0, 1, 1], [], []>} : vector<64x4xbf16>, vector<4x4xbf16>, vector<64x4xf32> -> vector<64x4xf32>
    %340 = arith.addf %333, %339 : vector<64x4xf32>
    %c2_302 = arith.constant 2 : index
    %c0_303 = arith.constant 0 : index
    %c0_304 = arith.constant 0 : index
    %341 = vector.load %arg16[%c2_302, %c0_303, %c0_304] : memref<10x10x4xf32, #tpu.memory_space<vmem>>, vector<8x8x4xf32>
    %342 = vector.shape_cast %341 : vector<8x8x4xf32> to vector<64x4xf32>
    %c24 = arith.constant 24 : index
    %c0_305 = arith.constant 0 : index
    %c0_306 = arith.constant 0 : index
    %343 = vector.load %arg10[%c24, %c0_305, %c0_306] : memref<27x4x4xbf16, #tpu.memory_space<vmem>>, vector<1x4x4xbf16>
    %344 = vector.shape_cast %343 : vector<1x4x4xbf16> to vector<4x4xbf16>
    %345 = arith.truncf %342 : vector<64x4xf32> to vector<64x4xbf16>
    %cst_307 = arith.constant dense<0.000000e+00> : vector<64x4xf32>
    %346 = tpu.matmul %345, %344, %cst_307 {dimension_numbers = #tpu.dot_dimension_numbers<[1], [0], [0], [1], [0, 0, 1, 1], [], []>} : vector<64x4xbf16>, vector<4x4xbf16>, vector<64x4xf32> -> vector<64x4xf32>
    %347 = arith.addf %340, %346 : vector<64x4xf32>
    %c2_308 = arith.constant 2 : index
    %c1_309 = arith.constant 1 : index
    %c0_310 = arith.constant 0 : index
    %348 = vector.load %arg16[%c2_308, %c1_309, %c0_310] : memref<10x10x4xf32, #tpu.memory_space<vmem>>, vector<8x8x4xf32>
    %349 = vector.shape_cast %348 : vector<8x8x4xf32> to vector<64x4xf32>
    %c25 = arith.constant 25 : index
    %c0_311 = arith.constant 0 : index
    %c0_312 = arith.constant 0 : index
    %350 = vector.load %arg10[%c25, %c0_311, %c0_312] : memref<27x4x4xbf16, #tpu.memory_space<vmem>>, vector<1x4x4xbf16>
    %351 = vector.shape_cast %350 : vector<1x4x4xbf16> to vector<4x4xbf16>
    %352 = arith.truncf %349 : vector<64x4xf32> to vector<64x4xbf16>
    %cst_313 = arith.constant dense<0.000000e+00> : vector<64x4xf32>
    %353 = tpu.matmul %352, %351, %cst_313 {dimension_numbers = #tpu.dot_dimension_numbers<[1], [0], [0], [1], [0, 0, 1, 1], [], []>} : vector<64x4xbf16>, vector<4x4xbf16>, vector<64x4xf32> -> vector<64x4xf32>
    %354 = arith.addf %347, %353 : vector<64x4xf32>
    %c2_314 = arith.constant 2 : index
    %c2_315 = arith.constant 2 : index
    %c0_316 = arith.constant 0 : index
    %355 = vector.load %arg16[%c2_314, %c2_315, %c0_316] : memref<10x10x4xf32, #tpu.memory_space<vmem>>, vector<8x8x4xf32>
    %356 = vector.shape_cast %355 : vector<8x8x4xf32> to vector<64x4xf32>
    %c26 = arith.constant 26 : index
    %c0_317 = arith.constant 0 : index
    %c0_318 = arith.constant 0 : index
    %357 = vector.load %arg10[%c26, %c0_317, %c0_318] : memref<27x4x4xbf16, #tpu.memory_space<vmem>>, vector<1x4x4xbf16>
    %358 = vector.shape_cast %357 : vector<1x4x4xbf16> to vector<4x4xbf16>
    %359 = arith.truncf %356 : vector<64x4xf32> to vector<64x4xbf16>
    %cst_319 = arith.constant dense<0.000000e+00> : vector<64x4xf32>
    %360 = tpu.matmul %359, %358, %cst_319 {dimension_numbers = #tpu.dot_dimension_numbers<[1], [0], [0], [1], [0, 0, 1, 1], [], []>} : vector<64x4xbf16>, vector<4x4xbf16>, vector<64x4xf32> -> vector<64x4xf32>
    %361 = arith.addf %354, %360 : vector<64x4xf32>
    %c2_320 = arith.constant 2 : index
    %c0_321 = arith.constant 0 : index
    %c0_322 = arith.constant 0 : index
    %362 = vector.load %arg11[%c2_320, %c0_321, %c0_322] : memref<3x1x4xf32, #tpu.memory_space<vmem>>, vector<1x1x4xf32>
    %363 = vector.shape_cast %362 : vector<1x1x4xf32> to vector<1x4xf32>
    %364 = vector.broadcast %363 : vector<1x4xf32> to vector<64x4xf32>
    %365 = arith.addf %361, %364 : vector<64x4xf32>
    %366 = arith.negf %365 : vector<64x4xf32>
    %367 = math.exp %366 : vector<64x4xf32>
    %cst_323 = arith.constant 1.000000e+00 : f32
    %368 = vector.broadcast %cst_323 : f32 to vector<64x4xf32>
    %369 = arith.addf %368, %367 : vector<64x4xf32>
    %370 = arith.divf %368, %369 : vector<64x4xf32>
    %371 = arith.mulf %365, %370 : vector<64x4xf32>
    %372 = arith.addf %283, %371 : vector<64x4xf32>
    %c0_324 = arith.constant 0 : index
    %c0_325 = arith.constant 0 : index
    %373 = vector.load %arg12[%c0_324, %c0_325] : memref<4x8xbf16, #tpu.memory_space<vmem>>, vector<4x8xbf16>
    %374 = arith.truncf %372 : vector<64x4xf32> to vector<64x4xbf16>
    %cst_326 = arith.constant dense<0.000000e+00> : vector<64x8xf32>
    %375 = tpu.matmul %374, %373, %cst_326 {dimension_numbers = #tpu.dot_dimension_numbers<[1], [0], [0], [1], [0, 0, 1, 1], [], []>} : vector<64x4xbf16>, vector<4x8xbf16>, vector<64x8xf32> -> vector<64x8xf32>
    %c0_327 = arith.constant 0 : index
    %c0_328 = arith.constant 0 : index
    %376 = vector.load %arg13[%c0_327, %c0_328] : memref<4x8xbf16, #tpu.memory_space<vmem>>, vector<4x8xbf16>
    %377 = arith.truncf %103 : vector<64x4xf32> to vector<64x4xbf16>
    %cst_329 = arith.constant dense<0.000000e+00> : vector<64x8xf32>
    %378 = tpu.matmul %377, %376, %cst_329 {dimension_numbers = #tpu.dot_dimension_numbers<[1], [0], [0], [1], [0, 0, 1, 1], [], []>} : vector<64x4xbf16>, vector<4x8xbf16>, vector<64x8xf32> -> vector<64x8xf32>
    %379 = arith.addf %375, %378 : vector<64x8xf32>
    %c0_330 = arith.constant 0 : index
    %c0_331 = arith.constant 0 : index
    %380 = vector.load %arg14[%c0_330, %c0_331] : memref<1x8xf32, #tpu.memory_space<vmem>>, vector<1x8xf32>
    %381 = vector.broadcast %380 : vector<1x8xf32> to vector<64x8xf32>
    %382 = arith.addf %379, %381 : vector<64x8xf32>
    %383 = arith.negf %382 : vector<64x8xf32>
    %384 = math.exp %383 : vector<64x8xf32>
    %cst_332 = arith.constant 1.000000e+00 : f32
    %385 = vector.broadcast %cst_332 : f32 to vector<64x8xf32>
    %386 = arith.addf %385, %384 : vector<64x8xf32>
    %387 = arith.divf %385, %386 : vector<64x8xf32>
    %388 = arith.mulf %382, %387 : vector<64x8xf32>
    %c0_333 = arith.constant 0 : index
    %c0_334 = arith.constant 0 : index
    %c0_335 = arith.constant 0 : index
    %389 = vector.load %arg15[%c0_333, %c0_334, %c0_335] : memref<1x64x8xf32, #tpu.memory_space<vmem>>, vector<1x64x8xf32>
    %390 = vector.shape_cast %389 : vector<1x64x8xf32> to vector<64x8xf32>
    %391 = vector.shape_cast %388 : vector<64x8xf32> to vector<1x64x8xf32>
    tpu.vector_store %arg15[%c0_333, %c0_334, %c0_335], %391 {strides = array<i32>} : memref<1x64x8xf32, #tpu.memory_space<vmem>>, vector<1x64x8xf32>,
    return
  }
  func.func @transform_0(%arg0: i32) -> (i32, i32, i32, i32, i32, i32) {
    %c0_i32 = arith.constant 0 : i32
    %c0_i32_0 = arith.constant 0 : i32
    %c0_i32_1 = arith.constant 0 : i32
    %c0_i32_2 = arith.constant 0 : i32
    %c0_i32_3 = arith.constant 0 : i32
    %c0_i32_4 = arith.constant 0 : i32
    return %arg0, %c0_i32, %c0_i32_0, %c0_i32_1, %c0_i32_2, %c0_i32_3 : i32, i32, i32, i32, i32, i32
  }
  func.func @transform_1(%arg0: i32) -> (i32, i32, i32, i32) {
    %c0_i32 = arith.constant 0 : i32
    %c0_i32_0 = arith.constant 0 : i32
    %c0_i32_1 = arith.constant 0 : i32
    %c0_i32_2 = arith.constant 0 : i32
    %c0_i32_3 = arith.constant 0 : i32
    return %c0_i32, %c0_i32_0, %c0_i32_1, %c0_i32_2 : i32, i32, i32, i32
  }
  func.func @transform_2(%arg0: i32) -> (i32, i32) {
    %c0_i32 = arith.constant 0 : i32
    %c0_i32_0 = arith.constant 0 : i32
    %c0_i32_1 = arith.constant 0 : i32
    return %c0_i32, %c0_i32_0 : i32, i32
  }
  func.func @transform_3(%arg0: i32) -> (i32, i32) {
    %c0_i32 = arith.constant 0 : i32
    %c0_i32_0 = arith.constant 0 : i32
    %c0_i32_1 = arith.constant 0 : i32
    return %c0_i32, %c0_i32_0 : i32, i32
  }
  func.func @transform_4(%arg0: i32) -> (i32, i32) {
    %c0_i32 = arith.constant 0 : i32
    %c0_i32_0 = arith.constant 0 : i32
    %c0_i32_1 = arith.constant 0 : i32
    return %c0_i32, %c0_i32_0 : i32, i32
  }
  func.func @transform_5(%arg0: i32) -> (i32, i32) {
    %c0_i32 = arith.constant 0 : i32
    %c0_i32_0 = arith.constant 0 : i32
    %c0_i32_1 = arith.constant 0 : i32
    return %c0_i32, %c0_i32_0 : i32, i32
  }
  func.func @transform_6(%arg0: i32) -> (i32, i32) {
    %c0_i32 = arith.constant 0 : i32
    %c0_i32_0 = arith.constant 0 : i32
    %c0_i32_1 = arith.constant 0 : i32
    return %c0_i32, %c0_i32_0 : i32, i32
  }
  func.func @transform_7(%arg0: i32) -> (i32, i32, i32) {
    %c0_i32 = arith.constant 0 : i32
    %c0_i32_0 = arith.constant 0 : i32
    %c0_i32_1 = arith.constant 0 : i32
    %c0_i32_2 = arith.constant 0 : i32
    return %c0_i32, %c0_i32_0, %c0_i32_1 : i32, i32, i32
  }
  func.func @transform_8(%arg0: i32) -> (i32, i32, i32) {
    %c0_i32 = arith.constant 0 : i32
    %c0_i32_0 = arith.constant 0 : i32
    %c0_i32_1 = arith.constant 0 : i32
    %c0_i32_2 = arith.constant 0 : i32
    return %c0_i32, %c0_i32_0, %c0_i32_1 : i32, i32, i32
  }
  func.func @transform_9(%arg0: i32) -> (i32, i32, i32) {
    %c0_i32 = arith.constant 0 : i32
    %c0_i32_0 = arith.constant 0 : i32
    %c0_i32_1 = arith.constant 0 : i32
    %c0_i32_2 = arith.constant 0 : i32
    return %c0_i32, %c0_i32_0, %c0_i32_1 : i32, i32, i32
  }
  func.func @transform_10(%arg0: i32) -> (i32, i32, i32) {
    %c0_i32 = arith.constant 0 : i32
    %c0_i32_0 = arith.constant 0 : i32
    %c0_i32_1 = arith.constant 0 : i32
    %c0_i32_2 = arith.constant 0 : i32
    return %c0_i32, %c0_i32_0, %c0_i32_1 : i32, i32, i32
  }
  func.func @transform_11(%arg0: i32) -> (i32, i32) {
    %c0_i32 = arith.constant 0 : i32
    %c0_i32_0 = arith.constant 0 : i32
    %c0_i32_1 = arith.constant 0 : i32
    return %c0_i32, %c0_i32_0 : i32, i32
  }
  func.func @transform_12(%arg0: i32) -> (i32, i32) {
    %c0_i32 = arith.constant 0 : i32
    %c0_i32_0 = arith.constant 0 : i32
    %c0_i32_1 = arith.constant 0 : i32
    return %c0_i32, %c0_i32_0 : i32, i32
  }
  func.func @transform_13(%arg0: i32) -> (i32, i32) {
    %c0_i32 = arith.constant 0 : i32
    %c0_i32_0 = arith.constant 0 : i32
    %c0_i32_1 = arith.constant 0 : i32
    return %c0_i32, %c0_i32_0 : i32, i32
  }
  func.func @transform_14(%arg0: i32) -> (i32, i32, i32) {
    %c0_i32 = arith.constant 0 : i32
    %c0_i32_0 = arith.constant 0 : i32
    %c0_i32_1 = arith.constant 0 : i32
    return %arg0, %c0_i32, %c0_i32_0 : i32, i32, i32
  }
}

</mosaic_0001>

<bundles_post_ra>
// kernel: down_forward_pallas.1
= control target key start
LH: loop header
LB: loop body
LE: loop exit
PB: predicated region body
PF: predicated region fallthrough
CT: control target
= control target key end

     0   :  { %s5721_s29 = smov 0   ;;  %s7643_s0 = inlined_call_operand.vmem [shape: f32[2,2,2,9,9,4], index: 0, kind: input, shape index: {}]   ;;  %s7644_s1 = inlined_call_operand.vmem [shape: bf16[3,3,4,8], index: 1, kind: input, shape index: {}]   ;;  %s7645_s2 = inlined_call_operand.vmem [shape: f32[1,8], index: 2, kind: input, shape index: {}]   ;;  %s7646_s3 = inlined_call_operand.vmem [shape: bf16[8,4], index: 3, kind: input, shape index: {}]   ;;  %s7647_s4 = inlined_call_operand.vmem [shape: f32[1,4], index: 4, kind: input, shape index: {}]   ;;  %s7648_s5 = inlined_call_operand.vmem [shape: bf16[8,4], index: 5, kind: input, shape index: {}]   ;;  %s7649_s6 = inlined_call_operand.vmem [shape: f32[1,4], index: 6, kind: input, shape index: {}]   ;;  %s7650_s7 = inlined_call_operand.vmem [shape: bf16[3,4,4], index: 7, kind: input, shape index: {}]   ;;  %s7651_s8 = inlined_call_operand.vmem [shape: f32[3,1,4], index: 8, kind: input, shape index: {}]   ;;  %s7652_s9 = inlined_call_operand.vmem [shape: bf16[27,4,4], index: 9, kind: input, shape index: {}]   ;;  %s7653_s10 = inlined_call_operand.vmem [shape: f32[3,1,4], index: 10, kind: input, shape index: {}]   ;;  %s7654_s11 = inlined_call_operand.vmem [shape: bf16[4,8], index: 11, kind: input, shape index: {}]   ;;  %s7655_s12 = inlined_call_operand.vmem [shape: bf16[4,8], index: 12, kind: input, shape index: {}]   ;;  %s7656_s13 = inlined_call_operand.vmem [shape: f32[1,8], index: 13, kind: input, shape index: {}]   ;;  %s7657_s14 = inlined_call_operand.vmem [shape: f32[2,64,8], index: 14, kind: output, shape index: {}]  }
   0x1 LB: > { %s4935_s30 = sadd.s32 4294967295, %s5643_s29   ;;  %p4939_p0 = scmp.ge.s32.totalorder %s5643_s29, 1  ;;  %s5643_s29 = sphi %s5721_s29, %s24_s29  }
   0x2   : > { %p412_p1 = scmp.lt.s32.totalorder %s5643_s29, 3 }
   0x4   : > { %p413_p2 = pnand %p4939_p0, %p412_p1 }
   0x5   : > { %p458_p3 = scmp.lt.s32.totalorder (!%p413_p2), %s4935_s30, 1 }
   0x6   : > { %416 = sbr.rel (%p413_p2) target bundleno = 2131 (0x853), region = 76 }
   0xb   : > { %v4951_v0 = vld [vmem:[%s7644_s1 + $0x2] sm:$0x3]  ;;  %vm510_vm0 = vcmask 1041408   ;;  %v4960_v1 = vld [vmem:[%s7644_s1 + $0x4] sm:$0x3]  ;;  %s7685_s30 = smov (!%p458_p3, %s4935_s30), 1 }
   0xc   : > { %v512_v2 = vsel %vm510_vm0, %v4951_v0, 0  ;;  %v614_v3 = vsel %vm510_vm0, %v4960_v1, 0  ;;  %v4973_v4 = vld [vmem:[%s7644_s1 + $0x6] sm:$0x3]  ;;  %v477_v6 = vld [vmem:[%s7644_s1] sm:$0x3] }
   0xd   : > { %521 = vmatpush.bf16.msra.mxu0 %v512_v2  ;;  %5294 = vmatpush.bf16.msra.mxu3 %v512_v2  ;;  %v681_v5 = vsel %vm510_vm0, %v4973_v4, 0  ;;  %v556_v7 = vsel %vm510_vm0, %v477_v6, 0  ;;  %s5297_s23 = smul.u32 576, %s7685_s30  ;;  %vm497_vm1 = vcmask 31744   ;;  %v4986_v29 = vld [vmem:[%s7644_s1 + $0x8] sm:$0x3] }
   0xe   : > { %5296 = vmatpush.bf16.msra.mxu2 %v614_v3  ;;  %5295 = vmatpush.bf16.msra.mxu1 %v556_v7  ;;  %v748_v33 = vsel %vm510_vm0, %v4986_v29, 0  ;;  %v5025_v34 = vld [vmem:[%s7644_s1 + $0xe] sm:$0x3]  ;;  %v5012_v35 = vld [vmem:[%s7644_s1 + $0xc] sm:$0x3]  ;;  %vm1247_vm2 = vcmask 1043456  }
   0xf   : > { %s5751_s26 = scalar_lea.vmem %s7643_s0, %s5297_s23  ;;  %v4999_v36 = vld [vmem:[%s7644_s1 + $0xa] sm:$0x3]  ;;  %v948_v37 = vsel %vm510_vm0, %v5025_v34, 0  ;;  %v881_v38 = vsel %vm510_vm0, %v5012_v35, 0  ;;  %v5038_v49 = vld [vmem:[%s7644_s1 + $0x10] sm:$0x3] }
  0x10   : > { %v4943_v8 = vld [vmem:[%s5751_s26 + $0x90] sm:$0xff]  ;;  %v5755_v9 = vld [vmem:[%s5751_s26 + $0xa0] sm:$0xff]  ;;  %v814_v39 = vsel %vm510_vm0, %v4999_v36, 0  ;;  %v1014_v53 = vsel %vm510_vm0, %v5038_v49, 0  ;;  %vm1234_vm11 = vcmask 64512   ;;  %s5293_s27 = sshll.u32 %s7685_s30, 6 }
  0x11   : > { %690 = vmatpush.bf16.msrb.mxu3 %v681_v5  ;;  %565 = vmatpush.bf16.msrb.mxu0 %v556_v7  ;;  %v5758_v10 = vld [vmem:[%s5751_s26 + $0xb0] sm:$0xff]  ;;  %v493_v11 = vpack.c.bf16 %v5755_v9, %v4943_v8  ;;  %v5762_v12 = vld [vmem:[%s5751_s26 + $0xc0] sm:$0xff]  ;;  %s7599_s16 = scalar_lea.vmem %s7657_s14, %s5293_s27 }
  0x12   : > { %v5765_v13 = vld [vmem:[%s5751_s26 + $0x21] sm:$0xff]  ;;  %v5768_v14 = vld [vmem:[%s5751_s26 + $0x31] sm:$0xff]  ;;  %v494_v15 = vpack.c.bf16 %v5762_v12, %v5758_v10  ;;  %890 = vmatpush.bf16.msrb.mxu2 %v881_v38  ;;  %823 = vmatpush.bf16.msrb.mxu1 %v814_v39 }
  0x13   : > { %v598_v16 = vpack.c.bf16 %v5768_v14, %v5765_v13  ;;  %v5775_v17 = vld [vmem:[%s5751_s26 + $0x20] sm:$0xff]  ;;  %v5778_v18 = vld [vmem:[%s5751_s26 + $0x30] sm:$0xff]  ;;  %4952 = vmatmul.msk.bf16.vlgmr.msra.gmra.mxu0 %vm497_vm1, %v493_v11 }
  0x14   : > { %v479_v19 = vpack.c.bf16 %v5778_v18, %v5775_v17  ;;  %4953 = vmatmul.msk.bf16.vlgmr.msra.gmra.mxu3 %vm497_vm1, %v494_v15  ;;  %v5787_v20 = vld [vmem:[%s5751_s26 + $0xd0] sm:$0xff]  ;;  %v469_v21 = vld [vmem:[%s5751_s26] sm:$0xff] }
  0x15   : > { %4962 = vmatmul.msk.bf16.vlgmr.msra.gmra.mxu2 %vm497_vm1, %v598_v16  ;;  %623 = vmatpush.bf16.msra.mxu0 %v614_v3  ;;  %v470_v22 = vld [vmem:[%s5751_s26 + $0x10] sm:$0xff]  ;;  %v5792_v23 = vld [vmem:[%s5751_s26 + $0xe0] sm:$0xff]  ;;  %v932_v49 = vpack.c.bf16 %v5787_v20, %v5762_v12 }
  0x16   : > { %4957 = vmatmul.msk.bf16.vlgmr.msra.gmra.mxu1 %vm497_vm1, %v479_v19  ;;  %v5795_v24 = vld [vmem:[%s5751_s26 + $0x41] sm:$0xff]  ;;  %v5798_v25 = vld [vmem:[%s5751_s26 + $0x51] sm:$0xff]  ;;  %v478_v28 = vpack.c.bf16 %v470_v22, %v469_v21  ;;  %v495_v30 = vpack.c.bf16 %v5792_v23, %v5787_v20  ;;  %957 = vmatpush.bf16.msra.mxu3 %v948_v37  ;;  %v864_v62 = vpack.c.bf16 %v5775_v17, %v470_v22 }
  0x17   : > { %v5801_v26 = vld [vmem:[%s5751_s26 + $0x40] sm:$0xff]  ;;  %v5804_v27 = vld [vmem:[%s5751_s26 + $0x50] sm:$0xff]  ;;  %v599_v31 = vpack.c.bf16 %v5798_v25, %v5795_v24 }
  0x18   : > { %v480_v32 = vpack.c.bf16 %v5804_v27, %v5801_v26  ;;  %v5833_v40 = vld [vmem:[%s5751_s26 + $0xf0] sm:$0xff]  ;;  %v587_v41 = vld [vmem:[%s5751_s26 + $0x1] sm:$0xff]  ;;  %v865_v8 = vpack.c.bf16 %v5801_v26, %v5778_v18 }
  0x19   : > { %v5837_v42 = vld [vmem:[%s5751_s26 + $0x11] sm:$0xff]  ;;  %v5840_v43 = vld [vmem:[%s5751_s26 + $0x100] sm:$0xff] }
  0x1a   : > { %v5843_v44 = vld [vmem:[%s5751_s26 + $0x61] sm:$0xff]  ;;  %v5846_v45 = vld [vmem:[%s5751_s26 + $0x71] sm:$0xff]  ;;  %v597_v48 = vpack.c.bf16 %v5837_v42, %v587_v41  ;;  %v496_v50 = vpack.c.bf16 %v5840_v43, %v5833_v40  ;;  %v997_v41 = vpack.c.bf16 %v5765_v13, %v5837_v42 }
  0x1b   : > { %v475_v46 = vld [vmem:[%s5751_s26 + $0x60] sm:$0xff]  ;;  %v5850_v47 = vld [vmem:[%s5751_s26 + $0x70] sm:$0xff]  ;;  %v600_v51 = vpack.c.bf16 %v5846_v45, %v5843_v44  ;;  %v999_v12 = vpack.c.bf16 %v5843_v44, %v5798_v25 }
  0x1c   : > { %v481_v52 = vpack.c.bf16 %v5850_v47, %v475_v46  ;;  %v4978_v54 = vld [vmem:[%s5751_s26 + $0x1b0] sm:$0xff]  ;;  %v4979_v55 = vld [vmem:[%s5751_s26 + $0x1c0] sm:$0xff] }
  0x1d   : > { %v4965_v56 = vld [vmem:[%s5751_s26 + $0x120] sm:$0xff]  ;;  %v4966_v57 = vld [vmem:[%s5751_s26 + $0x130] sm:$0xff]  ;;  %v731_v60 = vpack.c.bf16 %v4979_v55, %v4978_v54 }
  0x1e   : > { %v4991_v58 = vld [vmem:[%s5751_s26 + $0x121] sm:$0xff]  ;;  %v4992_v59 = vld [vmem:[%s5751_s26 + $0x131] sm:$0xff]  ;;  %v664_v61 = vpack.c.bf16 %v4966_v57, %v4965_v56 }
  0x1f   : > { %v797_v63 = vpack.c.bf16 %v4992_v59, %v4991_v58  ;;  %v4980_v0 = vld [vmem:[%s5751_s26 + $0x1d0] sm:$0xff]  ;;  %v4981_v1 = vld [vmem:[%s5751_s26 + $0x1e0] sm:$0xff] }
  0x20   : > { %v4967_v2 = vld [vmem:[%s5751_s26 + $0x140] sm:$0xff]  ;;  %v4968_v3 = vld [vmem:[%s5751_s26 + $0x150] sm:$0xff]  ;;  %v732_v6 = vpack.c.bf16 %v4981_v1, %v4980_v0 }
  0x21   : > { %v4993_v4 = vld [vmem:[%s5751_s26 + $0x141] sm:$0xff]  ;;  %v4994_v5 = vld [vmem:[%s5751_s26 + $0x151] sm:$0xff]  ;;  %v665_v7 = vpack.c.bf16 %v4968_v3, %v4967_v2 }
  0x22   : > { %v798_v11 = vpack.c.bf16 %v4994_v5, %v4993_v4  ;;  %v4982_v15 = vld [vmem:[%s5751_s26 + $0x1f0] sm:$0xff]  ;;  %v4983_v16 = vld [vmem:[%s5751_s26 + $0x200] sm:$0xff] }
  0x23   : > { %4956 = vmatmul.msk.bf16.vlgmr.msrb.gmra.mxu0 %vm497_vm1, %v478_v28  ;;  %v4969_v17 = vld [vmem:[%s5751_s26 + $0x160] sm:$0xff]  ;;  %v4970_v19 = vld [vmem:[%s5751_s26 + $0x170] sm:$0xff]  ;;  %v733_v22 = vpack.c.bf16 %v4983_v16, %v4982_v15  ;;  %v866_v28 = vpack.c.bf16 %v475_v46, %v5804_v27  ;;  %v931_v46 = vpack.c.bf16 %v5758_v10, %v5755_v9 }
  0x24   : > { %4954 = vmatmul.msk.bf16.gmra.mxu3 %vm497_vm1, %v495_v30  ;;  %757 = vmatpush.bf16.msrb.mxu0 %v748_v33  ;;  %v4995_v18 = vld [vmem:[%s5751_s26 + $0x161] sm:$0xff]  ;;  %v4996_v21 = vld [vmem:[%s5751_s26 + $0x171] sm:$0xff]  ;;  %v666_v26 = vpack.c.bf16 %v4970_v19, %v4969_v17 }
  0x25   : > { %4963 = vmatmul.msk.bf16.gmra.mxu2 %vm497_vm1, %v599_v31  ;;  %v799_v29 = vpack.c.bf16 %v4996_v21, %v4995_v18  ;;  %v4984_v30 = vld [vmem:[%s5751_s26 + $0x210] sm:$0xff]  ;;  %v4985_v31 = vld [vmem:[%s5751_s26 + $0x220] sm:$0xff] }
  0x26   : > { %4958 = vmatmul.msk.bf16.gmra.mxu1 %vm497_vm1, %v480_v32  ;;  %v4971_v32 = vld [vmem:[%s5751_s26 + $0x180] sm:$0xff]  ;;  %v4972_v33 = vld [vmem:[%s5751_s26 + $0x190] sm:$0xff]  ;;  %v734_v37 = vpack.c.bf16 %v4985_v31, %v4984_v30 }
  0x27   : > { %v5011_v34 = vld [vmem:[%s5751_s26 + $0x80] sm:$0xff]  ;;  %v4998_v36 = vld [vmem:[%s5751_s26 + $0x191] sm:$0xff]  ;;  %v667_v38 = vpack.c.bf16 %v4972_v33, %v4971_v32 }
  0x28   : > { %v4997_v35 = vld [vmem:[%s5751_s26 + $0x181] sm:$0xff]  ;;  %v867_v27 = vpack.c.bf16 %v5011_v34, %v5850_v47  ;;  %v998_v47 = vpack.c.bf16 %v5795_v24, %v5768_v14  ;;  %v933_v24 = vpack.c.bf16 %v5833_v40, %v5792_v23 }
  0x29   : > { %v800_v39 = vpack.c.bf16 %v4998_v36, %v4997_v35  ;;  %v1225_v18 = vld [vmem:[%s7646_s3] sm:$0xf] }
  0x33   : > { %4961 = vmatmul.msk.bf16.vlgmr.msra.gmra.mxu0 %vm497_vm1, %v597_v48 }
  0x34   : > { %4955 = vmatmul.msk.bf16.gmra.mxu3 %vm497_vm1, %v496_v50  ;;  %1023 = vmatpush.bf16.msra.mxu0 %v1014_v53 }
  0x35   : > { %4964 = vmatmul.msk.bf16.gmra.mxu2 %vm497_vm1, %v600_v51 }
  0x36   : > { %4959 = vmatmul.msk.bf16.gmra.mxu1 %vm497_vm1, %v481_v52 }
  0x43   : > { %4987 = vmatmul.msk.bf16.vlgmr.msrb.gmra.mxu0 %vm497_vm1, %v731_v60 }
  0x44   : > { %4974 = vmatmul.msk.bf16.vlgmr.msrb.gmra.mxu3 %vm497_vm1, %v664_v61 }
  0x45   : > { %5013 = vmatmul.msk.bf16.vlgmr.msrb.gmra.mxu2 %vm497_vm1, %v864_v62  ;;  %v5037_v62 = vld [vmem:[%s5751_s26 + $0x81] sm:$0xff] }
  0x46   : > { %5000 = vmatmul.msk.bf16.vlgmr.msrb.gmra.mxu1 %vm497_vm1, %v797_v63  ;;  %v5024_v63 = vld [vmem:[%s5751_s26 + $0x110] sm:$0xff]  ;;  %v1000_v23 = vpack.c.bf16 %v5037_v62, %v5846_v45  ;;  %v5976_v62 = vld [vmem:[%s7645_s2] ss:$0 sm:$0xff] }
  0x47   : > { %v934_v0 = vpack.c.bf16 %v5024_v63, %v5840_v43 }
  0x53   : > { %4988 = vmatmul.msk.bf16.gmra.mxu0 %vm497_vm1, %v732_v6 }
  0x54   : > { %4975 = vmatmul.msk.bf16.gmra.mxu3 %vm497_vm1, %v665_v7 }
  0x55   : > { %5014 = vmatmul.msk.bf16.gmra.mxu2 %vm497_vm1, %v865_v8 }
  0x56   : > { %5001 = vmatmul.msk.bf16.gmra.mxu1 %vm497_vm1, %v798_v11 }
  0x63   : > { %4989 = vmatmul.msk.bf16.gmra.mxu0 %vm497_vm1, %v733_v22  ;;  %v1249_v22 = vsel %vm1247_vm2, %v1225_v18, 0 }
  0x64   : > { %4976 = vmatmul.msk.bf16.gmra.mxu3 %vm497_vm1, %v666_v26  ;;  %1258 = vmatpush.bf16.msra.mxu1 %v1249_v22 }
  0x65   : > { %5015 = vmatmul.msk.bf16.gmra.mxu2 %vm497_vm1, %v866_v28 }
  0x66   : > { %5002 = vmatmul.msk.bf16.gmra.mxu1 %vm497_vm1, %v799_v29 }
  0x73   : > { %4990 = vmatmul.msk.bf16.gmra.mxu0 %vm497_vm1, %v734_v37 }
  0x74   : > { %4977 = vmatmul.msk.bf16.gmra.mxu3 %vm497_vm1, %v667_v38 }
  0x75   : > { %5016 = vmatmul.msk.bf16.gmra.mxu2 %vm497_vm1, %v867_v27 }
  0x76   : > { %5003 = vmatmul.msk.bf16.gmra.mxu1 %vm497_vm1, %v800_v39 }
  0x83   : > { %5039 = vmatmul.msk.bf16.vlgmr.msra.gmra.mxu0 %vm497_vm1, %v997_v41 }
  0x84   : > { %5026 = vmatmul.msk.bf16.vlgmr.msra.gmra.mxu3 %vm497_vm1, %v931_v46 }
  0x90   : > { %v523_v48 = vpop.f32.mrf.mxu0 }
  0x93   : > { %v572_v50 = vpop.f32.mrf.mxu1  ;;  %5040 = vmatmul.msk.bf16.gmra.mxu0 %vm497_vm1, %v998_v47 }
  0x94   : > { %5027 = vmatmul.msk.bf16.gmra.mxu3 %vm497_vm1, %v932_v49 }
  0x97   : > { %v528_v13 = vpop.f32.mrf.mxu3 }
  0x98   : > { %v630_v42 = vpop.f32.mrf.mxu2  ;;  %v573_v51 = vadd.f32 %v572_v50, %v528_v13  ;;  %v5924_v9 = vpop.f32.mrf.mxu0 }
  0x9a   : > { %v647_v10 = vadd.f32 %v630_v42, %v573_v51 }
  0x9b   : > { %v5926_v52 = vpop.f32.mrf.mxu1 }
  0x9f   : > { %v5928_v53 = vpop.f32.mrf.mxu3 }
  0xa0   : > { %v5930_v14 = vpop.f32.mrf.mxu2  ;;  %v567_v20 = vpop.f32.mrf.mxu0 }
  0xa1   : > { %v568_v54 = vadd.f32 %v567_v20, %v523_v48 }
  0xa3   : > { %v577_v55 = vpop.f32.mrf.mxu1  ;;  %5041 = vmatmul.msk.bf16.gmra.mxu0 %vm497_vm1, %v999_v12 }
  0xa4   : > { %5028 = vmatmul.msk.bf16.gmra.mxu3 %vm497_vm1, %v933_v24 }
  0xa7   : > { %v533_v56 = vpop.f32.mrf.mxu3 }
  0xa8   : > { %v635_v57 = vpop.f32.mrf.mxu2  ;;  %v578_v58 = vadd.f32 %v577_v55, %v533_v56  ;;  %v569_v59 = vpop.f32.mrf.mxu0 }
  0xa9   : > { %v570_v13 = vadd.f32 %v569_v59, %v5924_v9 }
  0xaa   : > { %v649_v60 = vadd.f32 %v635_v57, %v578_v58 }
  0xab   : > { %v5938_v61 = vpop.f32.mrf.mxu1 }
  0xaf   : > { %v5942_v25 = vpop.f32.mrf.mxu3 }
  0xb0   : > { %v5944_v44 = vpop.f32.mrf.mxu2  ;;  %v625_v40 = vpop.f32.mrf.mxu0 }
  0xb1   : > { %v645_v1 = vadd.f32 %v625_v40, %v568_v54 }
  0xb3   : > { %5042 = vmatmul.msk.bf16.gmra.mxu0 %vm497_vm1, %v1000_v23  ;;  %v582_v2 = vpop.f32.mrf.mxu1  ;;  %v575_v23 = vadd.f32 %v5926_v52, %v5928_v53  ;;  %v1440_v52 = vld [vmem:[%s7648_s5] sm:$0xf] }
  0xb4   : > { %5029 = vmatmul.msk.bf16.gmra.mxu3 %vm497_vm1, %v934_v0 }
  0xb7   : > { %v538_v3 = vpop.f32.mrf.mxu3 }
  0xb8   : > { %v640_v4 = vpop.f32.mrf.mxu2  ;;  %v583_v5 = vadd.f32 %v582_v2, %v538_v3  ;;  %v627_v6 = vpop.f32.mrf.mxu0 }
  0xba   : > { %v651_v7 = vadd.f32 %v640_v4, %v583_v5  ;;  %v648_v4 = vadd.f32 %v5930_v14, %v575_v23 }
  0xbb   : > { %v5956_v33 = vpop.f32.mrf.mxu1 }
  0xbf   : > { %v5950_v8 = vpop.f32.mrf.mxu3 }
  0xc0   : > { %v759_v11 = vpop.f32.mrf.mxu0  ;;  %v5962_v37 = vpop.f32.mrf.mxu2 }
  0xc3   : > { %v825_v27 = vpop.f32.mrf.mxu1 }
  0xc7   : > { %v692_v15 = vpop.f32.mrf.mxu3 }
  0xc8   : > { %v712_v16 = vadd.f32 %v692_v15, %v645_v1  ;;  %v761_v45 = vpop.f32.mrf.mxu0  ;;  %v892_v41 = vpop.f32.mrf.mxu2 }
  0xca   : > { %v779_v17 = vadd.f32 %v759_v11, %v712_v16 }
  0xcb   : > { %v827_v49 = vpop.f32.mrf.mxu1 }
  0xcc   : > { %v845_v20 = vadd.f32 %v825_v27, %v779_v17 }
  0xce   : > { %v912_v55 = vadd.f32 %v892_v41, %v845_v20 }
  0xcf   : > { %v694_v19 = vpop.f32.mrf.mxu3 }
  0xd0   : > { %v764_v43 = vpop.f32.mrf.mxu0  ;;  %v894_v42 = vpop.f32.mrf.mxu2 }
  0xd3   : > { %v830_v54 = vpop.f32.mrf.mxu1 }
  0xd7   : > { %v697_v21 = vpop.f32.mrf.mxu3 }
  0xd8   : > { %v714_v26 = vadd.f32 %v697_v21, %v647_v10  ;;  %v766_v28 = vpop.f32.mrf.mxu0  ;;  %v646_v10 = vadd.f32 %v627_v6, %v570_v13  ;;  %v897_v58 = vpop.f32.mrf.mxu2 }
  0xda   : > { %v781_v29 = vadd.f32 %v764_v43, %v714_v26  ;;  %v713_v24 = vadd.f32 %v694_v19, %v646_v10 }
  0xdb   : > { %v832_v1 = vpop.f32.mrf.mxu1 }
  0xdc   : > { %v780_v56 = vadd.f32 %v761_v45, %v713_v24  ;;  %v1446_v45 = vsel %vm1247_vm2, %v1440_v52, 0 }
  0xdd   : > { %1455 = vmatpush.bf16.msra.mxu2 %v1446_v45 }
  0xde   : > { %v846_v9 = vadd.f32 %v827_v49, %v780_v56 }
  0xdf   : > { %v699_v30 = vpop.f32.mrf.mxu3 }
  0xe0   : > { %v769_v31 = vpop.f32.mrf.mxu0  ;;  %v913_v0 = vadd.f32 %v894_v42, %v846_v9  ;;  %v715_v11 = vadd.f32 %v699_v30, %v648_v4  ;;  %v899_v15 = vpop.f32.mrf.mxu2 }
  0xe2   : > { %v782_v14 = vadd.f32 %v766_v28, %v715_v11 }
  0xe3   : > { %v835_v22 = vpop.f32.mrf.mxu1 }
  0xe4   : > { %v848_v30 = vadd.f32 %v832_v1, %v782_v14 }
  0xe6   : > { %v915_v28 = vadd.f32 %v899_v15, %v848_v30 }
  0xe7   : > { %v702_v32 = vpop.f32.mrf.mxu3 }
  0xe8   : > { %v716_v34 = vadd.f32 %v702_v32, %v649_v60  ;;  %v5958_v35 = vpop.f32.mrf.mxu0  ;;  %v580_v32 = vadd.f32 %v5938_v61, %v5942_v25 }
  0xea   : > { %v5960_v36 = vadd.f32 %v769_v31, %v716_v34  ;;  %v902_v34 = vpop.f32.mrf.mxu2  ;;  %v650_v13 = vadd.f32 %v5944_v44, %v580_v32 }
  0xeb   : > { %v837_v25 = vpop.f32.mrf.mxu1 }
  0xec   : > { %v849_v24 = vadd.f32 %v835_v22, %v5960_v36  ;;  %v585_v36 = vadd.f32 %v5956_v33, %v5950_v8 }
  0xee   : > { %v916_v9 = vadd.f32 %v902_v34, %v849_v24  ;;  %v652_v52 = vadd.f32 %v5962_v37, %v585_v36 }
  0xef   : > { %v5964_v38 = vpop.f32.mrf.mxu3 }
  0xf0   : > { %v774_v39 = vpop.f32.mrf.mxu0  ;;  %v717_v61 = vadd.f32 %v5964_v38, %v650_v13 }
  0xf2   : > { %v784_v44 = vadd.f32 %v5958_v35, %v717_v61 }
  0xf7   : > { %v707_v46 = vpop.f32.mrf.mxu3 }
  0xf8   : > { %v718_v47 = vadd.f32 %v707_v46, %v651_v7  ;;  %v5966_v48 = vpop.f32.mrf.mxu0  ;;  %v847_v7 = vadd.f32 %v830_v54, %v781_v29 }
  0xfa   : > { %v5968_v50 = vadd.f32 %v774_v39, %v718_v47  ;;  %v914_v19 = vadd.f32 %v897_v58, %v847_v7  ;;  %v904_v58 = vpop.f32.mrf.mxu2  ;;  %v840_v7 = vpop.f32.mrf.mxu1 }
  0xfc   : > { %v851_v22 = vadd.f32 %v840_v7, %v5968_v50 }
  0xff   : > { %v5971_v51 = vpop.f32.mrf.mxu3 }
 0x100   : > { %v1025_v12 = vpop.f32.mrf.mxu0 }
 0x107   : > { %v959_v57 = vpop.f32.mrf.mxu3 }
 0x108   : > { %v979_v60 = vadd.f32 %v959_v57, %v912_v55  ;;  %v1027_v63 = vpop.f32.mrf.mxu0 }
 0x10a   : > { %v1045_v59 = vadd.f32 %v1025_v12, %v979_v60 }
 0x10c   : > { %v5981_v40 = vadd.f32 %v5976_v62, %v1045_v59 }
 0x10e   : > { %v5043_v2 = vmul.f32 -1.442695, %v5981_v40 }
 0x10f   : > { %v961_v3 = vpop.f32.mrf.mxu3 }
 0x110   : > { %5317 = vpow2.f32 %v5043_v2  ;;  %v980_v5 = vadd.f32 %v961_v3, %v913_v0  ;;  %v1030_v6 = vpop.f32.mrf.mxu0  ;;  %v850_v3 = vadd.f32 %v837_v25, %v784_v44  ;;  %v842_v25 = vpop.f32.mrf.mxu1 }
 0x112   : > { %v1046_v16 = vadd.f32 %v1027_v63, %v980_v5  ;;  %v917_v14 = vadd.f32 %v904_v58, %v850_v3 }
 0x114   : > { %v5989_v53 = vadd.f32 %v5976_v62, %v1046_v16 }
 0x116   : > { %v5318_v17 = vpop.eup %5317  ;;  %v5044_v43 = vmul.f32 -1.442695, %v5989_v53 }
 0x117   : > { %v1089_v18 = vadd.f32 1.0, %v5318_v17  ;;  %v964_v21 = vpop.f32.mrf.mxu3 }
 0x118   : > { %5319 = vpow2.f32 %v5044_v43  ;;  %v981_v26 = vadd.f32 %v964_v21, %v914_v19  ;;  %v1032_v29 = vpop.f32.mrf.mxu0 }
 0x119   : > { %5321 = vrcp.f32 %v1089_v18  ;;  %v1108_v0 = vand.u32 2147483648, %v1089_v18  ;;  %vm1102_vm4 = vweird.f32 %v1089_v18  ;;  %v1106_v2 = vand.u32 2147483647, %v1089_v18 }
 0x11a   : > { %v1047_v31 = vadd.f32 %v1030_v6, %v981_v26 }
 0x11b   : > { %v1109_v11 = vor.u32 1.1754944e-38, %v1108_v0  ;;  %vm1107_vm7 = vcmp.eq.f32.partialorder %v1106_v2, 8.507059e+37 }
 0x11c   : > { %v5996_v27 = vadd.f32 %v5976_v62, %v1047_v31  ;;  %v907_v31 = vpop.f32.mrf.mxu2 }
 0x11e   : > { %v5320_v39 = vpop.eup %5319  ;;  %v5045_v41 = vmul.f32 -1.442695, %v5996_v27 }
 0x11f   : > { %v5322_v46 = vpop.eup %5321  ;;  %v5999_v47 = vadd.f32 1.0, %v5320_v39  ;;  %v966_v49 = vpop.f32.mrf.mxu3 }
 0x120   : > { %v1098_v42 = vmul.f32 %v5322_v46, %v1089_v18  ;;  %5323 = vpow2.f32 %v5045_v41  ;;  %v982_v10 = vadd.f32 %v966_v49, %v915_v28  ;;  %v1035_v54 = vpop.f32.mrf.mxu0  ;;  %vm1103_vm3 = vweird.f32 %v5322_v46 }
 0x121   : > { %5325 = vrcp.f32 %v5999_v47  ;;  %vm6016_vm5 = vmor %vm1102_vm4, %vm1103_vm3  ;;  %v1123_v8 = vand.u32 2147483648, %v5999_v47  ;;  %v1121_v16 = vand.u32 2147483647, %v5999_v47  ;;  %vm1117_vm8 = vweird.f32 %v5999_v47 }
 0x122   : > { %v1099_v12 = vsub.f32 1.0, %v1098_v42  ;;  %v1048_v20 = vadd.f32 %v1032_v29, %v982_v10  ;;  %v719_v28 = vadd.f32 %v5971_v51, %v652_v52  ;;  %v918_v51 = vadd.f32 %v907_v31, %v851_v22 }
 0x123   : > { %v1124_v26 = vor.u32 1.1754944e-38, %v1123_v8  ;;  %vm1122_vm10 = vcmp.eq.f32.partialorder %v1121_v16, 8.507059e+37 }
 0x124   : > { %v1100_v55 = vmul.f32 %v5322_v46, %v1099_v12  ;;  %v6006_v56 = vadd.f32 %v5976_v62, %v1048_v20  ;;  %v786_v61 = vadd.f32 %v5966_v48, %v719_v28 }
 0x126   : > { %v5324_v57 = vpop.eup %5323  ;;  %v5046_v60 = vmul.f32 -1.442695, %v6006_v56  ;;  %v1101_v59 = vadd.f32 %v5322_v46, %v1100_v55 }
 0x127   : > { %v5326_v63 = vpop.eup %5325  ;;  %v6010_v38 = vadd.f32 1.0, %v5324_v57  ;;  %v969_v23 = vpop.f32.mrf.mxu3  ;;  %v852_v57 = vadd.f32 %v842_v25, %v786_v61 }
 0x128   : > { %v1113_v1 = vmul.f32 %v5326_v63, %v5999_v47  ;;  %5327 = vpow2.f32 %v5046_v60  ;;  %v983_v35 = vadd.f32 %v969_v23, %v916_v9  ;;  %v1105_v6 = vsel %vm6016_vm5, %v5322_v46, %v1101_v59  ;;  %v1037_v17 = vpop.f32.mrf.mxu0  ;;  %v909_v60 = vpop.f32.mrf.mxu2 }
 0x129   : > { %5329 = vrcp.f32 %v6010_v38  ;;  %vm1118_vm6 = vweird.f32 %v5326_v63  ;;  %v1110_v43 = vsel %vm1107_vm7, %v1109_v11, %v1105_v6  ;;  %v1138_v58 = vand.u32 2147483648, %v6010_v38 }
 0x12a   : > { %v1114_v5 = vsub.f32 1.0, %v1113_v1  ;;  %v1049_v33 = vadd.f32 %v1035_v54, %v983_v35  ;;  %vm1119_vm9 = vmor %vm1117_vm8, %vm1118_vm6  ;;  %v1217_v41 = vmul.f32 %v1110_v43, %v5981_v40  ;;  %vm1132_vm13 = vweird.f32 %v6010_v38 }
 0x12b   : > { %v1136_v9 = vand.u32 2147483647, %v6010_v38  ;;  %v919_v35 = vadd.f32 %v909_v60, %v852_v57  ;;  %v1139_v3 = vor.u32 1.1754944e-38, %v1138_v58 }
 0x12c   : > { %v1115_v15 = vmul.f32 %v5326_v63, %v1114_v5  ;;  %v6026_v45 = vadd.f32 %v5976_v62, %v1049_v33 }
 0x12d   : > { %vm1137_vm2 = vcmp.eq.f32.partialorder %v1136_v9, 8.507059e+37 }
 0x12e   : > { %v5328_v19 = vpop.eup %5327  ;;  %v1116_v18 = vadd.f32 %v5326_v63, %v1115_v15  ;;  %v5047_v37 = vmul.f32 -1.442695, %v6026_v45 }
 0x12f   : > { %v6029_v21 = vpop.eup %5329  ;;  %v6032_v29 = vadd.f32 1.0, %v5328_v19  ;;  %v971_v30 = vpop.f32.mrf.mxu3 }
 0x130   : > { %v1120_v32 = vsel %vm1119_vm9, %v5326_v63, %v1116_v18  ;;  %v984_v34 = vadd.f32 %v971_v30, %v917_v14  ;;  %v1128_v39 = vmul.f32 %v6029_v21, %v6010_v38  ;;  %v1040_v12 = vpop.f32.mrf.mxu0  ;;  %vm1133_vm12 = vweird.f32 %v6029_v21 }
 0x131   : > { %v1125_v46 = vsel %vm1122_vm10, %v1124_v26, %v1120_v32  ;;  %5331 = vrcp.f32 %v6032_v29  ;;  %vm6060_vm14 = vmor %vm1132_vm13, %vm1133_vm12  ;;  %v1151_v36 = vand.u32 2147483647, %v6032_v29  ;;  %v1153_v0 = vand.u32 2147483648, %v6032_v29 }
 0x132   : > { %v1218_v50 = vmul.f32 %v1125_v46, %v5989_v53  ;;  %5333 = vpow2.f32 %v5047_v37  ;;  %v1050_v47 = vadd.f32 %v1037_v17, %v984_v34  ;;  %v1129_v49 = vsub.f32 1.0, %v1128_v39 }
 0x133   : > { %vm1147_vm3 = vweird.f32 %v6032_v29  ;;  %v1154_v11 = vor.u32 1.1754944e-38, %v1153_v0  ;;  %vm1152_vm5 = vcmp.eq.f32.partialorder %v1151_v36, 8.507059e+37 }
 0x134   : > { %v1226_v13 = vpack.c.bf16 %v1218_v50, %v1217_v41  ;;  %v6042_v42 = vadd.f32 %v5976_v62, %v1050_v47  ;;  %v1130_v10 = vmul.f32 %v6029_v21, %v1129_v49 }
 0x136   : > { %v5048_v40 = vmul.f32 -1.442695, %v6042_v42  ;;  %5051 = vmatmul.msk.bf16.vlgmr.msra.gmra.mxu1 %vm1234_vm11, %v1226_v13  ;;  %5063 = vmatmul.msk.bf16.vlgmr.msra.gmra.mxu2 %vm1234_vm11, %v1226_v13  ;;  %v1131_v55 = vadd.f32 %v6029_v21, %v1130_v10 }
 0x137   : > { %v5332_v53 = vpop.eup %5331  ;;  %v974_v20 = vpop.f32.mrf.mxu3 }
 0x138   : > { %v5334_v24 = vpop.eup %5333  ;;  %5335 = vpow2.f32 %v5048_v40  ;;  %v985_v54 = vadd.f32 %v974_v20, %v918_v51  ;;  %v1143_v48 = vmul.f32 %v5332_v53, %v6032_v29  ;;  %v1135_v38 = vsel %vm6060_vm14, %v6029_v21, %v1131_v55  ;;  %v1042_v17 = vpop.f32.mrf.mxu0 }
 0x139   : > { %v6052_v44 = vadd.f32 1.0, %v5334_v24  ;;  %vm1148_vm15 = vweird.f32 %v5332_v53  ;;  %v1140_v7 = vsel %vm1137_vm2, %v1139_v3, %v1135_v38 }
 0x13a   : > { %v1051_v63 = vadd.f32 %v1040_v12, %v985_v54  ;;  %v1144_v59 = vsub.f32 1.0, %v1143_v48  ;;  %vm1149_vm4 = vmor %vm1147_vm3, %vm1148_vm15  ;;  %v1219_v43 = vmul.f32 %v1140_v7, %v5996_v27  ;;  %v1658_v27 = vld [vmem:[%s7650_s7] sm:$0x3] }
 0x13b   : > { %5337 = vrcp.f32 %v6052_v44  ;;  %v1680_v34 = vsel %vm510_vm0, %v1658_v27, 0  ;;  %v1168_v28 = vand.u32 2147483648, %v6052_v44  ;;  %vm1162_vm7 = vweird.f32 %v6052_v44 }
 0x13c   : > { %v6067_v1 = vadd.f32 %v5976_v62, %v1051_v63  ;;  %v1145_v2 = vmul.f32 %v5332_v53, %v1144_v59  ;;  %1689 = vmatpush.bf16.msrb.mxu3 %v1680_v34  ;;  %v1166_v41 = vand.u32 2147483647, %v6052_v44 }
 0x13d   : > { %v1169_v10 = vor.u32 1.1754944e-38, %v1168_v28 }
 0x13e   : > { %v5336_v4 = vpop.eup %5335  ;;  %v5049_v5 = vmul.f32 -1.442695, %v6067_v1  ;;  %v1146_v6 = vadd.f32 %v5332_v53, %v1145_v2  ;;  %vm1167_vm10 = vcmp.eq.f32.partialorder %v1166_v41, 8.507059e+37 }
 0x13f   : > { %v1094_v8 = vadd.f32 1.0, %v5336_v4  ;;  %v976_v33 = vpop.f32.mrf.mxu3 }
 0x140   : > { %5339 = vpow2.f32 %v5049_v5  ;;  %v986_v15 = vadd.f32 %v976_v33, %v919_v35  ;;  %v1150_v16 = vsel %vm1149_vm4, %v5332_v53, %v1146_v6 }
 0x141   : > { %v5338_v52 = vpop.eup %5337  ;;  %5341 = vrcp.f32 %v1094_v8  ;;  %v1155_v19 = vsel %vm1152_vm5, %v1154_v11, %v1150_v16  ;;  %v1183_v50 = vand.u32 2147483648, %v1094_v8  ;;  %v1181_v13 = vand.u32 2147483647, %v1094_v8  ;;  %v6101_v11 = vld [vmem:[%s7647_s4] ss:$0 sm:$0xff] }
 0x142   : > { %v1052_v14 = vadd.f32 %v1042_v17, %v986_v15  ;;  %v1220_v18 = vmul.f32 %v1155_v19, %v6006_v56  ;;  %v1158_v21 = vmul.f32 %v5338_v52, %v6052_v44  ;;  %vm1163_vm6 = vweird.f32 %v5338_v52 }
 0x143   : > { %vm1164_vm8 = vmor %vm1162_vm7, %vm1163_vm6  ;;  %vm1177_vm12 = vweird.f32 %v1094_v8  ;;  %v1184_v12 = vor.u32 1.1754944e-38, %v1183_v50  ;;  %vm1182_vm14 = vcmp.eq.f32.partialorder %v1181_v13, 8.507059e+37 }
 0x144   : > { %v6078_v22 = vadd.f32 %v5976_v62, %v1052_v14  ;;  %v1227_v26 = vpack.c.bf16 %v1220_v18, %v1219_v43  ;;  %v1159_v29 = vsub.f32 1.0, %v1158_v21 }
 0x146   : > { %v5340_v37 = vpop.eup %5339  ;;  %v5050_v30 = vmul.f32 -1.442695, %v6078_v22  ;;  %5052 = vmatmul.msk.bf16.gmra.mxu1 %vm1234_vm11, %v1227_v26  ;;  %5064 = vmatmul.msk.bf16.gmra.mxu2 %vm1234_vm11, %v1227_v26  ;;  %v1160_v31 = vmul.f32 %v5338_v52, %v1159_v29 }
 0x147   : > { %v5342_v56 = vpop.eup %5341  ;;  %v1095_v32 = vadd.f32 1.0, %v5340_v37 }
 0x148   : > { %5343 = vpow2.f32 %v5050_v30  ;;  %v1161_v62 = vadd.f32 %v5338_v52, %v1160_v31  ;;  %v1173_v39 = vmul.f32 %v5342_v56, %v1094_v8  ;;  %vm1178_vm9 = vweird.f32 %v5342_v56 }
 0x149   : > { %5345 = vrcp.f32 %v1095_v32  ;;  %vm1179_vm13 = vmor %vm1177_vm12, %vm1178_vm9  ;;  %v1198_v59 = vand.u32 2147483648, %v1095_v32  ;;  %vm1192_vm2 = vweird.f32 %v1095_v32  ;;  %v1196_v23 = vand.u32 2147483647, %v1095_v32 }
 0x14a   : > { %v1174_v46 = vsub.f32 1.0, %v1173_v39  ;;  %v1165_v47 = vsel %vm1164_vm8, %v5338_v52, %v1161_v62 }
 0x14b   : > { %v1170_v53 = vsel %vm1167_vm10, %v1169_v10, %v1165_v47  ;;  %v1199_v2 = vor.u32 1.1754944e-38, %v1198_v59  ;;  %vm1197_vm5 = vcmp.eq.f32.partialorder %v1196_v23, 8.507059e+37 }
 0x14c   : > { %v1175_v49 = vmul.f32 %v5342_v56, %v1174_v46  ;;  %v1221_v55 = vmul.f32 %v1170_v53, %v6026_v45 }
 0x14e   : > { %v5344_v61 = vpop.eup %5343  ;;  %v1176_v51 = vadd.f32 %v5342_v56, %v1175_v49 }
 0x14f   : > { %v5346_v25 = vpop.eup %5345  ;;  %v1096_v40 = vadd.f32 1.0, %v5344_v61 }
 0x150   : > { %v1180_v20 = vsel %vm1179_vm13, %v5342_v56, %v1176_v51  ;;  %v1188_v24 = vmul.f32 %v5346_v25, %v1095_v32  ;;  %vm1193_vm15 = vweird.f32 %v5346_v25 }
 0x151   : > { %5347 = vrcp.f32 %v1096_v40  ;;  %v1185_v54 = vsel %vm1182_vm14, %v1184_v12, %v1180_v20  ;;  %vm1194_vm3 = vmor %vm1192_vm2, %vm1193_vm15  ;;  %v1213_v0 = vand.u32 2147483648, %v1096_v40  ;;  %vm1207_vm6 = vweird.f32 %v1096_v40 }
 0x152   : > { %v1222_v48 = vmul.f32 %v1185_v54, %v6042_v42  ;;  %v1189_v57 = vsub.f32 1.0, %v1188_v24  ;;  %v1211_v42 = vand.u32 2147483647, %v1096_v40 }
 0x153   : > { %v1214_v4 = vor.u32 1.1754944e-38, %v1213_v0 }
 0x154   : > { %v1228_v44 = vpack.c.bf16 %v1222_v48, %v1221_v55  ;;  %v1190_v58 = vmul.f32 %v5346_v25, %v1189_v57  ;;  %vm1212_vm8 = vcmp.eq.f32.partialorder %v1211_v42, 8.507059e+37 }
 0x156   : > { %5053 = vmatmul.msk.bf16.gmra.mxu1 %vm1234_vm11, %v1228_v44  ;;  %5065 = vmatmul.msk.bf16.gmra.mxu2 %vm1234_vm11, %v1228_v44  ;;  %v1191_v63 = vadd.f32 %v5346_v25, %v1190_v58 }
 0x157   : > { %v5348_v60 = vpop.eup %5347 }
 0x158   : > { %v1203_v9 = vmul.f32 %v5348_v60, %v1096_v40  ;;  %v1195_v45 = vsel %vm1194_vm3, %v5346_v25, %v1191_v63  ;;  %vm1208_vm4 = vweird.f32 %v5348_v60 }
 0x159   : > { %v1200_v3 = vsel %vm1197_vm5, %v1199_v2, %v1195_v45  ;;  %vm1209_vm7 = vmor %vm1207_vm6, %vm1208_vm4 }
 0x15a   : > { %v1204_v36 = vsub.f32 1.0, %v1203_v9  ;;  %v1223_v8 = vmul.f32 %v1200_v3, %v6067_v1 }
 0x15c   : > { %v1205_v38 = vmul.f32 %v5348_v60, %v1204_v36 }
 0x15e   : > { %v1206_v35 = vadd.f32 %v5348_v60, %v1205_v38 }
 0x160   : > { %v1210_v5 = vsel %vm1209_vm7, %v5348_v60, %v1206_v35 }
 0x161   : > { %v1215_v6 = vsel %vm1212_vm8, %v1214_v4, %v1210_v5 }
 0x162   : > { %v1224_v33 = vmul.f32 %v1215_v6, %v6078_v22 }
 0x164   : > { %v1229_v7 = vpack.c.bf16 %v1224_v33, %v1223_v8 }
 0x166   : > { %5054 = vmatmul.msk.bf16.gmra.mxu1 %vm1234_vm11, %v1229_v7  ;;  %5066 = vmatmul.msk.bf16.gmra.mxu2 %vm1234_vm11, %v1229_v7 }
 0x1b3   : > { %v1260_v15 = vpop.f32.mrf.mxu1 }
 0x1b4   : > { %v1261_v16 = vadd.f32 %v6101_v11, %v1260_v15 }
 0x1b6   : > { %v5055_v52 = vmul.f32 -1.442695, %v1261_v16 }
 0x1b8   : > { %5349 = vpow2.f32 %v5055_v52 }
 0x1bb   : > { %v1262_v17 = vpop.f32.mrf.mxu1 }
 0x1bc   : > { %v1263_v1 = vadd.f32 %v6101_v11, %v1262_v17 }
 0x1be   : > { %v5350_v19 = vpop.eup %5349  ;;  %v5056_v14 = vmul.f32 -1.442695, %v1263_v1 }
 0x1bf   : > { %v1304_v43 = vadd.f32 1.0, %v5350_v19 }
 0x1c0   : > { %5351 = vpow2.f32 %v5056_v14 }
 0x1c1   : > { %5353 = vrcp.f32 %v1304_v43  ;;  %v1323_v50 = vand.u32 2147483648, %v1304_v43  ;;  %vm1317_vm10 = vweird.f32 %v1304_v43  ;;  %v1321_v47 = vand.u32 2147483647, %v1304_v43 }
 0x1c3   : > { %v1265_v18 = vpop.f32.mrf.mxu1  ;;  %v1324_v53 = vor.u32 1.1754944e-38, %v1323_v50  ;;  %vm1322_vm14 = vcmp.eq.f32.partialorder %v1321_v47, 8.507059e+37 }
 0x1c4   : > { %v6106_v21 = vadd.f32 %v6101_v11, %v1265_v18 }
 0x1c6   : > { %v5352_v22 = vpop.eup %5351  ;;  %v5057_v26 = vmul.f32 -1.442695, %v6106_v21 }
 0x1c7   : > { %v5354_v29 = vpop.eup %5353  ;;  %v1305_v30 = vadd.f32 1.0, %v5352_v22 }
 0x1c8   : > { %v1313_v37 = vmul.f32 %v5354_v29, %v1304_v43  ;;  %5355 = vpow2.f32 %v5057_v26  ;;  %vm1318_vm9 = vweird.f32 %v5354_v29 }
 0x1c9   : > { %5357 = vrcp.f32 %v1305_v30  ;;  %vm1319_vm12 = vmor %vm1317_vm10, %vm1318_vm9  ;;  %v1338_v10 = vand.u32 2147483648, %v1305_v30  ;;  %v1336_v40 = vand.u32 2147483647, %v1305_v30  ;;  %vm1332_vm15 = vweird.f32 %v1305_v30 }
 0x1ca   : > { %v1314_v31 = vsub.f32 1.0, %v1313_v37 }
 0x1cb   : > { %v1267_v27 = vpop.f32.mrf.mxu1  ;;  %v1339_v54 = vor.u32 1.1754944e-38, %v1338_v10  ;;  %vm1337_vm3 = vcmp.eq.f32.partialorder %v1336_v40, 8.507059e+37 }
 0x1cc   : > { %v6110_v56 = vadd.f32 %v6101_v11, %v1267_v27  ;;  %v1315_v32 = vmul.f32 %v5354_v29, %v1314_v31 }
 0x1ce   : > { %v5356_v34 = vpop.eup %5355  ;;  %v5058_v28 = vmul.f32 -1.442695, %v6110_v56  ;;  %v1316_v41 = vadd.f32 %v5354_v29, %v1315_v32 }
 0x1cf   : > { %v5358_v62 = vpop.eup %5357  ;;  %v6112_v39 = vadd.f32 1.0, %v5356_v34 }
 0x1d0   : > { %v1328_v46 = vmul.f32 %v5358_v62, %v1305_v30  ;;  %v1320_v51 = vsel %vm1319_vm12, %v5354_v29, %v1316_v41  ;;  %vm1333_vm13 = vweird.f32 %v5358_v62 }
 0x1d1   : > { %5359 = vrcp.f32 %v6112_v39  ;;  %v1325_v24 = vsel %vm1322_vm14, %v1324_v53, %v1320_v51  ;;  %vm1334_vm2 = vmor %vm1332_vm15, %vm1333_vm13  ;;  %vm1347_vm5 = vweird.f32 %v6112_v39  ;;  %v1353_v4 = vand.u32 2147483648, %v6112_v39 }
 0x1d2   : > { %v1329_v49 = vsub.f32 1.0, %v1328_v46  ;;  %5361 = vpow2.f32 %v5058_v28  ;;  %v6121_v60 = vmul.f32 %v1325_v24, %v1261_v16  ;;  %v1351_v5 = vand.u32 2147483647, %v6112_v39 }
 0x1d3   : > { %v1270_v13 = vpop.f32.mrf.mxu1  ;;  %v1354_v52 = vor.u32 1.1754944e-38, %v1353_v4 }
 0x1d4   : > { %v6117_v61 = vadd.f32 %v6101_v11, %v1270_v13  ;;  %v1330_v25 = vmul.f32 %v5358_v62, %v1329_v49  ;;  %vm1352_vm8 = vcmp.eq.f32.partialorder %v1351_v5, 8.507059e+37  ;;  %v5645_v49 = vmov 0.0  }
 0x1d5   : > { %1640 = vst.msk [vmem:[#allocation2 + $0x10] sm:$0xff] %vm497_vm1, %v5645_v49 }
 0x1d6   : > { %v1331_v12 = vadd.f32 %v5358_v62, %v1330_v25  ;;  %v5059_v55 = vmul.f32 -1.442695, %v6117_v61  ;;  %1637 = vst.msk [vmem:[#allocation2] sm:$0xff] %vm497_vm1, %v5645_v49 }
 0x1d7   : > { %v5360_v20 = vpop.eup %5359  ;;  %1642 = vst.msk [vmem:[#allocation2 + $0x20] sm:$0xff] %vm497_vm1, %v5645_v49 }
 0x1d8   : > { %v1335_v48 = vsel %vm1334_vm2, %v5358_v62, %v1331_v12  ;;  %v1343_v57 = vmul.f32 %v5360_v20, %v6112_v39  ;;  %v5362_v44 = vpop.eup %5361  ;;  %5363 = vpow2.f32 %v5059_v55  ;;  %vm1348_vm4 = vweird.f32 %v5360_v20  ;;  %1644 = vst.msk [vmem:[#allocation2 + $0x30] sm:$0xff] %vm497_vm1, %v5645_v49  ;;  %v5087_v55 = vld [vmem:[%s7652_s9 + $0x2] sm:$0x3] }
 0x1d9   : > { %v1340_v58 = vsel %vm1337_vm3, %v1339_v54, %v1335_v48  ;;  %v1307_v9 = vadd.f32 1.0, %v5362_v44  ;;  %vm1349_vm6 = vmor %vm1347_vm5, %vm1348_vm4  ;;  %1646 = vst.msk [vmem:[#allocation2 + $0x40] sm:$0xff] %vm497_vm1, %v5645_v49 }
 0x1da   : > { %v6123_v63 = vmul.f32 %v1340_v58, %v1263_v1  ;;  %v1344_v23 = vsub.f32 1.0, %v1343_v57  ;;  %1648 = vst.msk [vmem:[#allocation2 + $0x50] sm:$0xff] %vm497_vm1, %v5645_v49 }
 0x1db   : > { %v1272_v59 = vpop.f32.mrf.mxu1  ;;  %5365 = vrcp.f32 %v1307_v9  ;;  %v1368_v33 = vand.u32 2147483648, %v1307_v9  ;;  %v1366_v16 = vand.u32 2147483647, %v1307_v9  ;;  %vm1362_vm9 = vweird.f32 %v1307_v9  ;;  %1650 = vst.msk [vmem:[#allocation2 + $0x60] sm:$0xff] %vm497_vm1, %v5645_v49 }
 0x1dc   : > { %v1659_v36 = vpack.c.bf16 %v6123_v63, %v6121_v60  ;;  %v1345_v0 = vmul.f32 %v5360_v20, %v1344_v23  ;;  %v6135_v8 = vadd.f32 %v6101_v11, %v1272_v59  ;;  %1652 = vst.msk [vmem:[#allocation2 + $0x70] sm:$0xff] %vm497_vm1, %v5645_v49  ;;  %v1920_v23 = vsel %vm510_vm0, %v5087_v55, 0 }
 0x1dd   : > { %v1369_v43 = vor.u32 1.1754944e-38, %v1368_v33  ;;  %vm1367_vm12 = vcmp.eq.f32.partialorder %v1366_v16, 8.507059e+37  ;;  %1654 = vst.msk [vmem:[#allocation2 + $0x80] sm:$0xff] %vm497_vm1, %v5645_v49  ;;  %1929 = vmatpush.bf16.msrb.mxu0 %v1920_v23 }
 0x1de   : > { %5075 = vmatmul.msk.bf16.vlgmr.msrb.gmra.mxu3 %vm497_vm1, %v1659_v36  ;;  %v5364_v45 = vpop.eup %5363  ;;  %v1346_v35 = vadd.f32 %v5360_v20, %v1345_v0  ;;  %v5060_v17 = vmul.f32 -1.442695, %v6135_v8  ;;  %1656 = vst.msk [vmem:[#allocation2 + $0x90] sm:$0xff] %vm497_vm1, %v5645_v49 }
 0x1df   : > { %v6128_v42 = vadd.f32 1.0, %v5364_v45 }
 0x1e0   : > { %v1350_v7 = vsel %vm1349_vm6, %v5360_v20, %v1346_v35 }
 0x1e1   : > { %v5366_v38 = vpop.eup %5365  ;;  %5367 = vrcp.f32 %v6128_v42  ;;  %v1355_v14 = vsel %vm1352_vm8, %v1354_v52, %v1350_v7  ;;  %vm1377_vm14 = vweird.f32 %v6128_v42  ;;  %v1383_v51 = vand.u32 2147483648, %v6128_v42 }
 0x1e2   : > { %v1358_v3 = vmul.f32 %v5366_v38, %v1307_v9  ;;  %vm1363_vm7 = vweird.f32 %v5366_v38  ;;  %5369 = vpow2.f32 %v5060_v17  ;;  %v6143_v30 = vmul.f32 %v1355_v14, %v6106_v21 }
 0x1e3   : > { %v1275_v2 = vpop.f32.mrf.mxu1  ;;  %vm1364_vm10 = vmor %vm1362_vm9, %vm1363_vm7  ;;  %v1381_v40 = vand.u32 2147483647, %v6128_v42  ;;  %v1384_v57 = vor.u32 1.1754944e-38, %v1383_v51  ;;  %vm1638_vm8 = vcmask 25600  }
 0x1e4   : > { %v1359_v6 = vsub.f32 1.0, %v1358_v3  ;;  %v6139_v1 = vadd.f32 %v6101_v11, %v1275_v2  ;;  %1641 = vst.msk [vmem:[#allocation2 + $0x18] sm:$0x3] %vm1638_vm8, %v5645_v49 }
 0x1e5   : > { %vm1382_vm3 = vcmp.eq.f32.partialorder %v1381_v40, 8.507059e+37  ;;  %1639 = vst.msk [vmem:[#allocation2 + $0x8] sm:$0x3] %vm1638_vm8, %v5645_v49 }
 0x1e6   : > { %v1360_v15 = vmul.f32 %v5366_v38, %v1359_v6  ;;  %v5061_v37 = vmul.f32 -1.442695, %v6139_v1  ;;  %1643 = vst.msk [vmem:[#allocation2 + $0x28] sm:$0x3] %vm1638_vm8, %v5645_v49 }
 0x1e7   : > { %v5368_v18 = vpop.eup %5367  ;;  %1645 = vst.msk [vmem:[#allocation2 + $0x38] sm:$0x3] %vm1638_vm8, %v5645_v49 }
 0x1e8   : > { %v1361_v19 = vadd.f32 %v5366_v38, %v1360_v15  ;;  %v1373_v27 = vmul.f32 %v5368_v18, %v6128_v42  ;;  %v5370_v62 = vpop.eup %5369  ;;  %5371 = vpow2.f32 %v5061_v37  ;;  %vm1378_vm13 = vweird.f32 %v5368_v18  ;;  %1647 = vst.msk [vmem:[#allocation2 + $0x48] sm:$0x3] %vm1638_vm8, %v5645_v49 }
 0x1e9   : > { %v1309_v28 = vadd.f32 1.0, %v5370_v62  ;;  %vm6169_vm15 = vmor %vm1377_vm14, %vm1378_vm13  ;;  %1649 = vst.msk [vmem:[#allocation2 + $0x58] sm:$0x3] %vm1638_vm8, %v5645_v49 }
 0x1ea   : > { %v1365_v22 = vsel %vm1364_vm10, %v5366_v38, %v1361_v19  ;;  %v1374_v21 = vsub.f32 1.0, %v1373_v27  ;;  %1651 = vst.msk [vmem:[#allocation2 + $0x68] sm:$0x3] %vm1638_vm8, %v5645_v49  ;;  %v6250_v27 = vld [vmem:[%s7651_s8] ss:$0 sm:$0xff] }
 0x1eb   : > { %v1277_v26 = vpop.f32.mrf.mxu1  ;;  %v1370_v29 = vsel %vm1367_vm12, %v1369_v43, %v1365_v22  ;;  %v1398_v20 = vand.u32 2147483648, %v1309_v28  ;;  %v1396_v54 = vand.u32 2147483647, %v1309_v28  ;;  %vm1392_vm4 = vweird.f32 %v1309_v28  ;;  %1653 = vst.msk [vmem:[#allocation2 + $0x78] sm:$0x3] %vm1638_vm8, %v5645_v49 }
 0x1ec   : > { %v6146_v31 = vmul.f32 %v1370_v29, %v6110_v56  ;;  %v6150_v32 = vadd.f32 %v6101_v11, %v1277_v26  ;;  %v1375_v41 = vmul.f32 %v5368_v18, %v1374_v21  ;;  %1655 = vst.msk [vmem:[#allocation2 + $0x88] sm:$0x3] %vm1638_vm8, %v5645_v49 }
 0x1ed   : > { %v1399_v59 = vor.u32 1.1754944e-38, %v1398_v20  ;;  %vm1397_vm6 = vcmp.eq.f32.partialorder %v1396_v54, 8.507059e+37  ;;  %1657 = vst.msk [vmem:[#allocation2 + $0x98] sm:$0x3] %vm1638_vm8, %v5645_v49  ;;  %v5101_v54 = vld [vmem:[%s7652_s9 + $0x6] sm:$0x3] }
 0x1ee   : > { %v1660_v34 = vpack.c.bf16 %v6146_v31, %v6143_v30  ;;  %v5062_v39 = vmul.f32 -1.442695, %v6150_v32  ;;  %v5372_v56 = vpop.eup %5371  ;;  %v1376_v47 = vadd.f32 %v5368_v18, %v1375_v41  ;;  %v5096_v41 = vld [vmem:[%s7652_s9 + $0x4] sm:$0x3] }
 0x1ef   : > { %v6156_v50 = vadd.f32 1.0, %v5372_v56 }
 0x1f0   : > { %5076 = vmatmul.msk.bf16.gmra.mxu3 %vm497_vm1, %v1660_v34  ;;  %5373 = vpow2.f32 %v5062_v39  ;;  %v1380_v12 = vsel %vm6169_vm15, %v5368_v18, %v1376_v47  ;;  %v2022_v47 = vsel %vm510_vm0, %v5096_v41, 0 }
 0x1f1   : > { %5375 = vrcp.f32 %v1309_v28  ;;  %v1385_v9 = vsel %vm1382_vm3, %v1384_v57, %v1380_v12  ;;  %vm1407_vm10 = vweird.f32 %v6156_v50  ;;  %v1411_v15 = vand.u32 2147483647, %v6156_v50  ;;  %2031 = vmatpush.bf16.msrb.mxu2 %v2022_v47 }
 0x1f2   : > { %5377 = vrcp.f32 %v6156_v50  ;;  %v6197_v42 = vmul.f32 %v1385_v9, %v6117_v61  ;;  %v1413_v61 = vand.u32 2147483648, %v6156_v50  ;;  %v2088_v57 = vsel %vm510_vm0, %v5101_v54, 0 }
 0x1f3   : > { %2097 = vmatpush.bf16.msra.mxu3 %v2088_v57 }
 0x1f4   : > { %v1414_v14 = vor.u32 1.1754944e-38, %v1413_v61 }
 0x1f6   : > { %v5374_v46 = vpop.eup %5373 }
 0x1f7   : > { %v5376_v11 = vpop.eup %5375  ;;  %v6161_v10 = vadd.f32 1.0, %v5374_v46  ;;  %v1888_v46 = vld [vmem:[%s7652_s9] sm:$0x3] }
 0x1f8   : > { %v1388_v13 = vmul.f32 %v5376_v11, %v1309_v28  ;;  %vm1393_vm2 = vweird.f32 %v5376_v11  ;;  %v5378_v48 = vpop.eup %5377  ;;  %v1964_v49 = vsel %vm510_vm0, %v1888_v46, 0 }
 0x1f9   : > { %5379 = vrcp.f32 %v6161_v10  ;;  %v1403_v58 = vmul.f32 %v5378_v48, %v6156_v50  ;;  %vm1394_vm5 = vmor %vm1392_vm4, %vm1393_vm2  ;;  %vm1408_vm7 = vweird.f32 %v5378_v48  ;;  %v1428_v33 = vand.u32 2147483648, %v6161_v10  ;;  %1973 = vmatpush.bf16.msrb.mxu1 %v1964_v49 }
 0x1fa   : > { %v1389_v53 = vsub.f32 1.0, %v1388_v13  ;;  %vm6215_vm12 = vmor %vm1407_vm10, %vm1408_vm7  ;;  %vm1422_vm13 = vweird.f32 %v6161_v10  ;;  %vm1412_vm2 = vcmp.eq.f32.partialorder %v1411_v15, 8.507059e+37 }
 0x1fb   : > { %v1404_v0 = vsub.f32 1.0, %v1403_v58  ;;  %v1429_v19 = vor.u32 1.1754944e-38, %v1428_v33 }
 0x1fc   : > { %v1390_v24 = vmul.f32 %v5376_v11, %v1389_v53 }
 0x1fd   : > { %v1405_v35 = vmul.f32 %v5378_v48, %v1404_v0 }
 0x1fe   : > { %v1391_v44 = vadd.f32 %v5376_v11, %v1390_v24 }
 0x1ff   : > { %v5380_v38 = vpop.eup %5379  ;;  %v1406_v6 = vadd.f32 %v5378_v48, %v1405_v35 }
 0x200   : > { %v1395_v36 = vsel %vm1394_vm5, %v5376_v11, %v1391_v44  ;;  %v1418_v3 = vmul.f32 %v5380_v38, %v6161_v10  ;;  %vm1423_vm9 = vweird.f32 %v5380_v38 }
 0x201   : > { %v1400_v45 = vsel %vm1397_vm6, %v1399_v59, %v1395_v36  ;;  %v1410_v17 = vsel %vm6215_vm12, %v5378_v48, %v1406_v6  ;;  %vm1424_vm14 = vmor %vm1422_vm13, %vm1423_vm9 }
 0x202   : > { %v6200_v2 = vmul.f32 %v1400_v45, %v6135_v8  ;;  %v1419_v5 = vsub.f32 1.0, %v1418_v3  ;;  %v1426_v8 = vand.u32 2147483647, %v6161_v10  ;;  %v1415_v22 = vsel %vm1412_vm2, %v1414_v14, %v1410_v17  ;;  %v1893_v17 = vld [vmem:[#allocation2 + $0x1] sm:$0xff] }
 0x203   : > { %v6240_v29 = vmul.f32 %v1415_v22, %v6139_v1  ;;  %v1995_v14 = vld [vmem:[#allocation2 + $0x2] sm:$0xff] }
 0x204   : > { %v1661_v4 = vpack.c.bf16 %v6200_v2, %v6197_v42  ;;  %v1420_v7 = vmul.f32 %v5380_v38, %v1419_v5  ;;  %vm1427_vm15 = vcmp.eq.f32.partialorder %v1426_v8, 8.507059e+37 }
 0x206   : > { %5077 = vmatmul.msk.bf16.gmra.mxu3 %vm497_vm1, %v1661_v4  ;;  %v1421_v52 = vadd.f32 %v5380_v38, %v1420_v7 }
 0x208   : > { %v1425_v43 = vsel %vm1424_vm14, %v5380_v38, %v1421_v52 }
 0x209   : > { %v1430_v18 = vsel %vm1427_vm15, %v1429_v19, %v1425_v43  ;;  %v1880_v19 = vld [vmem:[#allocation2] sm:$0xff] }
 0x20a   : > { %v6233_v26 = vmul.f32 %v1430_v18, %v6150_v32 }
 0x20c   : > { %v1662_v37 = vpack.c.bf16 %v6233_v26, %v6240_v29 }
 0x216   : > { %5078 = vmatmul.msk.bf16.gmra.mxu3 %vm497_vm1, %v1662_v37 }
 0x261   : > { %v1691_v32 = vpop.f32.mrf.mxu3 }
 0x262   : > { %v1692_v34 = vadd.f32 %v6250_v27, %v1691_v32 }
 0x264   : > { %v5079_v62 = vmul.f32 -1.442695, %v1692_v34 }
 0x266   : > { %5381 = vpow2.f32 %v5079_v62 }
 0x269   : > { %v1693_v1 = vpop.f32.mrf.mxu3 }
 0x26a   : > { %v1694_v39 = vadd.f32 %v6250_v27, %v1693_v1 }
 0x26c   : > { %v5382_v28 = vpop.eup %5381  ;;  %v5080_v21 = vmul.f32 -1.442695, %v1694_v39 }
 0x26d   : > { %v1735_v56 = vadd.f32 1.0, %v5382_v28 }
 0x26e   : > { %5383 = vpow2.f32 %v5080_v21 }
 0x26f   : > { %5385 = vrcp.f32 %v1735_v56  ;;  %v1754_v12 = vand.u32 2147483648, %v1735_v56  ;;  %v1752_v24 = vand.u32 2147483647, %v1735_v56  ;;  %vm1748_vm4 = vweird.f32 %v1735_v56 }
 0x271   : > { %v1755_v58 = vor.u32 1.1754944e-38, %v1754_v12  ;;  %vm1753_vm6 = vcmp.eq.f32.partialorder %v1752_v24, 8.507059e+37 }
 0x273   : > { %v1696_v11 = vpop.f32.mrf.mxu3 }
 0x274   : > { %v5384_v50 = vpop.eup %5383  ;;  %v6263_v51 = vadd.f32 %v6250_v27, %v1696_v11 }
 0x275   : > { %v5386_v13 = vpop.eup %5385  ;;  %v1736_v10 = vadd.f32 1.0, %v5384_v50 }
 0x276   : > { %v1744_v25 = vmul.f32 %v5386_v13, %v1735_v56  ;;  %v5081_v53 = vmul.f32 -1.442695, %v6263_v51  ;;  %vm1749_vm3 = vweird.f32 %v5386_v13 }
 0x277   : > { %5387 = vrcp.f32 %v1736_v10  ;;  %vm1750_vm5 = vmor %vm1748_vm4, %vm1749_vm3  ;;  %v1769_v3 = vand.u32 2147483648, %v1736_v10  ;;  %v1767_v6 = vand.u32 2147483647, %v1736_v10  ;;  %vm1763_vm8 = vweird.f32 %v1736_v10 }
 0x278   : > { %v1745_v40 = vsub.f32 1.0, %v1744_v25  ;;  %5389 = vpow2.f32 %v5081_v53 }
 0x279   : > { %v1770_v61 = vor.u32 1.1754944e-38, %v1769_v3  ;;  %vm1768_vm10 = vcmp.eq.f32.partialorder %v1767_v6, 8.507059e+37 }
 0x27a   : > { %v1746_v20 = vmul.f32 %v5386_v13, %v1745_v40 }
 0x27b   : > { %v1698_v48 = vpop.f32.mrf.mxu3 }
 0x27c   : > { %v1747_v55 = vadd.f32 %v5386_v13, %v1746_v20  ;;  %v6271_v9 = vadd.f32 %v6250_v27, %v1698_v48 }
 0x27d   : > { %v5388_v44 = vpop.eup %5387 }
 0x27e   : > { %v1751_v59 = vsel %vm1750_vm5, %v5386_v13, %v1747_v55  ;;  %v1759_v23 = vmul.f32 %v5388_v44, %v1736_v10  ;;  %v5082_v0 = vmul.f32 -1.442695, %v6271_v9  ;;  %v5390_v45 = vpop.eup %5389  ;;  %vm1764_vm7 = vweird.f32 %v5388_v44 }
 0x27f   : > { %v1756_v36 = vsel %vm1753_vm6, %v1755_v58, %v1751_v59  ;;  %v1737_v4 = vadd.f32 1.0, %v5390_v45  ;;  %vm1765_vm9 = vmor %vm1763_vm8, %vm1764_vm7 }
 0x280   : > { %v1863_v38 = vmul.f32 %v1756_v36, %v1692_v34  ;;  %v1760_v35 = vsub.f32 1.0, %v1759_v23  ;;  %5391 = vpow2.f32 %v5082_v0 }
 0x281   : > { %5393 = vrcp.f32 %v1737_v4  ;;  %v1784_v21 = vand.u32 2147483648, %v1737_v4  ;;  %v1782_v46 = vand.u32 2147483647, %v1737_v4  ;;  %vm1778_vm13 = vweird.f32 %v1737_v4 }
 0x282   : > { %1872 = vst.msk [vmem:[#allocation2 + $0x11] sm:$0xff] %vm497_vm1, %v1863_v38  ;;  %v1761_v5 = vmul.f32 %v5388_v44, %v1760_v35 }
 0x283   : > { %v1785_v49 = vor.u32 1.1754944e-38, %v1784_v21  ;;  %vm1783_vm15 = vcmp.eq.f32.partialorder %v1782_v46, 8.507059e+37 }
 0x284   : > { %v1762_v33 = vadd.f32 %v5388_v44, %v1761_v5 }
 0x286   : > { %v1766_v7 = vsel %vm1765_vm9, %v5388_v44, %v1762_v33  ;;  %v5392_v8 = vpop.eup %5391  ;;  %v5106_v44 = vld [vmem:[%s7652_s9 + $0x8] sm:$0x3] }
 0x287   : > { %v1771_v15 = vsel %vm1768_vm10, %v1770_v61, %v1766_v7  ;;  %v1738_v52 = vadd.f32 1.0, %v5392_v8  ;;  %v5394_v43 = vpop.eup %5393  ;;  %v2154_v58 = vsel %vm510_vm0, %v5106_v44, 0 }
 0x288   : > { %v1864_v16 = vmul.f32 %v1771_v15, %v1694_v39  ;;  %v1774_v32 = vmul.f32 %v5394_v43, %v1737_v4  ;;  %vm1779_vm12 = vweird.f32 %v5394_v43  ;;  %2163 = vmatpush.bf16.msra.mxu0 %v2154_v58 }
 0x289   : > { %v6275_v18 = vld [vmem:[#allocation2 + $0x11] sm:$0xff]  ;;  %5395 = vrcp.f32 %v1738_v52  ;;  %v1701_v28 = vpop.f32.mrf.mxu3  ;;  %vm1780_vm14 = vmor %vm1778_vm13, %vm1779_vm12  ;;  %v1799_v24 = vand.u32 2147483648, %v1738_v52  ;;  %v1797_v48 = vand.u32 2147483647, %v1738_v52  ;;  %vm1793_vm3 = vweird.f32 %v1738_v52 }
 0x28a   : > { %v1881_v22 = vld [vmem:[#allocation2 + $0x10] sm:$0xff]  ;;  %1873 = vst.msk [vmem:[#allocation2 + $0x21] sm:$0xff] %vm497_vm1, %v1864_v16  ;;  %v1903_v34 = vpack.c.bf16 %v6275_v18, %v1893_v17  ;;  %v1775_v1 = vsub.f32 1.0, %v1774_v32  ;;  %v6283_v56 = vadd.f32 %v6250_v27, %v1701_v28 }
 0x28b   : > { %v6277_v37 = vld [vmem:[#allocation2 + $0x12] sm:$0xff]  ;;  %v1889_v62 = vpack.c.bf16 %v1881_v22, %v1880_v19  ;;  %v1800_v36 = vor.u32 1.1754944e-38, %v1799_v24  ;;  %vm1798_vm5 = vcmp.eq.f32.partialorder %v1797_v48, 8.507059e+37  ;;  %v5121_v48 = vld [vmem:[%s7652_s9 + $0xe] sm:$0x3] }
 0x28c   : > { %v2005_v39 = vpack.c.bf16 %v6277_v37, %v1995_v14  ;;  %5088 = vmatmul.msk.bf16.vlgmr.msrb.gmra.mxu0 %vm497_vm1, %v1903_v34  ;;  %v1776_v41 = vmul.f32 %v5394_v43, %v1775_v1  ;;  %v5083_v50 = vmul.f32 -1.442695, %v6283_v56 }
 0x28d   : > { %5092 = vmatmul.msk.bf16.vlgmr.msrb.gmra.mxu1 %vm497_vm1, %v1889_v62 }
 0x28e   : > { %5097 = vmatmul.msk.bf16.vlgmr.msrb.gmra.mxu2 %vm497_vm1, %v2005_v39  ;;  %v1777_v47 = vadd.f32 %v5394_v43, %v1776_v41  ;;  %5397 = vpow2.f32 %v5083_v50 }
 0x28f   : > { %v5396_v11 = vpop.eup %5395 }
 0x290   : > { %v1789_v13 = vmul.f32 %v5396_v11, %v1738_v52  ;;  %v1781_v25 = vsel %vm1780_vm14, %v5394_v43, %v1777_v47  ;;  %vm1794_vm2 = vweird.f32 %v5396_v11 }
 0x291   : > { %v2062_v10 = vld [vmem:[#allocation2 + $0x20] sm:$0xff]  ;;  %v1786_v53 = vsel %vm1783_vm15, %v1785_v49, %v1781_v25  ;;  %v1703_v54 = vpop.f32.mrf.mxu3  ;;  %vm1795_vm4 = vmor %vm1793_vm3, %vm1794_vm2  ;;  %v5116_v49 = vld [vmem:[%s7652_s9 + $0xc] sm:$0x3] }
 0x292   : > { %v2071_v40 = vpack.c.bf16 %v2062_v10, %v1881_v22  ;;  %v1790_v12 = vsub.f32 1.0, %v1789_v13  ;;  %v1865_v20 = vmul.f32 %v1786_v53, %v6263_v51  ;;  %v6292_v57 = vadd.f32 %v6250_v27, %v1703_v54  ;;  %v6301_v4 = vld [vmem:[#allocation2 + $0x21] sm:$0xff] }
 0x293   : > { %v6303_v5 = vld [vmem:[#allocation2 + $0x22] sm:$0xff]  ;;  %v2287_v53 = vsel %vm510_vm0, %v5116_v49, 0 }
 0x294   : > { %5102 = vmatmul.msk.bf16.vlgmr.msra.gmra.mxu3 %vm497_vm1, %v2071_v40  ;;  %v1791_v55 = vmul.f32 %v5396_v11, %v1790_v12  ;;  %1874 = vst.msk [vmem:[#allocation2 + $0x31] sm:$0xff] %vm497_vm1, %v1865_v20  ;;  %v5398_v59 = vpop.eup %5397  ;;  %v5084_v23 = vmul.f32 -1.442695, %v6292_v57  ;;  %2296 = vmatpush.bf16.msra.mxu2 %v2287_v53 }
 0x295   : > { %v1739_v0 = vadd.f32 1.0, %v5398_v59 }
 0x296   : > { %v1792_v51 = vadd.f32 %v5396_v11, %v1791_v55  ;;  %5399 = vpow2.f32 %v5084_v23 }
 0x297   : > { %5401 = vrcp.f32 %v1739_v0  ;;  %v1812_v22 = vand.u32 2147483647, %v1739_v0  ;;  %v1814_v32 = vand.u32 2147483648, %v1739_v0  ;;  %vm1808_vm7 = vweird.f32 %v1739_v0 }
 0x298   : > { %v1796_v45 = vsel %vm1795_vm4, %v5396_v11, %v1792_v51  ;;  %v2353_v51 = vsel %vm510_vm0, %v5121_v48, 0 }
 0x299   : > { %v1801_v38 = vsel %vm1798_vm5, %v1800_v36, %v1796_v45  ;;  %v1706_v3 = vpop.f32.mrf.mxu3  ;;  %v1815_v11 = vor.u32 1.1754944e-38, %v1814_v32  ;;  %vm1813_vm9 = vcmp.eq.f32.partialorder %v1812_v22, 8.507059e+37  ;;  %2362 = vmatpush.bf16.msrb.mxu3 %v2353_v51 }
 0x29a   : > { %v1866_v35 = vmul.f32 %v1801_v38, %v6271_v9  ;;  %v6307_v6 = vadd.f32 %v6250_v27, %v1706_v3 }
 0x29b   : > { %v6309_v33 = vld [vmem:[#allocation2 + $0x31] sm:$0xff] }
 0x29c   : > { %1875 = vst.msk [vmem:[#allocation2 + $0x41] sm:$0xff] %vm497_vm1, %v1866_v35  ;;  %v1883_v61 = vld [vmem:[#allocation2 + $0x30] sm:$0xff]  ;;  %v6315_v8 = vpack.c.bf16 %v6309_v33, %v6301_v4  ;;  %v5400_v16 = vpop.eup %5399  ;;  %v5085_v52 = vmul.f32 -1.442695, %v6307_v6 }
 0x29d   : > { %v6311_v7 = vld [vmem:[#allocation2 + $0x32] sm:$0xff]  ;;  %v6317_v9 = vpack.c.bf16 %v1883_v61, %v2062_v10  ;;  %v5402_v17 = vpop.eup %5401  ;;  %v1740_v19 = vadd.f32 1.0, %v5400_v16 }
 0x29e   : > { %v6321_v15 = vpack.c.bf16 %v6311_v7, %v6303_v5  ;;  %5089 = vmatmul.msk.bf16.gmra.mxu0 %vm497_vm1, %v6315_v8  ;;  %v1804_v14 = vmul.f32 %v5402_v17, %v1739_v0  ;;  %5403 = vpow2.f32 %v5085_v52  ;;  %vm1809_vm6 = vweird.f32 %v5402_v17 }
 0x29f   : > { %5093 = vmatmul.msk.bf16.gmra.mxu1 %vm497_vm1, %v6317_v9  ;;  %5405 = vrcp.f32 %v1740_v19  ;;  %vm1810_vm8 = vmor %vm1808_vm7, %vm1809_vm6  ;;  %v1829_v12 = vand.u32 2147483648, %v1740_v19  ;;  %v1827_v24 = vand.u32 2147483647, %v1740_v19  ;;  %vm1823_vm12 = vweird.f32 %v1740_v19 }
 0x2a0   : > { %5098 = vmatmul.msk.bf16.gmra.mxu2 %vm497_vm1, %v6321_v15  ;;  %v1805_v43 = vsub.f32 1.0, %v1804_v14 }
 0x2a1   : > { %v1708_v34 = vpop.f32.mrf.mxu3  ;;  %v1830_v58 = vor.u32 1.1754944e-38, %v1829_v12  ;;  %vm1828_vm14 = vcmp.eq.f32.partialorder %v1827_v24, 8.507059e+37  ;;  %v6382_v24 = vpop.f32.mrf.mxu2 }
 0x2a2   : > { %v1806_v1 = vmul.f32 %v5402_v17, %v1805_v43  ;;  %v6331_v28 = vadd.f32 %v6250_v27, %v1708_v34 }
 0x2a3   : > { %v2064_v62 = vld [vmem:[#allocation2 + $0x40] sm:$0xff] }
 0x2a4   : > { %v2072_v39 = vpack.c.bf16 %v2064_v62, %v1883_v61  ;;  %v5404_v21 = vpop.eup %5403  ;;  %v1807_v41 = vadd.f32 %v5402_v17, %v1806_v1  ;;  %v5086_v46 = vmul.f32 -1.442695, %v6331_v28  ;;  %v6350_v3 = vld [vmem:[#allocation2 + $0x41] sm:$0xff] }
 0x2a5   : > { %v5406_v50 = vpop.eup %5405  ;;  %v1741_v47 = vadd.f32 1.0, %v5404_v21 }
 0x2a6   : > { %5103 = vmatmul.msk.bf16.gmra.mxu3 %vm497_vm1, %v2072_v39  ;;  %v1811_v13 = vsel %vm1810_vm8, %v5402_v17, %v1807_v41  ;;  %v1819_v27 = vmul.f32 %v5406_v50, %v1740_v19  ;;  %5407 = vpow2.f32 %v5086_v46  ;;  %vm1824_vm10 = vweird.f32 %v5406_v50 }
 0x2a7   : > { %v1816_v10 = vsel %vm1813_vm9, %v1815_v11, %v1811_v13  ;;  %5409 = vrcp.f32 %v1741_v47  ;;  %vm1825_vm13 = vmor %vm1823_vm12, %vm1824_vm10  ;;  %v1842_v61 = vand.u32 2147483647, %v1741_v47  ;;  %v1844_v16 = vand.u32 2147483648, %v1741_v47 }
 0x2a8   : > { %v1867_v25 = vmul.f32 %v1816_v10, %v6283_v56  ;;  %v1820_v40 = vsub.f32 1.0, %v1819_v27  ;;  %v5111_v56 = vld [vmem:[%s7652_s9 + $0xa] sm:$0x3]  ;;  %vm1838_vm2 = vweird.f32 %v1741_v47 }
 0x2a9   : > { %v2220_v23 = vsel %vm510_vm0, %v5111_v56, 0  ;;  %v1845_v39 = vor.u32 1.1754944e-38, %v1844_v16  ;;  %vm1843_vm4 = vcmp.eq.f32.partialorder %v1842_v61, 8.507059e+37  ;;  %v2267_v61 = vld [vmem:[#allocation2 + $0x90] sm:$0xff] }
 0x2aa   : > { %1876 = vst.msk [vmem:[#allocation2 + $0x51] sm:$0xff] %vm497_vm1, %v1867_v25  ;;  %v1821_v20 = vmul.f32 %v5406_v50, %v1820_v40  ;;  %2229 = vmatpush.bf16.msra.mxu1 %v2220_v23 }
 0x2ac   : > { %v5408_v54 = vpop.eup %5407  ;;  %v1822_v55 = vadd.f32 %v5406_v50, %v1821_v20 }
 0x2ad   : > { %v5410_v44 = vpop.eup %5409  ;;  %v1742_v59 = vadd.f32 1.0, %v5408_v54 }
 0x2ae   : > { %v1826_v36 = vsel %vm1825_vm13, %v5406_v50, %v1822_v55  ;;  %v1834_v0 = vmul.f32 %v5410_v44, %v1741_v47  ;;  %vm1839_vm15 = vweird.f32 %v5410_v44 }
 0x2af   : > { %v1831_v45 = vsel %vm1828_vm14, %v1830_v58, %v1826_v36  ;;  %5411 = vrcp.f32 %v1742_v59  ;;  %vm1840_vm3 = vmor %vm1838_vm2, %vm1839_vm15  ;;  %v1859_v49 = vand.u32 2147483648, %v1742_v59  ;;  %v1857_v10 = vand.u32 2147483647, %v1742_v59 }
 0x2b0   : > { %v1868_v38 = vmul.f32 %v1831_v45, %v6292_v57  ;;  %v1835_v35 = vsub.f32 1.0, %v1834_v0  ;;  %v6363_v57 = vld [vmem:[#allocation2 + $0x42] sm:$0xff]  ;;  %vm1853_vm6 = vweird.f32 %v1742_v59  ;;  %v2137_v0 = vpack.c.bf16 %v6301_v4, %v6275_v18 }
 0x2b1   : > { %v6352_v52 = vld [vmem:[#allocation2 + $0x51] sm:$0xff]  ;;  %v1860_v53 = vor.u32 1.1754944e-38, %v1859_v49  ;;  %vm1858_vm8 = vcmp.eq.f32.partialorder %v1857_v10, 8.507059e+37  ;;  %v2203_v45 = vpack.c.bf16 %v6303_v5, %v6277_v37  ;;  %v2138_v18 = vpack.c.bf16 %v6350_v3, %v6309_v33 }
 0x2b2   : > { %v1885_v17 = vld [vmem:[#allocation2 + $0x50] sm:$0xff]  ;;  %1877 = vst.msk [vmem:[#allocation2 + $0x61] sm:$0xff] %vm497_vm1, %v1868_v38  ;;  %v1836_v14 = vmul.f32 %v5410_v44, %v1835_v35  ;;  %v6359_v43 = vpack.c.bf16 %v6352_v52, %v6350_v3  ;;  %v2204_v37 = vpack.c.bf16 %v6363_v57, %v6311_v7 }
 0x2b3   : > { %v6354_v19 = vld [vmem:[#allocation2 + $0x52] sm:$0xff]  ;;  %v6361_v22 = vpack.c.bf16 %v1885_v17, %v2064_v62  ;;  %v5126_v62 = vld [vmem:[%s7652_s9 + $0x10] sm:$0x3] }
 0x2b4   : > { %v6367_v32 = vpack.c.bf16 %v6354_v19, %v6363_v57  ;;  %v1837_v34 = vadd.f32 %v5410_v44, %v1836_v14  ;;  %5090 = vmatmul.msk.bf16.gmra.mxu0 %vm497_vm1, %v6359_v43  ;;  %v2419_v46 = vsel %vm510_vm0, %v5126_v62, 0 }
 0x2b5   : > { %5094 = vmatmul.msk.bf16.gmra.mxu1 %vm497_vm1, %v6361_v22  ;;  %v5412_v1 = vpop.eup %5411  ;;  %2428 = vmatpush.bf16.msrb.mxu0 %v2419_v46 }
 0x2b6   : > { %5099 = vmatmul.msk.bf16.gmra.mxu2 %vm497_vm1, %v6367_v32  ;;  %v1841_v21 = vsel %vm1840_vm3, %v5410_v44, %v1837_v34  ;;  %v1849_v41 = vmul.f32 %v5412_v1, %v1742_v59  ;;  %vm1854_vm5 = vweird.f32 %v5412_v1 }
 0x2b7   : > { %v1846_v50 = vsel %vm1843_vm4, %v1845_v39, %v1841_v21  ;;  %vm1855_vm7 = vmor %vm1853_vm6, %vm1854_vm5 }
 0x2b8   : > { %v1869_v11 = vmul.f32 %v1846_v50, %v6307_v6  ;;  %v1850_v47 = vsub.f32 1.0, %v1849_v41 }
 0x2b9   : > { %v2066_v13 = vld [vmem:[#allocation2 + $0x60] sm:$0xff] }
 0x2ba   : > { %1878 = vst.msk [vmem:[#allocation2 + $0x71] sm:$0xff] %vm497_vm1, %v1869_v11  ;;  %v1851_v27 = vmul.f32 %v5412_v1, %v1850_v47  ;;  %v2073_v25 = vpack.c.bf16 %v2066_v13, %v1885_v17  ;;  %v1899_v54 = vld [vmem:[#allocation2 + $0x61] sm:$0xff] }
 0x2bb   : > { %v2001_v55 = vld [vmem:[#allocation2 + $0x62] sm:$0xff] }
 0x2bc   : > { %v1852_v40 = vadd.f32 %v5412_v1, %v1851_v27  ;;  %5104 = vmatmul.msk.bf16.gmra.mxu3 %vm497_vm1, %v2073_v25  ;;  %v2205_v33 = vpack.c.bf16 %v2001_v55, %v6354_v19  ;;  %v2333_v19 = vld [vmem:[#allocation2 + $0x91] sm:$0xff] }
 0x2be   : > { %v1856_v12 = vsel %vm1855_vm7, %v5412_v1, %v1852_v40 }
 0x2bf   : > { %v1861_v20 = vsel %vm1858_vm8, %v1860_v53, %v1856_v12 }
 0x2c0   : > { %v1870_v6 = vmul.f32 %v1861_v20, %v6331_v28  ;;  %v6392_v28 = vpop.f32.mrf.mxu2 }
 0x2c1   : > { %v1900_v48 = vld [vmem:[#allocation2 + $0x71] sm:$0xff] }
 0x2c2   : > { %v1887_v56 = vld [vmem:[#allocation2 + $0x70] sm:$0xff]  ;;  %1879 = vst.msk [vmem:[#allocation2 + $0x81] sm:$0xff] %vm497_vm1, %v1870_v6  ;;  %v1906_v58 = vpack.c.bf16 %v1900_v48, %v1899_v54 }
 0x2c3   : > { %v2002_v44 = vld [vmem:[#allocation2 + $0x72] sm:$0xff]  ;;  %v1892_v59 = vpack.c.bf16 %v1887_v56, %v2066_v13 }
 0x2c4   : > { %v6386_v51 = vpack.c.bf16 %v2002_v44, %v2001_v55  ;;  %5091 = vmatmul.msk.bf16.gmra.mxu0 %vm497_vm1, %v1906_v58 }
 0x2c5   : > { %5095 = vmatmul.msk.bf16.gmra.mxu1 %vm497_vm1, %v1892_v59 }
 0x2c6   : > { %5100 = vmatmul.msk.bf16.gmra.mxu2 %vm497_vm1, %v6386_v51 }
 0x2c8   : > { %v6399_v38 = vpop.f32.mrf.mxu2 }
 0x2c9   : > { %v2068_v23 = vld [vmem:[#allocation2 + $0x80] sm:$0xff] }
 0x2ca   : > { %v2074_v36 = vpack.c.bf16 %v2068_v23, %v1887_v56  ;;  %v2200_v3 = vld [vmem:[#allocation2 + $0x82] sm:$0xff]  ;;  %v2273_v14 = vpack.c.bf16 %v2267_v61, %v2068_v23 }
 0x2cb   : > { %v2206_v17 = vpack.c.bf16 %v2200_v3, %v2002_v44 }
 0x2cc   : > { %5105 = vmatmul.msk.bf16.gmra.mxu3 %vm497_vm1, %v2074_v36 }
 0x2d0   : > { %v6407_v35 = vpop.f32.mrf.mxu2 }
 0x2d4   : > { %5107 = vmatmul.msk.bf16.vlgmr.msra.gmra.mxu0 %vm497_vm1, %v2137_v0 }
 0x2d5   : > { %5112 = vmatmul.msk.bf16.vlgmr.msra.gmra.mxu1 %vm497_vm1, %v2203_v45 }
 0x2d6   : > { %5117 = vmatmul.msk.bf16.vlgmr.msra.gmra.mxu2 %vm497_vm1, %v6317_v9  ;;  %v2134_v9 = vld [vmem:[#allocation2 + $0x81] sm:$0xff] }
 0x2d7   : > { %v2140_v16 = vpack.c.bf16 %v2134_v9, %v1900_v48  ;;  %v2339_v34 = vpack.c.bf16 %v2333_v19, %v2134_v9 }
 0x2d8   : > { %v6417_v4 = vpop.f32.mrf.mxu2 }
 0x2dc   : > { %5122 = vmatmul.msk.bf16.vlgmr.msrb.gmra.mxu3 %vm497_vm1, %v6315_v8  ;;  %v2139_v8 = vpack.c.bf16 %v1899_v54, %v6352_v52 }
 0x2e0   : > { %v6421_v5 = vpop.f32.mrf.mxu2 }
 0x2e4   : > { %5108 = vmatmul.msk.bf16.gmra.mxu0 %vm497_vm1, %v2138_v18 }
 0x2e5   : > { %5113 = vmatmul.msk.bf16.gmra.mxu1 %vm497_vm1, %v2204_v37 }
 0x2e6   : > { %5118 = vmatmul.msk.bf16.gmra.mxu2 %vm497_vm1, %v6361_v22 }
 0x2e8   : > { %v6428_v7 = vpop.f32.mrf.mxu2 }
 0x2ec   : > { %5123 = vmatmul.msk.bf16.gmra.mxu3 %vm497_vm1, %v6359_v43 }
 0x2f0   : > { %v6434_v52 = vpop.f32.mrf.mxu2 }
 0x2f4   : > { %5109 = vmatmul.msk.bf16.gmra.mxu0 %vm497_vm1, %v2139_v8 }
 0x2f5   : > { %5114 = vmatmul.msk.bf16.gmra.mxu1 %vm497_vm1, %v2205_v33 }
 0x2f6   : > { %5119 = vmatmul.msk.bf16.gmra.mxu2 %vm497_vm1, %v1892_v59  ;;  %v2399_v59 = vld [vmem:[#allocation2 + $0x92] sm:$0xff] }
 0x2f7   : > { %v2405_v37 = vpack.c.bf16 %v2399_v59, %v2200_v3 }
 0x2fc   : > { %5124 = vmatmul.msk.bf16.gmra.mxu3 %vm497_vm1, %v1906_v58 }
 0x304   : > { %5110 = vmatmul.msk.bf16.gmra.mxu0 %vm497_vm1, %v2140_v16 }
 0x305   : > { %5115 = vmatmul.msk.bf16.gmra.mxu1 %vm497_vm1, %v2206_v17 }
 0x306   : > { %5120 = vmatmul.msk.bf16.gmra.mxu2 %vm497_vm1, %v2273_v14 }
 0x309   : > { %v1931_v43 = vpop.f32.mrf.mxu0 }
 0x30a   : > { %v1975_v22 = vpop.f32.mrf.mxu1 }
 0x30b   : > { %v1976_v57 = vadd.f32 %v1975_v22, %v1931_v43  ;;  %v5139_v22 = vld [vmem:[%s7650_s7 + $0x2] sm:$0x3] }
 0x30c   : > { %5125 = vmatmul.msk.bf16.gmra.mxu3 %vm497_vm1, %v2339_v34  ;;  %v2662_v3 = vsel %vm510_vm0, %v5139_v22, 0 }
 0x30d   : > { %2671 = vmatpush.bf16.msrb.mxu1 %v2662_v3 }
 0x311   : > { %v2033_v1 = vpop.f32.mrf.mxu2  ;;  %v6437_v62 = vpop.f32.mrf.mxu0 }
 0x312   : > { %v2053_v39 = vadd.f32 %v2033_v1, %v1976_v57  ;;  %v6439_v21 = vpop.f32.mrf.mxu1 }
 0x314   : > { %5127 = vmatmul.msk.bf16.vlgmr.msrb.gmra.mxu0 %vm497_vm1, %v6321_v15 }
 0x317   : > { %v2099_v41 = vpop.f32.mrf.mxu3 }
 0x318   : > { %v2119_v46 = vadd.f32 %v2099_v41, %v2053_v39 }
 0x319   : > { %v2035_v50 = vpop.f32.mrf.mxu2 }
 0x31b   : > { %v1936_v11 = vpop.f32.mrf.mxu0 }
 0x31c   : > { %v1980_v47 = vpop.f32.mrf.mxu1 }
 0x31d   : > { %v1981_v49 = vadd.f32 %v1980_v47, %v1936_v11 }
 0x31f   : > { %v2101_v13 = vpop.f32.mrf.mxu3 }
 0x323   : > { %v2038_v27 = vpop.f32.mrf.mxu2  ;;  %v6445_v25 = vpop.f32.mrf.mxu0 }
 0x324   : > { %v2055_v10 = vadd.f32 %v2038_v27, %v1981_v49  ;;  %5128 = vmatmul.msk.bf16.gmra.mxu0 %vm497_vm1, %v6367_v32  ;;  %v6447_v40 = vpop.f32.mrf.mxu1 }
 0x329   : > { %v2104_v53 = vpop.f32.mrf.mxu3 }
 0x32a   : > { %v2121_v12 = vadd.f32 %v2104_v53, %v2055_v10 }
 0x32b   : > { %v6449_v20 = vpop.f32.mrf.mxu2 }
 0x331   : > { %v1941_v15 = vpop.f32.mrf.mxu0  ;;  %v6453_v55 = vpop.f32.mrf.mxu3 }
 0x332   : > { %v1985_v6 = vpop.f32.mrf.mxu1 }
 0x333   : > { %v1986_v54 = vadd.f32 %v1985_v6, %v1941_v15 }
 0x334   : > { %5129 = vmatmul.msk.bf16.gmra.mxu0 %vm497_vm1, %v6386_v51 }
 0x339   : > { %v2043_v48 = vpop.f32.mrf.mxu2  ;;  %v6455_v44 = vpop.f32.mrf.mxu0 }
 0x33a   : > { %v2057_v56 = vadd.f32 %v2043_v48, %v1986_v54  ;;  %v6457_v32 = vpop.f32.mrf.mxu1 }
 0x33f   : > { %v2109_v58 = vpop.f32.mrf.mxu3 }
 0x340   : > { %v2123_v36 = vadd.f32 %v2109_v58, %v2057_v56  ;;  %v1978_v56 = vadd.f32 %v6439_v21, %v6437_v62 }
 0x341   : > { %v6459_v23 = vpop.f32.mrf.mxu2  ;;  %v1946_v0 = vpop.f32.mrf.mxu0 }
 0x342   : > { %v1990_v45 = vpop.f32.mrf.mxu1  ;;  %v2054_v58 = vadd.f32 %v2035_v50, %v1978_v56 }
 0x343   : > { %v1991_v18 = vadd.f32 %v1990_v45, %v1946_v0 }
 0x344   : > { %5130 = vmatmul.msk.bf16.gmra.mxu0 %vm497_vm1, %v2405_v37 }
 0x347   : > { %v6462_v51 = vpop.f32.mrf.mxu3 }
 0x349   : > { %v2048_v8 = vpop.f32.mrf.mxu2  ;;  %v6464_v9 = vpop.f32.mrf.mxu0 }
 0x34a   : > { %v2059_v33 = vadd.f32 %v2048_v8, %v1991_v18  ;;  %v6470_v39 = vpop.f32.mrf.mxu1 }
 0x34f   : > { %v2114_v61 = vpop.f32.mrf.mxu3 }
 0x350   : > { %v2125_v16 = vadd.f32 %v2114_v61, %v2059_v33  ;;  %v6489_v33 = vld [vmem:[%s7653_s10] ss:$0 sm:$0xff] }
 0x351   : > { %v2165_v17 = vpop.f32.mrf.mxu0  ;;  %v6472_v41 = vpop.f32.mrf.mxu2 }
 0x352   : > { %v2185_v14 = vadd.f32 %v2165_v17, %v2119_v46  ;;  %v2231_v49 = vpop.f32.mrf.mxu1 }
 0x354   : > { %v2251_v59 = vadd.f32 %v2231_v49, %v2185_v14  ;;  %v1983_v14 = vadd.f32 %v6447_v40, %v6445_v25 }
 0x356   : > { %v2056_v49 = vadd.f32 %v6449_v20, %v1983_v14 }
 0x357   : > { %v6476_v47 = vpop.f32.mrf.mxu3 }
 0x359   : > { %v2167_v19 = vpop.f32.mrf.mxu0  ;;  %v2298_v27 = vpop.f32.mrf.mxu2 }
 0x35a   : > { %v2233_v15 = vpop.f32.mrf.mxu1  ;;  %v2318_v0 = vadd.f32 %v2298_v27, %v2251_v59 }
 0x35f   : > { %v2364_v10 = vpop.f32.mrf.mxu3 }
 0x360   : > { %v2384_v18 = vadd.f32 %v2364_v10, %v2318_v0 }
 0x361   : > { %v2170_v43 = vpop.f32.mrf.mxu0  ;;  %v2300_v6 = vpop.f32.mrf.mxu2 }
 0x362   : > { %v2187_v57 = vadd.f32 %v2170_v43, %v2121_v12  ;;  %v2236_v37 = vpop.f32.mrf.mxu1 }
 0x364   : > { %v2253_v27 = vadd.f32 %v2236_v37, %v2187_v57 }
 0x367   : > { %v2366_v54 = vpop.f32.mrf.mxu3 }
 0x369   : > { %v2172_v34 = vpop.f32.mrf.mxu0  ;;  %v2303_v8 = vpop.f32.mrf.mxu2 }
 0x36a   : > { %v2320_v56 = vadd.f32 %v2303_v8, %v2253_v27 }
 0x371   : > { %v2175_v1 = vpop.f32.mrf.mxu0  ;;  %v2305_v3 = vpop.f32.mrf.mxu2 }
 0x372   : > { %v6474_v11 = vadd.f32 %v2175_v1, %v2123_v36  ;;  %v2120_v36 = vadd.f32 %v2101_v13, %v2054_v58 }
 0x374   : > { %v2186_v45 = vadd.f32 %v2167_v19, %v2120_v36  ;;  %v2238_v19 = vpop.f32.mrf.mxu1 }
 0x376   : > { %v2252_v43 = vadd.f32 %v2233_v15, %v2186_v45 }
 0x378   : > { %v2319_v62 = vadd.f32 %v2300_v6, %v2252_v43  ;;  %v2122_v6 = vadd.f32 %v6453_v55, %v2056_v49 }
 0x379   : > { %v6478_v46 = vpop.f32.mrf.mxu0  ;;  %v2308_v57 = vpop.f32.mrf.mxu2 }
 0x37a   : > { %v2385_v50 = vadd.f32 %v2366_v54, %v2319_v62  ;;  %v2188_v59 = vadd.f32 %v2172_v34, %v2122_v6 }
 0x37c   : > { %v2254_v0 = vadd.f32 %v2238_v19, %v2188_v59  ;;  %v2241_v20 = vpop.f32.mrf.mxu1 }
 0x37d   : > { %v2255_v14 = vadd.f32 %v2241_v20, %v6474_v11 }
 0x37e   : > { %v2321_v37 = vadd.f32 %v2305_v3, %v2254_v0 }
 0x37f   : > { %v2322_v49 = vadd.f32 %v2308_v57, %v2255_v14 }
 0x381   : > { %v2180_v53 = vpop.f32.mrf.mxu0 }
 0x382   : > { %v6480_v12 = vadd.f32 %v2180_v53, %v2125_v16  ;;  %v2369_v16 = vpop.f32.mrf.mxu3 }
 0x383   : > { %v2386_v36 = vadd.f32 %v2369_v16, %v2320_v56  ;;  %v1988_v16 = vadd.f32 %v6457_v32, %v6455_v44 }
 0x389   : > { %v6482_v48 = vpop.f32.mrf.mxu0 }
 0x38a   : > { %v2371_v10 = vpop.f32.mrf.mxu3 }
 0x38b   : > { %v2387_v43 = vadd.f32 %v2371_v10, %v2321_v37  ;;  %v2243_v10 = vpop.f32.mrf.mxu1 }
 0x391   : > { %v2430_v61 = vpop.f32.mrf.mxu0 }
 0x392   : > { %v2450_v17 = vadd.f32 %v2430_v61, %v2384_v18  ;;  %v2374_v61 = vpop.f32.mrf.mxu3 }
 0x394   : > { %v6492_v22 = vadd.f32 %v6489_v33, %v2450_v17 }
 0x396   : > { %v5131_v21 = vmul.f32 -1.442695, %v6492_v22 }
 0x398   : > { %5413 = vpow2.f32 %v5131_v21 }
 0x399   : > { %v2432_v13 = vpop.f32.mrf.mxu0 }
 0x39a   : > { %v2451_v1 = vadd.f32 %v2432_v13, %v2385_v50  ;;  %v2058_v13 = vadd.f32 %v6459_v23, %v1988_v16  ;;  %v2388_v23 = vadd.f32 %v2374_v61, %v2322_v49  ;;  %v2376_v59 = vpop.f32.mrf.mxu3 }
 0x39c   : > { %v6499_v53 = vadd.f32 %v6489_v33, %v2451_v1  ;;  %v2124_v1 = vadd.f32 %v6462_v51, %v2058_v13 }
 0x39e   : > { %v5414_v15 = vpop.eup %5413  ;;  %v5132_v54 = vmul.f32 -1.442695, %v6499_v53  ;;  %v2190_v56 = vadd.f32 %v6478_v46, %v2124_v1 }
 0x39f   : > { %v2494_v58 = vadd.f32 1.0, %v5414_v15  ;;  %v2310_v15 = vpop.f32.mrf.mxu2 }
 0x3a0   : > { %5415 = vpow2.f32 %v5132_v54  ;;  %v2256_v57 = vadd.f32 %v2243_v10, %v2190_v56 }
 0x3a1   : > { %5417 = vrcp.f32 %v2494_v58  ;;  %v2435_v25 = vpop.f32.mrf.mxu0  ;;  %v2513_v54 = vand.u32 2147483648, %v2494_v58  ;;  %vm2507_vm10 = vweird.f32 %v2494_v58 }
 0x3a2   : > { %v2452_v40 = vadd.f32 %v2435_v25, %v2386_v36  ;;  %v2511_v36 = vand.u32 2147483647, %v2494_v58 }
 0x3a4   : > { %v6504_v45 = vadd.f32 %v6489_v33, %v2452_v40  ;;  %vm2512_vm13 = vcmp.eq.f32.partialorder %v2511_v36, 8.507059e+37 }
 0x3a6   : > { %v5416_v18 = vpop.eup %5415  ;;  %v5133_v55 = vmul.f32 -1.442695, %v6504_v45 }
 0x3a7   : > { %v5418_v8 = vpop.eup %5417  ;;  %v2495_v17 = vadd.f32 1.0, %v5416_v18  ;;  %v2514_v18 = vor.u32 1.1754944e-38, %v2513_v54  ;;  %v2313_v1 = vpop.f32.mrf.mxu2 }
 0x3a8   : > { %v2503_v34 = vmul.f32 %v5418_v8, %v2494_v58  ;;  %5419 = vpow2.f32 %v5133_v55  ;;  %vm2508_vm9 = vweird.f32 %v5418_v8 }
 0x3a9   : > { %5421 = vrcp.f32 %v2495_v17  ;;  %v2437_v62 = vpop.f32.mrf.mxu0  ;;  %vm6519_vm12 = vmor %vm2507_vm10, %vm2508_vm9  ;;  %v2526_v37 = vand.u32 2147483647, %v2495_v17  ;;  %v2528_v61 = vand.u32 2147483648, %v2495_v17  ;;  %vm2522_vm15 = vweird.f32 %v2495_v17 }
 0x3aa   : > { %v2504_v21 = vsub.f32 1.0, %v2503_v34  ;;  %v2453_v50 = vadd.f32 %v2437_v62, %v2387_v43  ;;  %v2323_v43 = vadd.f32 %v2310_v15, %v2256_v57 }
 0x3ab   : > { %vm2527_vm3 = vcmp.eq.f32.partialorder %v2526_v37, 8.507059e+37  ;;  %v2529_v13 = vor.u32 1.1754944e-38, %v2528_v61 }
 0x3ac   : > { %v2505_v19 = vmul.f32 %v5418_v8, %v2504_v21  ;;  %v6512_v3 = vadd.f32 %v6489_v33, %v2453_v50  ;;  %v2389_v50 = vadd.f32 %v2376_v59, %v2323_v43 }
 0x3ae   : > { %v5420_v27 = vpop.eup %5419  ;;  %v2506_v6 = vadd.f32 %v5418_v8, %v2505_v19  ;;  %v5134_v44 = vmul.f32 -1.442695, %v6512_v3  ;;  %v2246_v19 = vpop.f32.mrf.mxu1 }
 0x3af   : > { %v5422_v32 = vpop.eup %5421  ;;  %v6517_v11 = vadd.f32 1.0, %v5420_v27  ;;  %v2315_v61 = vpop.f32.mrf.mxu2 }
 0x3b0   : > { %v2518_v25 = vmul.f32 %v5422_v32, %v2495_v17  ;;  %5423 = vpow2.f32 %v5134_v44  ;;  %v2510_v0 = vsel %vm6519_vm12, %v5418_v8, %v2506_v6  ;;  %vm2523_vm14 = vweird.f32 %v5422_v32  ;;  %v2379_v44 = vpop.f32.mrf.mxu3 }
 0x3b1   : > { %5425 = vrcp.f32 %v6517_v11  ;;  %v2440_v40 = vpop.f32.mrf.mxu0  ;;  %v2515_v34 = vsel %vm2512_vm13, %v2514_v18, %v2510_v0  ;;  %vm2524_vm2 = vmor %vm2522_vm15, %vm2523_vm14  ;;  %v1993_v17 = vadd.f32 %v6470_v39, %v6464_v9  ;;  %vm2537_vm5 = vweird.f32 %v6517_v11 }
 0x3b2   : > { %v2519_v46 = vsub.f32 1.0, %v2518_v25  ;;  %v2454_v20 = vadd.f32 %v2440_v40, %v2388_v23  ;;  %v2622_v49 = vmul.f32 %v2515_v34, %v6492_v22  ;;  %v2257_v22 = vadd.f32 %v2246_v19, %v6480_v12 }
 0x3b3   : > { %v2060_v59 = vadd.f32 %v6472_v41, %v1993_v17 }
 0x3b4   : > { %v2520_v58 = vmul.f32 %v5422_v32, %v2519_v46  ;;  %v6527_v55 = vadd.f32 %v6489_v33, %v2454_v20  ;;  %v2543_v46 = vand.u32 2147483648, %v6517_v11 }
 0x3b5   : > { %v2126_v25 = vadd.f32 %v6476_v47, %v2060_v59  ;;  %v2541_v47 = vand.u32 2147483647, %v6517_v11 }
 0x3b6   : > { %v5424_v16 = vpop.eup %5423  ;;  %v2521_v62 = vadd.f32 %v5422_v32, %v2520_v58  ;;  %v5135_v21 = vmul.f32 -1.442695, %v6527_v55  ;;  %v2248_v37 = vpop.f32.mrf.mxu1 }
 0x3b7   : > { %v6530_v8 = vpop.eup %5425  ;;  %v6532_v14 = vadd.f32 1.0, %v5424_v16  ;;  %v2192_v40 = vadd.f32 %v6482_v48, %v2126_v25  ;;  %v2544_v16 = vor.u32 1.1754944e-38, %v2543_v46  ;;  %vm2542_vm7 = vcmp.eq.f32.partialorder %v2541_v47, 8.507059e+37 }
 0x3b8   : > { %v2525_v27 = vsel %vm2524_vm2, %v5422_v32, %v2521_v62  ;;  %v2533_v10 = vmul.f32 %v6530_v8, %v6517_v11  ;;  %5427 = vpow2.f32 %v5135_v21  ;;  %v6544_v32 = vadd.f32 %v2622_v49, %v6121_v60 }
 0x3b9   : > { %v2530_v15 = vsel %vm2527_vm3, %v2529_v13, %v2525_v27  ;;  %5429 = vrcp.f32 %v6532_v14  ;;  %v2442_v6 = vpop.f32.mrf.mxu0  ;;  %vm2538_vm4 = vweird.f32 %v6530_v8  ;;  %v2258_v34 = vadd.f32 %v2248_v37, %v2192_v40 }
 0x3ba   : > { %v2623_v56 = vmul.f32 %v2530_v15, %v6499_v53  ;;  %v2534_v23 = vsub.f32 1.0, %v2533_v10  ;;  %v2455_v54 = vadd.f32 %v2442_v6, %v2389_v50  ;;  %v2324_v53 = vadd.f32 %v2313_v1, %v2257_v22  ;;  %vm6567_vm6 = vmor %vm2537_vm5, %vm2538_vm4  ;;  %v2381_v50 = vpop.f32.mrf.mxu3 }
 0x3bb   : > { %v2556_v62 = vand.u32 2147483647, %v6532_v14  ;;  %v2558_v21 = vand.u32 2147483648, %v6532_v14  ;;  %v2325_v1 = vadd.f32 %v2315_v61, %v2258_v34  ;;  %vm2552_vm9 = vweird.f32 %v6532_v14 }
 0x3bc   : > { %v6547_v36 = vadd.f32 %v2623_v56, %v6123_v63  ;;  %v2535_v9 = vmul.f32 %v6530_v8, %v2534_v23  ;;  %v6551_v39 = vadd.f32 %v6489_v33, %v2455_v54  ;;  %v2390_v0 = vadd.f32 %v2379_v44, %v2324_v53 }
 0x3bd   : > { %v2391_v15 = vadd.f32 %v2381_v50, %v2325_v1  ;;  %vm2557_vm12 = vcmp.eq.f32.partialorder %v2556_v62, 8.507059e+37  ;;  %v2559_v6 = vor.u32 1.1754944e-38, %v2558_v21 }
 0x3be   : > { %v5428_v51 = vpop.eup %5427  ;;  %v2640_v41 = vpack.c.bf16 %v6547_v36, %v6544_v32  ;;  %v2536_v12 = vadd.f32 %v6530_v8, %v2535_v9  ;;  %v5136_v60 = vmul.f32 -1.442695, %v6551_v39 }
 0x3bf   : > { %v5430_v63 = vpop.eup %5429  ;;  %v6561_v20 = vadd.f32 1.0, %v5428_v51 }
 0x3c0   : > { %v2548_v57 = vmul.f32 %v5430_v63, %v6532_v14  ;;  %5431 = vpow2.f32 %v5136_v60  ;;  %5141 = vmatmul.msk.bf16.vlgmr.msrb.gmra.mxu1 %vm497_vm1, %v2640_v41  ;;  %v2540_v58 = vsel %vm6567_vm6, %v6530_v8, %v2536_v12  ;;  %vm2553_vm8 = vweird.f32 %v5430_v63 }
 0x3c1   : > { %5433 = vrcp.f32 %v6561_v20  ;;  %v2445_v48 = vpop.f32.mrf.mxu0  ;;  %v2545_v49 = vsel %vm2542_vm7, %v2544_v16, %v2540_v58  ;;  %vm2554_vm10 = vmor %vm2552_vm9, %vm2553_vm8  ;;  %vm2567_vm14 = vweird.f32 %v6561_v20 }
 0x3c2   : > { %v2549_v43 = vsub.f32 1.0, %v2548_v57  ;;  %v2456_v11 = vadd.f32 %v2445_v48, %v2390_v0  ;;  %v2624_v56 = vmul.f32 %v2545_v49, %v6504_v45  ;;  %v2573_v0 = vand.u32 2147483648, %v6561_v20 }
 0x3c4   : > { %v2550_v13 = vmul.f32 %v5430_v63, %v2549_v43  ;;  %v6578_v19 = vadd.f32 %v6489_v33, %v2456_v11  ;;  %v6586_v53 = vadd.f32 %v2624_v56, %v6143_v30  ;;  %v2574_v48 = vor.u32 1.1754944e-38, %v2573_v0 }
 0x3c6   : > { %v5432_v27 = vpop.eup %5431  ;;  %v2551_v10 = vadd.f32 %v5430_v63, %v2550_v13  ;;  %v5137_v8 = vmul.f32 -1.442695, %v6578_v19 }
 0x3c7   : > { %v5434_v17 = vpop.eup %5433  ;;  %v2499_v44 = vadd.f32 1.0, %v5432_v27 }
 0x3c8   : > { %v2555_v23 = vsel %vm2554_vm10, %v5430_v63, %v2551_v10  ;;  %v2563_v54 = vmul.f32 %v5434_v17, %v6561_v20  ;;  %5435 = vpow2.f32 %v5137_v8  ;;  %vm2568_vm13 = vweird.f32 %v5434_v17 }
 0x3c9   : > { %v2560_v59 = vsel %vm2557_vm12, %v2559_v6, %v2555_v23  ;;  %5437 = vrcp.f32 %v2499_v44  ;;  %v2447_v22 = vpop.f32.mrf.mxu0  ;;  %vm2569_vm15 = vmor %vm2567_vm14, %vm2568_vm13  ;;  %v2588_v37 = vand.u32 2147483648, %v2499_v44  ;;  %vm2582_vm4 = vweird.f32 %v2499_v44 }
 0x3ca   : > { %v2625_v9 = vmul.f32 %v2560_v59, %v6512_v3  ;;  %v2564_v14 = vsub.f32 1.0, %v2563_v54  ;;  %v2457_v25 = vadd.f32 %v2447_v22, %v2391_v15 }
 0x3cb   : > { %v2589_v16 = vor.u32 1.1754944e-38, %v2588_v37 }
 0x3cc   : > { %v6589_v51 = vadd.f32 %v2625_v9, %v6146_v31  ;;  %v2565_v41 = vmul.f32 %v5434_v17, %v2564_v14  ;;  %v6592_v45 = vadd.f32 %v6489_v33, %v2457_v25  ;;  %v2571_v31 = vand.u32 2147483647, %v6561_v20  ;;  %v5154_v33 = vld [vmem:[%s7652_s9 + $0x14] sm:$0x3] }
 0x3cd   : > { %v2902_v18 = vsel %vm510_vm0, %v5154_v33, 0  ;;  %v2586_v20 = vand.u32 2147483647, %v2499_v44 }
 0x3ce   : > { %v5436_v12 = vpop.eup %5435  ;;  %v2566_v60 = vadd.f32 %v5434_v17, %v2565_v41  ;;  %v5138_v63 = vmul.f32 -1.442695, %v6592_v45  ;;  %v2641_v3 = vpack.c.bf16 %v6589_v51, %v6586_v53  ;;  %2911 = vmatpush.bf16.msrb.mxu2 %v2902_v18  ;;  %vm2572_vm2 = vcmp.eq.f32.partialorder %v2571_v31, 8.507059e+37 }
 0x3cf   : > { %v5438_v40 = vpop.eup %5437  ;;  %v2500_v30 = vadd.f32 1.0, %v5436_v12  ;;  %vm2587_vm6 = vcmp.eq.f32.partialorder %v2586_v20, 8.507059e+37 }
 0x3d0   : > { %v2578_v46 = vmul.f32 %v5438_v40, %v2499_v44  ;;  %5439 = vpow2.f32 %v5138_v63  ;;  %5142 = vmatmul.msk.bf16.gmra.mxu1 %vm497_vm1, %v2641_v3  ;;  %v2570_v47 = vsel %vm2569_vm15, %v5434_v17, %v2566_v60  ;;  %vm2583_vm3 = vweird.f32 %v5438_v40 }
 0x3d1   : > { %5441 = vrcp.f32 %v2500_v30  ;;  %v2575_v58 = vsel %vm2572_vm2, %v2574_v48, %v2570_v47  ;;  %vm2584_vm5 = vmor %vm2582_vm4, %vm2583_vm3  ;;  %v2603_v44 = vand.u32 2147483648, %v2500_v30  ;;  %vm2597_vm8 = vweird.f32 %v2500_v30 }
 0x3d2   : > { %v2579_v57 = vsub.f32 1.0, %v2578_v46  ;;  %v2626_v21 = vmul.f32 %v2575_v58, %v6527_v55  ;;  %v2601_v56 = vand.u32 2147483647, %v2500_v30 }
 0x3d3   : > { %v2604_v54 = vor.u32 1.1754944e-38, %v2603_v44 }
 0x3d4   : > { %v2580_v61 = vmul.f32 %v5438_v40, %v2579_v57  ;;  %v6608_v10 = vadd.f32 %v2626_v21, %v6197_v42  ;;  %vm2602_vm10 = vcmp.eq.f32.partialorder %v2601_v56, 8.507059e+37 }
 0x3d6   : > { %v5440_v43 = vpop.eup %5439  ;;  %v2581_v11 = vadd.f32 %v5438_v40, %v2580_v61  ;;  %v5168_v61 = vld [vmem:[%s7652_s9 + $0x18] sm:$0x3] }
 0x3d7   : > { %v5442_v34 = vpop.eup %5441  ;;  %v2501_v62 = vadd.f32 1.0, %v5440_v43  ;;  %v3070_v58 = vsel %vm510_vm0, %v5168_v61, 0 }
 0x3d8   : > { %v2585_v50 = vsel %vm2584_vm5, %v5438_v40, %v2581_v11  ;;  %v2593_v13 = vmul.f32 %v5442_v34, %v2500_v30  ;;  %vm2598_vm7 = vweird.f32 %v5442_v34  ;;  %3079 = vmatpush.bf16.msra.mxu1 %v3070_v58 }
 0x3d9   : > { %v2590_v1 = vsel %vm2587_vm6, %v2589_v16, %v2585_v50  ;;  %5443 = vrcp.f32 %v2501_v62  ;;  %vm2599_vm9 = vmor %vm2597_vm8, %vm2598_vm7  ;;  %v2618_v59 = vand.u32 2147483648, %v2501_v62  ;;  %v2616_v22 = vand.u32 2147483647, %v2501_v62 }
 0x3da   : > { %v2627_v49 = vmul.f32 %v2590_v1, %v6551_v39  ;;  %v2594_v27 = vsub.f32 1.0, %v2593_v13  ;;  %vm2612_vm13 = vweird.f32 %v2501_v62 }
 0x3db   : > { %v2619_v25 = vor.u32 1.1754944e-38, %v2618_v59  ;;  %vm2617_vm15 = vcmp.eq.f32.partialorder %v2616_v22, 8.507059e+37 }
 0x3dc   : > { %v6611_v8 = vadd.f32 %v2627_v49, %v6200_v2  ;;  %v2595_v17 = vmul.f32 %v5442_v34, %v2594_v27 }
 0x3de   : > { %v2596_v15 = vadd.f32 %v5442_v34, %v2595_v17  ;;  %v2642_v55 = vpack.c.bf16 %v6611_v8, %v6608_v10 }
 0x3df   : > { %v5444_v6 = vpop.eup %5443 }
 0x3e0   : > { %v2608_v23 = vmul.f32 %v5444_v6, %v2501_v62  ;;  %5143 = vmatmul.msk.bf16.gmra.mxu1 %vm497_vm1, %v2642_v55  ;;  %v2600_v39 = vsel %vm2599_vm9, %v5442_v34, %v2596_v15  ;;  %vm2613_vm12 = vweird.f32 %v5444_v6 }
 0x3e1   : > { %v2605_v9 = vsel %vm2602_vm10, %v2604_v54, %v2600_v39  ;;  %vm2614_vm14 = vmor %vm2612_vm13, %vm2613_vm12 }
 0x3e2   : > { %v2609_v42 = vsub.f32 1.0, %v2608_v23  ;;  %v2628_v41 = vmul.f32 %v2605_v9, %v6578_v19  ;;  %v6630_v19 = vld [vmem:[%s7651_s8 + $0x1] ss:$0 sm:$0xff] }
 0x3e4   : > { %v2610_v2 = vmul.f32 %v5444_v6, %v2609_v42  ;;  %v6619_v3 = vadd.f32 %v2628_v41, %v6240_v29  ;;  %v5163_v29 = vld [vmem:[%s7652_s9 + $0x16] sm:$0x3] }
 0x3e5   : > { %v3004_v47 = vsel %vm510_vm0, %v5163_v29, 0 }
 0x3e6   : > { %v2611_v14 = vadd.f32 %v5444_v6, %v2610_v2  ;;  %3013 = vmatpush.bf16.msra.mxu0 %v3004_v47 }
 0x3e8   : > { %v2615_v12 = vsel %vm2614_vm14, %v5444_v6, %v2611_v14 }
 0x3e9   : > { %v2620_v60 = vsel %vm2617_vm15, %v2619_v25, %v2615_v12 }
 0x3ea   : > { %v2629_v63 = vmul.f32 %v2620_v60, %v6592_v45 }
 0x3ec   : > { %v6622_v40 = vadd.f32 %v2629_v63, %v6233_v26  ;;  %v5153_v26 = vld [vmem:[%s7652_s9 + $0x12] sm:$0x3] }
 0x3ed   : > { %v2946_v33 = vsel %vm510_vm0, %v5153_v26, 0 }
 0x3ee   : > { %v2643_v0 = vpack.c.bf16 %v6622_v40, %v6619_v3  ;;  %2955 = vmatpush.bf16.msra.mxu3 %v2946_v33 }
 0x3f0   : > { %5144 = vmatmul.msk.bf16.gmra.mxu1 %vm497_vm1, %v2643_v0 }
 0x43d   : > { %v2673_v30 = vpop.f32.mrf.mxu1 }
 0x43e   : > { %v2674_v31 = vadd.f32 %v6630_v19, %v2673_v30 }
 0x440   : > { %v5145_v45 = vmul.f32 -1.442695, %v2674_v31 }
 0x442   : > { %5445 = vpow2.f32 %v5145_v45 }
 0x445   : > { %v2675_v46 = vpop.f32.mrf.mxu1 }
 0x446   : > { %v6642_v57 = vadd.f32 %v6630_v19, %v2675_v46  ;;  %v2875_v46 = vld [vmem:[#allocation2 + $0x1] sm:$0xff] }
 0x448   : > { %v5446_v18 = vpop.eup %5445  ;;  %v5146_v48 = vmul.f32 -1.442695, %v6642_v57 }
 0x449   : > { %v2717_v37 = vadd.f32 1.0, %v5446_v18  ;;  %v2861_v18 = vld [vmem:[#allocation2] sm:$0xff] }
 0x44a   : > { %5447 = vpow2.f32 %v5146_v48  ;;  %v2977_v48 = vld [vmem:[#allocation2 + $0x2] sm:$0xff] }
 0x44b   : > { %5449 = vrcp.f32 %v2717_v37  ;;  %v2736_v13 = vand.u32 2147483648, %v2717_v37  ;;  %v2734_v27 = vand.u32 2147483647, %v2717_v37  ;;  %vm2730_vm3 = vweird.f32 %v2717_v37 }
 0x44d   : > { %v2678_v20 = vpop.f32.mrf.mxu1  ;;  %v2737_v56 = vor.u32 1.1754944e-38, %v2736_v13  ;;  %vm2735_vm5 = vcmp.eq.f32.partialorder %v2734_v27, 8.507059e+37 }
 0x44e   : > { %v6650_v43 = vadd.f32 %v6630_v19, %v2678_v20 }
 0x450   : > { %v5448_v11 = vpop.eup %5447  ;;  %v5147_v34 = vmul.f32 -1.442695, %v6650_v43 }
 0x451   : > { %v5450_v16 = vpop.eup %5449  ;;  %v2718_v62 = vadd.f32 1.0, %v5448_v11 }
 0x452   : > { %v2726_v21 = vmul.f32 %v5450_v16, %v2717_v37  ;;  %5451 = vpow2.f32 %v5147_v34  ;;  %vm2731_vm2 = vweird.f32 %v5450_v16 }
 0x453   : > { %5453 = vrcp.f32 %v2718_v62  ;;  %vm2732_vm4 = vmor %vm2730_vm3, %vm2731_vm2  ;;  %v2751_v22 = vand.u32 2147483648, %v2718_v62  ;;  %v2749_v25 = vand.u32 2147483647, %v2718_v62  ;;  %vm2745_vm7 = vweird.f32 %v2718_v62 }
 0x454   : > { %v2727_v50 = vsub.f32 1.0, %v2726_v21  ;;  %v5173_v21 = vld [vmem:[%s7652_s9 + $0x1a] sm:$0x3] }
 0x455   : > { %v2680_v1 = vpop.f32.mrf.mxu1  ;;  %v2752_v30 = vor.u32 1.1754944e-38, %v2751_v22  ;;  %vm2750_vm9 = vcmp.eq.f32.partialorder %v2749_v25, 8.507059e+37 }
 0x456   : > { %v2728_v49 = vmul.f32 %v5450_v16, %v2727_v50  ;;  %v6654_v17 = vadd.f32 %v6630_v19, %v2680_v1  ;;  %v3136_v1 = vsel %vm510_vm0, %v5173_v21, 0 }
 0x457   : > { %3145 = vmatpush.bf16.msra.mxu2 %v3136_v1 }
 0x458   : > { %v5452_v15 = vpop.eup %5451  ;;  %v2729_v55 = vadd.f32 %v5450_v16, %v2728_v49  ;;  %v5148_v6 = vmul.f32 -1.442695, %v6654_v17 }
 0x459   : > { %v5454_v44 = vpop.eup %5453  ;;  %v6657_v23 = vadd.f32 1.0, %v5452_v15 }
 0x45a   : > { %v2733_v39 = vsel %vm2732_vm4, %v5450_v16, %v2729_v55  ;;  %v2741_v42 = vmul.f32 %v5454_v44, %v2718_v62  ;;  %5455 = vpow2.f32 %v5148_v6  ;;  %vm2746_vm6 = vweird.f32 %v5454_v44 }
 0x45b   : > { %v2738_v54 = vsel %vm2735_vm5, %v2737_v56, %v2733_v39  ;;  %5457 = vrcp.f32 %v6657_v23  ;;  %vm2747_vm8 = vmor %vm2745_vm7, %vm2746_vm6  ;;  %v2764_v37 = vand.u32 2147483647, %v6657_v23  ;;  %v2766_v61 = vand.u32 2147483648, %v6657_v23 }
 0x45c   : > { %v2845_v59 = vmul.f32 %v2738_v54, %v2674_v31  ;;  %v2742_v2 = vsub.f32 1.0, %v2741_v42  ;;  %vm2760_vm12 = vweird.f32 %v6657_v23 }
 0x45d   : > { %v2683_v9 = vpop.f32.mrf.mxu1  ;;  %v2767_v6 = vor.u32 1.1754944e-38, %v2766_v61  ;;  %vm2765_vm14 = vcmp.eq.f32.partialorder %v2764_v37, 8.507059e+37 }
 0x45e   : > { %2853 = vst.msk [vmem:[#allocation2 + $0x11] sm:$0xff] %vm497_vm1, %v2845_v59  ;;  %v2743_v14 = vmul.f32 %v5454_v44, %v2742_v2  ;;  %v6662_v41 = vadd.f32 %v6630_v19, %v2683_v9 }
 0x460   : > { %v5456_v12 = vpop.eup %5455  ;;  %v2744_v60 = vadd.f32 %v5454_v44, %v2743_v14  ;;  %v5149_v63 = vmul.f32 -1.442695, %v6662_v41 }
 0x461   : > { %v5458_v0 = vpop.eup %5457  ;;  %v6665_v31 = vadd.f32 1.0, %v5456_v12 }
 0x462   : > { %v2748_v45 = vsel %vm2747_vm8, %v5454_v44, %v2744_v60  ;;  %v2756_v26 = vmul.f32 %v5458_v0, %v6657_v23  ;;  %5459 = vpow2.f32 %v5149_v63  ;;  %vm2761_vm10 = vweird.f32 %v5458_v0 }
 0x463   : > { %v2753_v29 = vsel %vm2750_vm9, %v2752_v30, %v2748_v45  ;;  %5461 = vrcp.f32 %v6665_v31  ;;  %vm2762_vm13 = vmor %vm2760_vm12, %vm2761_vm10  ;;  %v2779_v59 = vand.u32 2147483647, %v6665_v31  ;;  %v2781_v2 = vand.u32 2147483648, %v6665_v31 }
 0x464   : > { %v2846_v33 = vmul.f32 %v2753_v29, %v6642_v57  ;;  %v2757_v47 = vsub.f32 1.0, %v2756_v26  ;;  %vm2775_vm2 = vweird.f32 %v6665_v31 }
 0x465   : > { %v2685_v20 = vpop.f32.mrf.mxu1  ;;  %v6672_v58 = vld [vmem:[#allocation2 + $0x11] sm:$0xff]  ;;  %v2782_v30 = vor.u32 1.1754944e-38, %v2781_v2  ;;  %vm2780_vm4 = vcmp.eq.f32.partialorder %v2779_v59, 8.507059e+37 }
 0x466   : > { %v2862_v11 = vld [vmem:[#allocation2 + $0x10] sm:$0xff]  ;;  %2854 = vst.msk [vmem:[#allocation2 + $0x21] sm:$0xff] %vm497_vm1, %v2846_v33  ;;  %v2758_v16 = vmul.f32 %v5458_v0, %v2757_v47  ;;  %v6678_v62 = vadd.f32 %v6630_v19, %v2685_v20  ;;  %v2885_v57 = vpack.c.bf16 %v6672_v58, %v2875_v46 }
 0x467   : > { %v6674_v34 = vld [vmem:[#allocation2 + $0x12] sm:$0xff]  ;;  %v2871_v50 = vpack.c.bf16 %v2862_v11, %v2861_v18 }
 0x468   : > { %v2987_v13 = vpack.c.bf16 %v6674_v34, %v2977_v48  ;;  %v5460_v49 = vpop.eup %5459  ;;  %v2759_v27 = vadd.f32 %v5458_v0, %v2758_v16  ;;  %v5150_v15 = vmul.f32 -1.442695, %v6678_v62  ;;  %5155 = vmatmul.msk.bf16.vlgmr.msrb.gmra.mxu2 %vm497_vm1, %v2885_v57 }
 0x469   : > { %v5462_v55 = vpop.eup %5461  ;;  %v6689_v44 = vadd.f32 1.0, %v5460_v49  ;;  %5159 = vmatmul.msk.bf16.vlgmr.msra.gmra.mxu3 %vm497_vm1, %v2871_v50 }
 0x46a   : > { %5164 = vmatmul.msk.bf16.vlgmr.msra.gmra.mxu0 %vm497_vm1, %v2987_v13  ;;  %v2763_v56 = vsel %vm2762_vm13, %v5458_v0, %v2759_v27  ;;  %v2771_v39 = vmul.f32 %v5462_v55, %v6665_v31  ;;  %5463 = vpow2.f32 %v5150_v15  ;;  %vm2776_vm15 = vweird.f32 %v5462_v55 }
 0x46b   : > { %v2768_v23 = vsel %vm2765_vm14, %v2767_v6, %v2763_v56  ;;  %5465 = vrcp.f32 %v6689_v44  ;;  %vm2777_vm3 = vmor %vm2775_vm2, %vm2776_vm15  ;;  %v2794_v18 = vand.u32 2147483647, %v6689_v44  ;;  %v2796_v48 = vand.u32 2147483648, %v6689_v44 }
 0x46c   : > { %v2847_v42 = vmul.f32 %v2768_v23, %v6650_v43  ;;  %v2772_v54 = vsub.f32 1.0, %v2771_v39  ;;  %vm2790_vm6 = vweird.f32 %v6689_v44 }
 0x46d   : > { %v2688_v22 = vpop.f32.mrf.mxu1  ;;  %v3044_v9 = vld [vmem:[#allocation2 + $0x20] sm:$0xff]  ;;  %v2797_v15 = vor.u32 1.1754944e-38, %v2796_v48  ;;  %vm2795_vm8 = vcmp.eq.f32.partialorder %v2794_v18, 8.507059e+37 }
 0x46e   : > { %2855 = vst.msk [vmem:[#allocation2 + $0x31] sm:$0xff] %vm497_vm1, %v2847_v42  ;;  %v2773_v14 = vmul.f32 %v5462_v55, %v2772_v54  ;;  %v6700_v25 = vadd.f32 %v6630_v19, %v2688_v22  ;;  %v3053_v12 = vpack.c.bf16 %v3044_v9, %v2862_v11  ;;  %v6710_v47 = vld [vmem:[#allocation2 + $0x21] sm:$0xff] }
 0x46f   : > { %v6726_v21 = vld [vmem:[#allocation2 + $0x22] sm:$0xff] }
 0x470   : > { %v5464_v60 = vpop.eup %5463  ;;  %v2774_v63 = vadd.f32 %v5462_v55, %v2773_v14  ;;  %v5151_v43 = vmul.f32 -1.442695, %v6700_v25  ;;  %5169 = vmatmul.msk.bf16.vlgmr.msra.gmra.mxu1 %vm497_vm1, %v3053_v12  ;;  %v5183_v12 = vld [vmem:[%s7652_s9 + $0x1e] sm:$0x3] }
 0x471   : > { %v5466_v0 = vpop.eup %5465  ;;  %v6705_v45 = vadd.f32 1.0, %v5464_v60 }
 0x472   : > { %v2778_v26 = vsel %vm2777_vm3, %v5462_v55, %v2774_v63  ;;  %v2786_v29 = vmul.f32 %v5466_v0, %v6689_v44  ;;  %5467 = vpow2.f32 %v5151_v43  ;;  %vm2791_vm5 = vweird.f32 %v5466_v0 }
 0x473   : > { %v2783_v46 = vsel %vm2780_vm4, %v2782_v30, %v2778_v26  ;;  %5469 = vrcp.f32 %v6705_v45  ;;  %vm2792_vm7 = vmor %vm2790_vm6, %vm2791_vm5  ;;  %v2811_v42 = vand.u32 2147483648, %v6705_v45  ;;  %v2809_v2 = vand.u32 2147483647, %v6705_v45 }
 0x474   : > { %v2848_v33 = vmul.f32 %v2783_v46, %v6654_v17  ;;  %v2787_v31 = vsub.f32 1.0, %v2786_v29  ;;  %vm2805_vm10 = vweird.f32 %v6705_v45  ;;  %v3268_v30 = vsel %vm510_vm0, %v5183_v12, 0 }
 0x475   : > { %v2690_v37 = vpop.f32.mrf.mxu1  ;;  %v6714_v61 = vld [vmem:[#allocation2 + $0x31] sm:$0xff]  ;;  %v2812_v63 = vor.u32 1.1754944e-38, %v2811_v42  ;;  %vm2810_vm13 = vcmp.eq.f32.partialorder %v2809_v2, 8.507059e+37  ;;  %3277 = vmatpush.bf16.msrb.mxu0 %v3268_v30 }
 0x476   : > { %v2864_v20 = vld [vmem:[#allocation2 + $0x30] sm:$0xff]  ;;  %2856 = vst.msk [vmem:[#allocation2 + $0x41] sm:$0xff] %vm497_vm1, %v2848_v33  ;;  %v2788_v16 = vmul.f32 %v5466_v0, %v2787_v31  ;;  %v6720_v57 = vadd.f32 %v6630_v19, %v2690_v37  ;;  %v6724_v17 = vpack.c.bf16 %v6714_v61, %v6710_v47 }
 0x477   : > { %v6716_v11 = vld [vmem:[#allocation2 + $0x32] sm:$0xff]  ;;  %v6728_v50 = vpack.c.bf16 %v2864_v20, %v3044_v9 }
 0x478   : > { %v6732_v13 = vpack.c.bf16 %v6716_v11, %v6726_v21  ;;  %v5468_v1 = vpop.eup %5467  ;;  %v2789_v49 = vadd.f32 %v5466_v0, %v2788_v16  ;;  %v5152_v27 = vmul.f32 -1.442695, %v6720_v57  ;;  %5156 = vmatmul.msk.bf16.gmra.mxu2 %vm497_vm1, %v6724_v17 }
 0x479   : > { %v5470_v19 = vpop.eup %5469  ;;  %v6738_v55 = vadd.f32 1.0, %v5468_v1  ;;  %5160 = vmatmul.msk.bf16.gmra.mxu3 %vm497_vm1, %v6728_v50 }
 0x47a   : > { %5165 = vmatmul.msk.bf16.gmra.mxu0 %vm497_vm1, %v6732_v13  ;;  %v2793_v6 = vsel %vm2792_vm7, %v5466_v0, %v2789_v49  ;;  %v2801_v44 = vmul.f32 %v5470_v19, %v6705_v45  ;;  %5471 = vpow2.f32 %v5152_v27  ;;  %vm2806_vm9 = vweird.f32 %v5470_v19 }
 0x47b   : > { %v2798_v56 = vsel %vm2795_vm8, %v2797_v15, %v2793_v6  ;;  %5473 = vrcp.f32 %v6738_v55  ;;  %vm2807_vm12 = vmor %vm2805_vm10, %vm2806_vm9  ;;  %v2824_v18 = vand.u32 2147483647, %v6738_v55  ;;  %v2826_v48 = vand.u32 2147483648, %v6738_v55 }
 0x47c   : > { %v2849_v39 = vmul.f32 %v2798_v56, %v6662_v41  ;;  %v2802_v23 = vsub.f32 1.0, %v2801_v44  ;;  %v5178_v41 = vld [vmem:[%s7652_s9 + $0x1c] sm:$0x3]  ;;  %vm2820_vm15 = vweird.f32 %v6738_v55  ;;  %v5193_v56 = vld [vmem:[%s7652_s9 + $0x22] sm:$0x3] }
 0x47d   : > { %v3046_v54 = vld [vmem:[#allocation2 + $0x40] sm:$0xff]  ;;  %v3202_v0 = vsel %vm510_vm0, %v5178_v41, 0  ;;  %v2827_v44 = vor.u32 1.1754944e-38, %v2826_v48  ;;  %vm2825_vm3 = vcmp.eq.f32.partialorder %v2824_v18, 8.507059e+37  ;;  %v3400_v42 = vsel %vm510_vm0, %v5193_v56, 0 }
 0x47e   : > { %2857 = vst.msk [vmem:[#allocation2 + $0x51] sm:$0xff] %vm497_vm1, %v2849_v39  ;;  %v2803_v59 = vmul.f32 %v5470_v19, %v2802_v23  ;;  %v3054_v22 = vpack.c.bf16 %v3046_v54, %v2864_v20  ;;  %3211 = vmatpush.bf16.msrb.mxu3 %v3202_v0  ;;  %v6762_v31 = vld [vmem:[#allocation2 + $0x41] sm:$0xff]  ;;  %3409 = vmatpush.bf16.msrb.mxu2 %v3400_v42 }
 0x47f   : > { %v6777_v27 = vld [vmem:[#allocation2 + $0x42] sm:$0xff] }
 0x480   : > { %v5472_v9 = vpop.eup %5471  ;;  %v2804_v14 = vadd.f32 %v5470_v19, %v2803_v59  ;;  %5170 = vmatmul.msk.bf16.gmra.mxu1 %vm497_vm1, %v3054_v22  ;;  %v3186_v56 = vpack.c.bf16 %v6777_v27, %v6716_v11  ;;  %v3248_v11 = vld [vmem:[#allocation2 + $0x90] sm:$0xff] }
 0x481   : > { %v5474_v60 = vpop.eup %5473  ;;  %v2724_v43 = vadd.f32 1.0, %v5472_v9 }
 0x482   : > { %v2808_v26 = vsel %vm2807_vm12, %v5470_v19, %v2804_v14  ;;  %v2816_v45 = vmul.f32 %v5474_v60, %v6738_v55  ;;  %vm2821_vm14 = vweird.f32 %v5474_v60  ;;  %v5188_v55 = vld [vmem:[%s7652_s9 + $0x20] sm:$0x3] }
 0x483   : > { %v2813_v29 = vsel %vm2810_vm13, %v2812_v63, %v2808_v26  ;;  %5475 = vrcp.f32 %v2724_v43  ;;  %vm2822_vm2 = vmor %vm2820_vm15, %vm2821_vm14  ;;  %v3334_v59 = vsel %vm510_vm0, %v5188_v55, 0  ;;  %v2841_v9 = vand.u32 2147483648, %v2724_v43 }
 0x484   : > { %v2850_v46 = vmul.f32 %v2813_v29, %v6678_v62  ;;  %v2817_v33 = vsub.f32 1.0, %v2816_v45  ;;  %3343 = vmatpush.bf16.msrb.mxu1 %v3334_v59  ;;  %v2839_v12 = vand.u32 2147483647, %v2724_v43  ;;  %vm2835_vm5 = vweird.f32 %v2724_v43 }
 0x485   : > { %v6766_v37 = vld [vmem:[#allocation2 + $0x51] sm:$0xff]  ;;  %v2842_v0 = vor.u32 1.1754944e-38, %v2841_v9 }
 0x486   : > { %v2866_v20 = vld [vmem:[#allocation2 + $0x50] sm:$0xff]  ;;  %2858 = vst.msk [vmem:[#allocation2 + $0x61] sm:$0xff] %vm497_vm1, %v2850_v46  ;;  %v2818_v1 = vmul.f32 %v5474_v60, %v2817_v33  ;;  %v6773_v49 = vpack.c.bf16 %v6766_v37, %v6762_v31  ;;  %vm2840_vm7 = vcmp.eq.f32.partialorder %v2839_v12, 8.507059e+37 }
 0x487   : > { %v6768_v16 = vld [vmem:[#allocation2 + $0x52] sm:$0xff]  ;;  %v6775_v62 = vpack.c.bf16 %v2866_v20, %v3046_v54 }
 0x488   : > { %v6781_v19 = vpack.c.bf16 %v6768_v16, %v6777_v27  ;;  %v2819_v15 = vadd.f32 %v5474_v60, %v2818_v1  ;;  %5157 = vmatmul.msk.bf16.gmra.mxu2 %vm497_vm1, %v6773_v49 }
 0x489   : > { %v5476_v6 = vpop.eup %5475  ;;  %5161 = vmatmul.msk.bf16.gmra.mxu3 %vm497_vm1, %v6775_v62 }
 0x48a   : > { %5166 = vmatmul.msk.bf16.gmra.mxu0 %vm497_vm1, %v6781_v19  ;;  %v2823_v39 = vsel %vm2822_vm2, %v5474_v60, %v2819_v15  ;;  %v2831_v23 = vmul.f32 %v5476_v6, %v2724_v43  ;;  %vm2836_vm4 = vweird.f32 %v5476_v6 }
 0x48b   : > { %v2828_v54 = vsel %vm2825_vm3, %v2827_v44, %v2823_v39  ;;  %vm2837_vm6 = vmor %vm2835_vm5, %vm2836_vm4  ;;  %v3120_v44 = vpack.c.bf16 %v6762_v31, %v6714_v61  ;;  %v3314_v31 = vld [vmem:[#allocation2 + $0x91] sm:$0xff] }
 0x48c   : > { %v2851_v2 = vmul.f32 %v2828_v54, %v6700_v25  ;;  %v2832_v22 = vsub.f32 1.0, %v2831_v23 }
 0x48d   : > { %v3048_v14 = vld [vmem:[#allocation2 + $0x60] sm:$0xff] }
 0x48e   : > { %2859 = vst.msk [vmem:[#allocation2 + $0x71] sm:$0xff] %vm497_vm1, %v2851_v2  ;;  %v2833_v41 = vmul.f32 %v5476_v6, %v2832_v22  ;;  %v3055_v60 = vpack.c.bf16 %v3048_v14, %v2866_v20  ;;  %v2881_v45 = vld [vmem:[#allocation2 + $0x61] sm:$0xff] }
 0x48f   : > { %v2983_v29 = vld [vmem:[#allocation2 + $0x62] sm:$0xff] }
 0x490   : > { %v2834_v63 = vadd.f32 %v5476_v6, %v2833_v41  ;;  %5171 = vmatmul.msk.bf16.gmra.mxu1 %vm497_vm1, %v3055_v60 }
 0x492   : > { %v2838_v30 = vsel %vm2837_vm6, %v5476_v6, %v2834_v63  ;;  %v3185_v6 = vpack.c.bf16 %v6726_v21, %v6674_v34  ;;  %v3187_v34 = vpack.c.bf16 %v2983_v29, %v6768_v16 }
 0x493   : > { %v2843_v26 = vsel %vm2840_vm7, %v2842_v0, %v2838_v30 }
 0x494   : > { %v2852_v25 = vmul.f32 %v2843_v26, %v6720_v57  ;;  %v3119_v57 = vpack.c.bf16 %v6710_v47, %v6672_v58  ;;  %v3121_v58 = vpack.c.bf16 %v2881_v45, %v6766_v37 }
 0x495   : > { %v2882_v46 = vld [vmem:[#allocation2 + $0x71] sm:$0xff] }
 0x496   : > { %v2868_v33 = vld [vmem:[#allocation2 + $0x70] sm:$0xff]  ;;  %2860 = vst.msk [vmem:[#allocation2 + $0x81] sm:$0xff] %vm497_vm1, %v2852_v25  ;;  %v2888_v48 = vpack.c.bf16 %v2882_v46, %v2881_v45 }
 0x497   : > { %v2984_v18 = vld [vmem:[#allocation2 + $0x72] sm:$0xff]  ;;  %v2874_v20 = vpack.c.bf16 %v2868_v33, %v3048_v14 }
 0x498   : > { %v2990_v1 = vpack.c.bf16 %v2984_v18, %v2983_v29  ;;  %5158 = vmatmul.msk.bf16.gmra.mxu2 %vm497_vm1, %v2888_v48 }
 0x499   : > { %5162 = vmatmul.msk.bf16.gmra.mxu3 %vm497_vm1, %v2874_v20 }
 0x49a   : > { %5167 = vmatmul.msk.bf16.gmra.mxu0 %vm497_vm1, %v2990_v1 }
 0x49d   : > { %v3050_v43 = vld [vmem:[#allocation2 + $0x80] sm:$0xff] }
 0x49e   : > { %v3056_v15 = vpack.c.bf16 %v3050_v43, %v2868_v33  ;;  %v3116_v47 = vld [vmem:[#allocation2 + $0x81] sm:$0xff] }
 0x49f   : > { %v3182_v61 = vld [vmem:[#allocation2 + $0x82] sm:$0xff]  ;;  %v3320_v37 = vpack.c.bf16 %v3314_v31, %v3116_v47 }
 0x4a0   : > { %5172 = vmatmul.msk.bf16.gmra.mxu1 %vm497_vm1, %v3056_v15  ;;  %v3188_v21 = vpack.c.bf16 %v3182_v61, %v2984_v18 }
 0x4a8   : > { %5174 = vmatmul.msk.bf16.vlgmr.msra.gmra.mxu2 %vm497_vm1, %v3119_v57 }
 0x4a9   : > { %5179 = vmatmul.msk.bf16.vlgmr.msrb.gmra.mxu3 %vm497_vm1, %v3185_v6 }
 0x4aa   : > { %5184 = vmatmul.msk.bf16.vlgmr.msrb.gmra.mxu0 %vm497_vm1, %v6728_v50  ;;  %v3254_v50 = vpack.c.bf16 %v3248_v11, %v3050_v43 }
 0x4b0   : > { %5189 = vmatmul.msk.bf16.vlgmr.msrb.gmra.mxu1 %vm497_vm1, %v6724_v17  ;;  %v3122_v17 = vpack.c.bf16 %v3116_v47, %v2882_v46 }
 0x4b8   : > { %5175 = vmatmul.msk.bf16.gmra.mxu2 %vm497_vm1, %v3120_v44 }
 0x4b9   : > { %5180 = vmatmul.msk.bf16.gmra.mxu3 %vm497_vm1, %v3186_v56 }
 0x4ba   : > { %5185 = vmatmul.msk.bf16.gmra.mxu0 %vm497_vm1, %v6775_v62 }
 0x4c0   : > { %5190 = vmatmul.msk.bf16.gmra.mxu1 %vm497_vm1, %v6773_v49 }
 0x4c8   : > { %5176 = vmatmul.msk.bf16.gmra.mxu2 %vm497_vm1, %v3121_v58 }
 0x4c9   : > { %5181 = vmatmul.msk.bf16.gmra.mxu3 %vm497_vm1, %v3187_v34 }
 0x4ca   : > { %5186 = vmatmul.msk.bf16.gmra.mxu0 %vm497_vm1, %v2874_v20  ;;  %v3380_v20 = vld [vmem:[#allocation2 + $0x92] sm:$0xff] }
 0x4cb   : > { %v3386_v6 = vpack.c.bf16 %v3380_v20, %v3182_v61 }
 0x4d0   : > { %5191 = vmatmul.msk.bf16.gmra.mxu1 %vm497_vm1, %v2888_v48 }
 0x4d8   : > { %5177 = vmatmul.msk.bf16.gmra.mxu2 %vm497_vm1, %v3122_v17 }
 0x4d9   : > { %5182 = vmatmul.msk.bf16.gmra.mxu3 %vm497_vm1, %v3188_v21 }
 0x4da   : > { %5187 = vmatmul.msk.bf16.gmra.mxu0 %vm497_vm1, %v3254_v50 }
 0x4e0   : > { %5192 = vmatmul.msk.bf16.gmra.mxu1 %vm497_vm1, %v3320_v37  ;;  %v5207_v37 = vld [vmem:[%s7650_s7 + $0x4] sm:$0x3] }
 0x4e1   : > { %v3644_v61 = vsel %vm510_vm0, %v5207_v37, 0 }
 0x4e2   : > { %3653 = vmatpush.bf16.msra.mxu3 %v3644_v61 }
 0x4e7   : > { %v3015_v16 = vpop.f32.mrf.mxu0 }
 0x4e8   : > { %5194 = vmatmul.msk.bf16.vlgmr.msrb.gmra.mxu2 %vm497_vm1, %v6732_v13 }
 0x4eb   : > { %v2913_v49 = vpop.f32.mrf.mxu2 }
 0x4ec   : > { %v2957_v62 = vpop.f32.mrf.mxu3 }
 0x4ed   : > { %v2958_v27 = vadd.f32 %v2957_v62, %v2913_v49  ;;  %v3081_v55 = vpop.f32.mrf.mxu1 }
 0x4ef   : > { %v6839_v39 = vpop.f32.mrf.mxu0  ;;  %v3035_v23 = vadd.f32 %v3015_v16, %v2958_v27 }
 0x4f1   : > { %v3101_v42 = vadd.f32 %v3081_v55, %v3035_v23 }
 0x4f3   : > { %v2915_v54 = vpop.f32.mrf.mxu2 }
 0x4f4   : > { %v2959_v59 = vpop.f32.mrf.mxu3 }
 0x4f5   : > { %v3083_v2 = vpop.f32.mrf.mxu1 }
 0x4f7   : > { %v3020_v22 = vpop.f32.mrf.mxu0 }
 0x4f8   : > { %5195 = vmatmul.msk.bf16.gmra.mxu2 %vm497_vm1, %v6781_v19 }
 0x4fb   : > { %v2918_v9 = vpop.f32.mrf.mxu2 }
 0x4fc   : > { %v2962_v14 = vpop.f32.mrf.mxu3 }
 0x4fd   : > { %v2963_v41 = vadd.f32 %v2962_v14, %v2918_v9  ;;  %v3086_v12 = vpop.f32.mrf.mxu1 }
 0x4ff   : > { %v3037_v13 = vadd.f32 %v3020_v22, %v2963_v41  ;;  %v6843_v60 = vpop.f32.mrf.mxu0 }
 0x501   : > { %v3103_v63 = vadd.f32 %v3086_v12, %v3037_v13 }
 0x503   : > { %v2920_v0 = vpop.f32.mrf.mxu2 }
 0x504   : > { %v2964_v30 = vpop.f32.mrf.mxu3 }
 0x505   : > { %v6845_v26 = vpop.f32.mrf.mxu1 }
 0x507   : > { %v3025_v25 = vpop.f32.mrf.mxu0 }
 0x508   : > { %5196 = vmatmul.msk.bf16.gmra.mxu2 %vm497_vm1, %v2990_v1 }
 0x50b   : > { %v2923_v45 = vpop.f32.mrf.mxu2 }
 0x50c   : > { %v2967_v29 = vpop.f32.mrf.mxu3 }
 0x50d   : > { %v2968_v46 = vadd.f32 %v2967_v29, %v2923_v45  ;;  %v3091_v33 = vpop.f32.mrf.mxu1 }
 0x50f   : > { %v3039_v19 = vadd.f32 %v3025_v25, %v2968_v46  ;;  %v6850_v43 = vpop.f32.mrf.mxu0  ;;  %v2960_v25 = vadd.f32 %v2959_v59, %v2915_v54  ;;  %v6879_v54 = vld [vmem:[%s7653_s10 + $0x1] ss:$0 sm:$0xff] }
 0x511   : > { %v3105_v18 = vadd.f32 %v3091_v33, %v3039_v19 }
 0x513   : > { %v6848_v48 = vpop.f32.mrf.mxu2 }
 0x514   : > { %v6852_v15 = vpop.f32.mrf.mxu3 }
 0x515   : > { %v6854_v57 = vpop.f32.mrf.mxu1 }
 0x517   : > { %v3030_v58 = vpop.f32.mrf.mxu0 }
 0x518   : > { %5197 = vmatmul.msk.bf16.gmra.mxu2 %vm497_vm1, %v3386_v6 }
 0x51b   : > { %v2928_v1 = vpop.f32.mrf.mxu2 }
 0x51c   : > { %v2972_v44 = vpop.f32.mrf.mxu3 }
 0x51d   : > { %v2973_v56 = vadd.f32 %v2972_v44, %v2928_v1  ;;  %v3096_v47 = vpop.f32.mrf.mxu1 }
 0x51f   : > { %v3041_v34 = vadd.f32 %v3030_v58, %v2973_v56  ;;  %v6865_v23 = vpop.f32.mrf.mxu0 }
 0x521   : > { %v3107_v11 = vadd.f32 %v3096_v47, %v3041_v34  ;;  %v2965_v47 = vadd.f32 %v2964_v30, %v2920_v0 }
 0x523   : > { %v6857_v17 = vpop.f32.mrf.mxu2 }
 0x524   : > { %v6863_v27 = vpop.f32.mrf.mxu3 }
 0x525   : > { %v6867_v9 = vpop.f32.mrf.mxu1 }
 0x527   : > { %v3279_v41 = vpop.f32.mrf.mxu0 }
 0x52b   : > { %v3147_v21 = vpop.f32.mrf.mxu2 }
 0x52c   : > { %v3167_v50 = vadd.f32 %v3147_v21, %v3101_v42  ;;  %v3213_v42 = vpop.f32.mrf.mxu3 }
 0x52d   : > { %v3345_v12 = vpop.f32.mrf.mxu1 }
 0x52e   : > { %v3233_v33 = vadd.f32 %v3213_v42, %v3167_v50 }
 0x52f   : > { %v3281_v46 = vpop.f32.mrf.mxu0 }
 0x530   : > { %v3299_v6 = vadd.f32 %v3279_v41, %v3233_v33 }
 0x532   : > { %v3365_v56 = vadd.f32 %v3345_v12, %v3299_v6 }
 0x533   : > { %v3149_v31 = vpop.f32.mrf.mxu2 }
 0x534   : > { %v3215_v45 = vpop.f32.mrf.mxu3 }
 0x537   : > { %v3284_v34 = vpop.f32.mrf.mxu0 }
 0x53b   : > { %v3152_v16 = vpop.f32.mrf.mxu2 }
 0x53c   : > { %v3169_v49 = vadd.f32 %v3152_v16, %v3103_v63  ;;  %v3036_v63 = vadd.f32 %v6839_v39, %v2960_v25  ;;  %v3218_v44 = vpop.f32.mrf.mxu3 }
 0x53e   : > { %v3102_v20 = vadd.f32 %v3083_v2, %v3036_v63  ;;  %v3038_v2 = vadd.f32 %v6843_v60, %v2965_v47  ;;  %v3235_v61 = vadd.f32 %v3218_v44, %v3169_v49 }
 0x53f   : > { %v3286_v41 = vpop.f32.mrf.mxu0 }
 0x540   : > { %v3168_v1 = vadd.f32 %v3149_v31, %v3102_v20  ;;  %v3104_v42 = vadd.f32 %v6845_v26, %v3038_v2  ;;  %v3301_v0 = vadd.f32 %v3284_v34, %v3235_v61 }
 0x542   : > { %v3234_v58 = vadd.f32 %v3215_v45, %v3168_v1 }
 0x543   : > { %v3154_v62 = vpop.f32.mrf.mxu2 }
 0x544   : > { %v3220_v31 = vpop.f32.mrf.mxu3  ;;  %v3170_v30 = vadd.f32 %v3154_v62, %v3104_v42 }
 0x546   : > { %v3236_v33 = vadd.f32 %v3220_v31, %v3170_v30 }
 0x547   : > { %v3289_v6 = vpop.f32.mrf.mxu0 }
 0x548   : > { %v3302_v1 = vadd.f32 %v3286_v41, %v3236_v33 }
 0x54b   : > { %v3157_v55 = vpop.f32.mrf.mxu2 }
 0x54c   : > { %v3171_v22 = vadd.f32 %v3157_v55, %v3105_v18  ;;  %v3347_v18 = vpop.f32.mrf.mxu1  ;;  %v3223_v20 = vpop.f32.mrf.mxu3 }
 0x54f   : > { %v3291_v42 = vpop.f32.mrf.mxu0 }
 0x553   : > { %v6869_v14 = vpop.f32.mrf.mxu2 }
 0x554   : > { %v3350_v21 = vpop.f32.mrf.mxu1  ;;  %v3225_v2 = vpop.f32.mrf.mxu3 }
 0x555   : > { %v3367_v49 = vadd.f32 %v3350_v21, %v3301_v0 }
 0x55b   : > { %v3162_v13 = vpop.f32.mrf.mxu2 }
 0x55c   : > { %v6871_v29 = vadd.f32 %v3162_v13, %v3107_v11  ;;  %v3300_v11 = vadd.f32 %v3281_v46, %v3234_v58  ;;  %v3352_v45 = vpop.f32.mrf.mxu1  ;;  %v2970_v46 = vadd.f32 %v6852_v15, %v6848_v48 }
 0x55d   : > { %v3368_v47 = vadd.f32 %v3352_v45, %v3302_v1 }
 0x55e   : > { %v3366_v16 = vadd.f32 %v3347_v18, %v3300_v11  ;;  %v3040_v62 = vadd.f32 %v6850_v43, %v2970_v46  ;;  %v2975_v46 = vadd.f32 %v6863_v27, %v6857_v17 }
 0x560   : > { %v3106_v15 = vadd.f32 %v6854_v57, %v3040_v62 }
 0x562   : > { %v3172_v43 = vadd.f32 %v6869_v14, %v3106_v15 }
 0x563   : > { %v6874_v19 = vpop.f32.mrf.mxu2 }
 0x564   : > { %v3238_v41 = vadd.f32 %v3225_v2, %v3172_v43 }
 0x56b   : > { %v3411_v59 = vpop.f32.mrf.mxu2 }
 0x56c   : > { %v3431_v39 = vadd.f32 %v3411_v59, %v3365_v56  ;;  %v3237_v59 = vadd.f32 %v3223_v20, %v3171_v22  ;;  %v3304_v20 = vadd.f32 %v3291_v42, %v3238_v41 }
 0x56e   : > { %v6882_v50 = vadd.f32 %v6879_v54, %v3431_v39  ;;  %v3355_v39 = vpop.f32.mrf.mxu1 }
 0x570   : > { %v5199_v37 = vmul.f32 -1.442695, %v6882_v50 }
 0x572   : > { %5477 = vpow2.f32 %v5199_v37 }
 0x573   : > { %v3413_v55 = vpop.f32.mrf.mxu2 }
 0x574   : > { %v3432_v12 = vadd.f32 %v3413_v55, %v3366_v16  ;;  %v3303_v16 = vadd.f32 %v3289_v6, %v3237_v59  ;;  %v3042_v59 = vadd.f32 %v6865_v23, %v2975_v46 }
 0x576   : > { %v6888_v13 = vadd.f32 %v6879_v54, %v3432_v12  ;;  %v3369_v30 = vadd.f32 %v3355_v39, %v3303_v16 }
 0x578   : > { %v5478_v25 = vpop.eup %5477  ;;  %v5200_v60 = vmul.f32 -1.442695, %v6888_v13 }
 0x579   : > { %v3476_v63 = vadd.f32 1.0, %v5478_v25 }
 0x57a   : > { %5479 = vpow2.f32 %v5200_v60 }
 0x57b   : > { %5481 = vrcp.f32 %v3476_v63  ;;  %v3416_v26 = vpop.f32.mrf.mxu2  ;;  %v3495_v25 = vand.u32 2147483648, %v3476_v63  ;;  %vm3489_vm9 = vweird.f32 %v3476_v63  ;;  %v3493_v14 = vand.u32 2147483647, %v3476_v63 }
 0x57c   : > { %v3433_v18 = vadd.f32 %v3416_v26, %v3367_v49  ;;  %v3357_v26 = vpop.f32.mrf.mxu1 }
 0x57d   : > { %vm3494_vm12 = vcmp.eq.f32.partialorder %v3493_v14, 8.507059e+37  ;;  %v3370_v39 = vadd.f32 %v3357_v26, %v3304_v20 }
 0x57e   : > { %v6895_v44 = vadd.f32 %v6879_v54, %v3433_v18 }
 0x580   : > { %v5480_v56 = vpop.eup %5479  ;;  %v5201_v58 = vmul.f32 -1.442695, %v6895_v44 }
 0x581   : > { %v5482_v34 = vpop.eup %5481  ;;  %v3477_v48 = vadd.f32 1.0, %v5480_v56 }
 0x582   : > { %v3485_v11 = vmul.f32 %v5482_v34, %v3476_v63  ;;  %5483 = vpow2.f32 %v5201_v58  ;;  %vm3490_vm8 = vweird.f32 %v5482_v34  ;;  %v3496_v63 = vor.u32 1.1754944e-38, %v3495_v25  ;;  %v3228_v58 = vpop.f32.mrf.mxu3 }
 0x583   : > { %5485 = vrcp.f32 %v3477_v48  ;;  %v3418_v21 = vpop.f32.mrf.mxu2  ;;  %vm6908_vm10 = vmor %vm3489_vm9, %vm3490_vm8  ;;  %v3508_v1 = vand.u32 2147483647, %v3477_v48  ;;  %v3510_v56 = vand.u32 2147483648, %v3477_v48  ;;  %vm3504_vm14 = vweird.f32 %v3477_v48 }
 0x584   : > { %v3486_v31 = vsub.f32 1.0, %v3485_v11  ;;  %v3434_v37 = vadd.f32 %v3418_v21, %v3368_v47  ;;  %v3239_v43 = vadd.f32 %v3228_v58, %v6871_v29  ;;  %v3360_v25 = vpop.f32.mrf.mxu1 }
 0x585   : > { %vm3509_vm2 = vcmp.eq.f32.partialorder %v3508_v1, 8.507059e+37  ;;  %v3511_v2 = vor.u32 1.1754944e-38, %v3510_v56 }
 0x586   : > { %v3487_v61 = vmul.f32 %v5482_v34, %v3486_v31  ;;  %v6901_v55 = vadd.f32 %v6879_v54, %v3434_v37  ;;  %v3294_v37 = vpop.f32.mrf.mxu0 }
 0x588   : > { %v5484_v22 = vpop.eup %5483  ;;  %v3488_v57 = vadd.f32 %v5482_v34, %v3487_v61  ;;  %v5202_v12 = vmul.f32 -1.442695, %v6901_v55 }
 0x589   : > { %v5486_v0 = vpop.eup %5485  ;;  %v6904_v45 = vadd.f32 1.0, %v5484_v22  ;;  %v3108_v22 = vadd.f32 %v6867_v9, %v3042_v59 }
 0x58a   : > { %v3500_v60 = vmul.f32 %v5486_v0, %v3477_v48  ;;  %5487 = vpow2.f32 %v5202_v12  ;;  %v3492_v18 = vsel %vm6908_vm10, %v5482_v34, %v3488_v57  ;;  %vm3505_vm13 = vweird.f32 %v5486_v0  ;;  %v3230_v46 = vpop.f32.mrf.mxu3 }
 0x58b   : > { %5489 = vrcp.f32 %v6904_v45  ;;  %v3421_v33 = vpop.f32.mrf.mxu2  ;;  %v3497_v15 = vsel %vm3494_vm12, %v3496_v63, %v3492_v18  ;;  %vm3506_vm15 = vmor %vm3504_vm14, %vm3505_vm13  ;;  %v3305_v12 = vadd.f32 %v3294_v37, %v3239_v43  ;;  %v3525_v26 = vand.u32 2147483648, %v6904_v45 }
 0x58c   : > { %v3501_v62 = vsub.f32 1.0, %v3500_v60  ;;  %v3435_v6 = vadd.f32 %v3421_v33, %v3369_v30  ;;  %v3604_v16 = vmul.f32 %v3497_v15, %v6882_v50  ;;  %v3174_v30 = vadd.f32 %v6874_v19, %v3108_v22 }
 0x58d   : > { %v3371_v20 = vadd.f32 %v3360_v25, %v3305_v12  ;;  %vm3519_vm4 = vweird.f32 %v6904_v45  ;;  %v3523_v18 = vand.u32 2147483647, %v6904_v45  ;;  %v3526_v15 = vor.u32 1.1754944e-38, %v3525_v26 }
 0x58e   : > { %v3502_v17 = vmul.f32 %v5486_v0, %v3501_v62  ;;  %v6916_v27 = vadd.f32 %v6879_v54, %v3435_v6  ;;  %v6927_v14 = vadd.f32 %v3604_v16, %v6544_v32  ;;  %v3240_v32 = vadd.f32 %v3230_v46, %v3174_v30  ;;  %v3296_v1 = vpop.f32.mrf.mxu0 }
 0x58f   : > { %vm3524_vm6 = vcmp.eq.f32.partialorder %v3523_v18, 8.507059e+37 }
 0x590   : > { %v5488_v47 = vpop.eup %5487  ;;  %v3503_v11 = vadd.f32 %v5486_v0, %v3502_v17  ;;  %v5203_v34 = vmul.f32 -1.442695, %v6916_v27  ;;  %v3306_v59 = vadd.f32 %v3296_v1, %v3240_v32 }
 0x591   : > { %v5490_v21 = vpop.eup %5489  ;;  %v3479_v31 = vadd.f32 1.0, %v5488_v47 }
 0x592   : > { %v3507_v61 = vsel %vm3506_vm15, %v5486_v0, %v3503_v11  ;;  %v3515_v23 = vmul.f32 %v5490_v21, %v6904_v45  ;;  %5491 = vpow2.f32 %v5203_v34  ;;  %vm3520_vm3 = vweird.f32 %v5490_v21 }
 0x593   : > { %v3512_v42 = vsel %vm3509_vm2, %v3511_v2, %v3507_v61  ;;  %5493 = vrcp.f32 %v3479_v31  ;;  %v3423_v48 = vpop.f32.mrf.mxu2  ;;  %vm6944_vm5 = vmor %vm3519_vm4, %vm3520_vm3  ;;  %v3538_v45 = vand.u32 2147483647, %v3479_v31  ;;  %v3540_v47 = vand.u32 2147483648, %v3479_v31  ;;  %v3362_v2 = vpop.f32.mrf.mxu1 }
 0x594   : > { %v3605_v41 = vmul.f32 %v3512_v42, %v6888_v13  ;;  %v3516_v57 = vsub.f32 1.0, %v3515_v23  ;;  %v3436_v29 = vadd.f32 %v3423_v48, %v3370_v39  ;;  %vm3534_vm8 = vweird.f32 %v3479_v31 }
 0x595   : > { %v3372_v61 = vadd.f32 %v3362_v2, %v3306_v59  ;;  %vm3539_vm10 = vcmp.eq.f32.partialorder %v3538_v45, 8.507059e+37  ;;  %v3541_v23 = vor.u32 1.1754944e-38, %v3540_v47 }
 0x596   : > { %v6930_v50 = vadd.f32 %v3605_v41, %v6547_v36  ;;  %v3517_v0 = vmul.f32 %v5490_v21, %v3516_v57  ;;  %v6933_v9 = vadd.f32 %v6879_v54, %v3436_v29 }
 0x598   : > { %v5492_v60 = vpop.eup %5491  ;;  %v3622_v13 = vpack.c.bf16 %v6930_v50, %v6927_v14  ;;  %v3518_v49 = vadd.f32 %v5490_v21, %v3517_v0  ;;  %v5204_v19 = vmul.f32 -1.442695, %v6933_v9 }
 0x599   : > { %v5494_v33 = vpop.eup %5493  ;;  %v6939_v36 = vadd.f32 1.0, %v5492_v60 }
 0x59a   : > { %v3530_v62 = vmul.f32 %v5494_v33, %v3479_v31  ;;  %5495 = vpow2.f32 %v5204_v19  ;;  %5209 = vmatmul.msk.bf16.vlgmr.msra.gmra.mxu3 %vm497_vm1, %v3622_v13  ;;  %v3522_v56 = vsel %vm6944_vm5, %v5490_v21, %v3518_v49  ;;  %vm3535_vm7 = vweird.f32 %v5494_v33 }
 0x59b   : > { %5497 = vrcp.f32 %v6939_v36  ;;  %v3426_v63 = vpop.f32.mrf.mxu2  ;;  %v3527_v34 = vsel %vm3524_vm6, %v3526_v15, %v3522_v56  ;;  %vm3536_vm9 = vmor %vm3534_vm8, %vm3535_vm7  ;;  %vm3549_vm13 = vweird.f32 %v6939_v36 }
 0x59c   : > { %v3531_v58 = vsub.f32 1.0, %v3530_v62  ;;  %v3437_v17 = vadd.f32 %v3426_v63, %v3371_v20  ;;  %v3606_v42 = vmul.f32 %v3527_v34, %v6895_v44 }
 0x59e   : > { %v3532_v39 = vmul.f32 %v5494_v33, %v3531_v58  ;;  %v6952_v11 = vadd.f32 %v6879_v54, %v3437_v17  ;;  %v6959_v25 = vadd.f32 %v3606_v42, %v6586_v53 }
 0x5a0   : > { %v5496_v43 = vpop.eup %5495  ;;  %v3533_v37 = vadd.f32 %v5494_v33, %v3532_v39  ;;  %v5205_v16 = vmul.f32 -1.442695, %v6952_v11 }
 0x5a1   : > { %v5498_v21 = vpop.eup %5497  ;;  %v3481_v22 = vadd.f32 1.0, %v5496_v43 }
 0x5a2   : > { %v3537_v48 = vsel %vm3536_vm9, %v5494_v33, %v3533_v37  ;;  %v3545_v41 = vmul.f32 %v5498_v21, %v6939_v36  ;;  %5499 = vpow2.f32 %v5205_v16  ;;  %vm3550_vm12 = vweird.f32 %v5498_v21 }
 0x5a3   : > { %v3542_v57 = vsel %vm3539_vm10, %v3541_v23, %v3537_v48  ;;  %5501 = vrcp.f32 %v3481_v22  ;;  %v3428_v29 = vpop.f32.mrf.mxu2  ;;  %v3555_v33 = vand.u32 2147483648, %v6939_v36  ;;  %vm3551_vm14 = vmor %vm3549_vm13, %vm3550_vm12  ;;  %v3570_v6 = vand.u32 2147483648, %v3481_v22 }
 0x5a4   : > { %v3607_v12 = vmul.f32 %v3542_v57, %v6901_v55  ;;  %v3546_v31 = vsub.f32 1.0, %v3545_v41  ;;  %v3438_v30 = vadd.f32 %v3428_v29, %v3372_v61  ;;  %vm3564_vm3 = vweird.f32 %v3481_v22 }
 0x5a5   : > { %v3556_v62 = vor.u32 1.1754944e-38, %v3555_v33  ;;  %v3571_v59 = vor.u32 1.1754944e-38, %v3570_v6 }
 0x5a6   : > { %v6962_v0 = vadd.f32 %v3607_v12, %v6589_v51  ;;  %v3547_v60 = vmul.f32 %v5498_v21, %v3546_v31  ;;  %v6965_v44 = vadd.f32 %v6879_v54, %v3438_v30  ;;  %v3553_v51 = vand.u32 2147483647, %v6939_v36  ;;  %v5222_v54 = vld [vmem:[%s7652_s9 + $0x26] sm:$0x3] }
 0x5a7   : > { %v3884_v18 = vsel %vm510_vm0, %v5222_v54, 0  ;;  %v3568_v36 = vand.u32 2147483647, %v3481_v22 }
 0x5a8   : > { %v5500_v46 = vpop.eup %5499  ;;  %v3548_v13 = vadd.f32 %v5498_v21, %v3547_v60  ;;  %v5206_v49 = vmul.f32 -1.442695, %v6965_v44  ;;  %v3623_v55 = vpack.c.bf16 %v6962_v0, %v6959_v25  ;;  %3893 = vmatpush.bf16.msra.mxu0 %v3884_v18  ;;  %vm3554_vm15 = vcmp.eq.f32.partialorder %v3553_v51, 8.507059e+37 }
 0x5a9   : > { %v5502_v19 = vpop.eup %5501  ;;  %v3482_v53 = vadd.f32 1.0, %v5500_v46  ;;  %vm3569_vm5 = vcmp.eq.f32.partialorder %v3568_v36, 8.507059e+37 }
 0x5aa   : > { %v3560_v20 = vmul.f32 %v5502_v19, %v3481_v22  ;;  %5503 = vpow2.f32 %v5206_v49  ;;  %5210 = vmatmul.msk.bf16.gmra.mxu3 %vm497_vm1, %v3623_v55  ;;  %v3552_v32 = vsel %vm3551_vm14, %v5498_v21, %v3548_v13  ;;  %vm3565_vm2 = vweird.f32 %v5502_v19 }
 0x5ab   : > { %5505 = vrcp.f32 %v3482_v53  ;;  %v3557_v1 = vsel %vm3554_vm15, %v3556_v62, %v3552_v32  ;;  %vm3566_vm4 = vmor %vm3564_vm3, %vm3565_vm2  ;;  %v3585_v22 = vand.u32 2147483648, %v3482_v53  ;;  %vm3579_vm7 = vweird.f32 %v3482_v53 }
 0x5ac   : > { %v3561_v26 = vsub.f32 1.0, %v3560_v20  ;;  %v3608_v45 = vmul.f32 %v3557_v1, %v6916_v27  ;;  %v3583_v42 = vand.u32 2147483647, %v3482_v53 }
 0x5ad   : > { %v3586_v41 = vor.u32 1.1754944e-38, %v3585_v22 }
 0x5ae   : > { %v3562_v63 = vmul.f32 %v5502_v19, %v3561_v26  ;;  %v6981_v37 = vadd.f32 %v3608_v45, %v6608_v10  ;;  %vm3584_vm9 = vcmp.eq.f32.partialorder %v3583_v42, 8.507059e+37 }
 0x5b0   : > { %v5504_v56 = vpop.eup %5503  ;;  %v3563_v58 = vadd.f32 %v5502_v19, %v3562_v63  ;;  %v5236_v63 = vld [vmem:[%s7652_s9 + $0x2a] sm:$0x3] }
 0x5b1   : > { %v5506_v17 = vpop.eup %5505  ;;  %v3483_v15 = vadd.f32 1.0, %v5504_v56  ;;  %v4052_v1 = vsel %vm510_vm0, %v5236_v63, 0 }
 0x5b2   : > { %v3567_v47 = vsel %vm3566_vm4, %v5502_v19, %v3563_v58  ;;  %v3575_v39 = vmul.f32 %v5506_v17, %v3482_v53  ;;  %vm3580_vm6 = vweird.f32 %v5506_v17  ;;  %4061 = vmatpush.bf16.msrb.mxu3 %v4052_v1 }
 0x5b3   : > { %v3572_v34 = vsel %vm3569_vm5, %v3571_v59, %v3567_v47  ;;  %5507 = vrcp.f32 %v3483_v15  ;;  %vm3581_vm8 = vmor %vm3579_vm7, %vm3580_vm6  ;;  %v3600_v57 = vand.u32 2147483648, %v3483_v15  ;;  %v3598_v29 = vand.u32 2147483647, %v3483_v15 }
 0x5b4   : > { %v3609_v43 = vmul.f32 %v3572_v34, %v6933_v9  ;;  %v3576_v2 = vsub.f32 1.0, %v3575_v39  ;;  %vm3594_vm12 = vweird.f32 %v3483_v15 }
 0x5b5   : > { %v3601_v30 = vor.u32 1.1754944e-38, %v3600_v57  ;;  %vm3599_vm14 = vcmp.eq.f32.partialorder %v3598_v29, 8.507059e+37 }
 0x5b6   : > { %v6984_v16 = vadd.f32 %v3609_v43, %v6611_v8  ;;  %v3577_v21 = vmul.f32 %v5506_v17, %v3576_v2 }
 0x5b8   : > { %v3578_v61 = vadd.f32 %v5506_v17, %v3577_v21  ;;  %v3624_v27 = vpack.c.bf16 %v6984_v16, %v6981_v37 }
 0x5b9   : > { %v5508_v23 = vpop.eup %5507 }
 0x5ba   : > { %v3590_v48 = vmul.f32 %v5508_v23, %v3483_v15  ;;  %5211 = vmatmul.msk.bf16.gmra.mxu3 %vm497_vm1, %v3624_v27  ;;  %v3582_v9 = vsel %vm3581_vm8, %v5506_v17, %v3578_v61  ;;  %vm3595_vm10 = vweird.f32 %v5508_v23 }
 0x5bb   : > { %v3587_v12 = vsel %vm3584_vm9, %v3586_v41, %v3582_v9  ;;  %vm3596_vm13 = vmor %vm3594_vm12, %vm3595_vm10 }
 0x5bc   : > { %v3591_v10 = vsub.f32 1.0, %v3590_v48  ;;  %v3610_v60 = vmul.f32 %v3587_v12, %v6952_v11  ;;  %v7003_v11 = vld [vmem:[%s7651_s8 + $0x2] ss:$0 sm:$0xff] }
 0x5be   : > { %v3592_v8 = vmul.f32 %v5508_v23, %v3591_v10  ;;  %v6992_v55 = vadd.f32 %v3610_v60, %v6619_v3  ;;  %v5231_v3 = vld [vmem:[%s7652_s9 + $0x28] sm:$0x3] }
 0x5bf   : > { %v3986_v54 = vsel %vm510_vm0, %v5231_v3, 0 }
 0x5c0   : > { %v3593_v31 = vadd.f32 %v5508_v23, %v3592_v8  ;;  %3995 = vmatpush.bf16.msra.mxu2 %v3986_v54 }
 0x5c2   : > { %v3597_v46 = vsel %vm3596_vm13, %v5508_v23, %v3593_v31 }
 0x5c3   : > { %v3602_v13 = vsel %vm3599_vm14, %v3601_v30, %v3597_v46 }
 0x5c4   : > { %v3611_v49 = vmul.f32 %v3602_v13, %v6965_v44 }
 0x5c6   : > { %v6995_v19 = vadd.f32 %v3611_v49, %v6622_v40  ;;  %v5221_v40 = vld [vmem:[%s7652_s9 + $0x24] sm:$0x3] }
 0x5c7   : > { %v3928_v32 = vsel %vm510_vm0, %v5221_v40, 0 }
 0x5c8   : > { %v3625_v33 = vpack.c.bf16 %v6995_v19, %v6992_v55  ;;  %3937 = vmatpush.bf16.msra.mxu1 %v3928_v32 }
 0x5ca   : > { %5212 = vmatmul.msk.bf16.gmra.mxu3 %vm497_vm1, %v3625_v33 }
 0x61d   : > { %v3655_v53 = vpop.f32.mrf.mxu3 }
 0x61e   : > { %v3656_v51 = vadd.f32 %v7003_v11, %v3655_v53 }
 0x620   : > { %v5213_v44 = vmul.f32 -1.442695, %v3656_v51 }
 0x622   : > { %5509 = vpow2.f32 %v5213_v44 }
 0x625   : > { %v3657_v20 = vpop.f32.mrf.mxu3 }
 0x626   : > { %v7015_v26 = vadd.f32 %v7003_v11, %v3657_v20  ;;  %v3857_v20 = vld [vmem:[#allocation2 + $0x1] sm:$0xff] }
 0x628   : > { %v5510_v18 = vpop.eup %5509  ;;  %v5214_v62 = vmul.f32 -1.442695, %v7015_v26 }
 0x629   : > { %v3699_v6 = vadd.f32 1.0, %v5510_v18  ;;  %v3843_v18 = vld [vmem:[#allocation2] sm:$0xff] }
 0x62a   : > { %5511 = vpow2.f32 %v5214_v62  ;;  %v3959_v62 = vld [vmem:[#allocation2 + $0x2] sm:$0xff] }
 0x62b   : > { %5513 = vrcp.f32 %v3699_v6  ;;  %v3718_v39 = vand.u32 2147483648, %v3699_v6  ;;  %v3716_v2 = vand.u32 2147483647, %v3699_v6  ;;  %vm3712_vm2 = vweird.f32 %v3699_v6 }
 0x62d   : > { %v3660_v36 = vpop.f32.mrf.mxu3  ;;  %v3719_v42 = vor.u32 1.1754944e-38, %v3718_v39  ;;  %vm3717_vm4 = vcmp.eq.f32.partialorder %v3716_v2, 8.507059e+37 }
 0x62e   : > { %v7023_v56 = vadd.f32 %v7003_v11, %v3660_v36 }
 0x630   : > { %v5512_v58 = vpop.eup %5511  ;;  %v5215_v17 = vmul.f32 -1.442695, %v7023_v56 }
 0x631   : > { %v5514_v59 = vpop.eup %5513  ;;  %v3700_v15 = vadd.f32 1.0, %v5512_v58 }
 0x632   : > { %v3708_v45 = vmul.f32 %v5514_v59, %v3699_v6  ;;  %5515 = vpow2.f32 %v5215_v17  ;;  %vm3713_vm15 = vweird.f32 %v5514_v59 }
 0x633   : > { %5517 = vrcp.f32 %v3700_v15  ;;  %vm3714_vm3 = vmor %vm3712_vm2, %vm3713_vm15  ;;  %v3733_v29 = vand.u32 2147483648, %v3700_v15  ;;  %v3731_v30 = vand.u32 2147483647, %v3700_v15  ;;  %vm3727_vm6 = vweird.f32 %v3700_v15 }
 0x634   : > { %v3709_v47 = vsub.f32 1.0, %v3708_v45  ;;  %v5241_v45 = vld [vmem:[%s7652_s9 + $0x2c] sm:$0x3] }
 0x635   : > { %v3662_v34 = vpop.f32.mrf.mxu3  ;;  %v3734_v53 = vor.u32 1.1754944e-38, %v3733_v29  ;;  %vm3732_vm8 = vcmp.eq.f32.partialorder %v3731_v30, 8.507059e+37 }
 0x636   : > { %v3710_v43 = vmul.f32 %v5514_v59, %v3709_v47  ;;  %v7027_v21 = vadd.f32 %v7003_v11, %v3662_v34  ;;  %v4118_v34 = vsel %vm510_vm0, %v5241_v45, 0 }
 0x637   : > { %4127 = vmatpush.bf16.msrb.mxu0 %v4118_v34 }
 0x638   : > { %v5516_v61 = vpop.eup %5515  ;;  %v3711_v27 = vadd.f32 %v5514_v59, %v3710_v43  ;;  %v5216_v23 = vmul.f32 -1.442695, %v7027_v21 }
 0x639   : > { %v5518_v22 = vpop.eup %5517  ;;  %v7030_v48 = vadd.f32 1.0, %v5516_v61 }
 0x63a   : > { %v3715_v9 = vsel %vm3714_vm3, %v5514_v59, %v3711_v27  ;;  %v3723_v10 = vmul.f32 %v5518_v22, %v3700_v15  ;;  %5519 = vpow2.f32 %v5216_v23  ;;  %vm3728_vm5 = vweird.f32 %v5518_v22 }
 0x63b   : > { %v3720_v41 = vsel %vm3717_vm4, %v3719_v42, %v3715_v9  ;;  %5521 = vrcp.f32 %v7030_v48  ;;  %vm3729_vm7 = vmor %vm3727_vm6, %vm3728_vm5  ;;  %v3746_v6 = vand.u32 2147483647, %v7030_v48  ;;  %v3748_v63 = vand.u32 2147483648, %v7030_v48 }
 0x63c   : > { %v3827_v57 = vmul.f32 %v3720_v41, %v3656_v51  ;;  %v3724_v8 = vsub.f32 1.0, %v3723_v10  ;;  %vm3742_vm10 = vweird.f32 %v7030_v48 }
 0x63d   : > { %v3665_v12 = vpop.f32.mrf.mxu3  ;;  %v3749_v23 = vor.u32 1.1754944e-38, %v3748_v63  ;;  %vm3747_vm13 = vcmp.eq.f32.partialorder %v3746_v6, 8.507059e+37 }
 0x63e   : > { %3835 = vst.msk [vmem:[#allocation2 + $0x11] sm:$0xff] %vm497_vm1, %v3827_v57  ;;  %v3725_v31 = vmul.f32 %v5518_v22, %v3724_v8  ;;  %v7035_v60 = vadd.f32 %v7003_v11, %v3665_v12 }
 0x640   : > { %v5520_v46 = vpop.eup %5519  ;;  %v3726_v13 = vadd.f32 %v5518_v22, %v3725_v31  ;;  %v5217_v49 = vmul.f32 -1.442695, %v7035_v60 }
 0x641   : > { %v5522_v33 = vpop.eup %5521  ;;  %v7038_v51 = vadd.f32 1.0, %v5520_v46 }
 0x642   : > { %v3730_v44 = vsel %vm3729_vm7, %v5518_v22, %v3726_v13  ;;  %v3738_v3 = vmul.f32 %v5522_v33, %v7030_v48  ;;  %5523 = vpow2.f32 %v5217_v49  ;;  %vm3743_vm9 = vweird.f32 %v5522_v33 }
 0x643   : > { %v3735_v40 = vsel %vm3732_vm8, %v3734_v53, %v3730_v44  ;;  %5525 = vrcp.f32 %v7038_v51  ;;  %vm3744_vm12 = vmor %vm3742_vm10, %vm3743_vm9  ;;  %v3761_v57 = vand.u32 2147483647, %v7038_v51  ;;  %v3763_v8 = vand.u32 2147483648, %v7038_v51 }
 0x644   : > { %v3828_v54 = vmul.f32 %v3735_v40, %v7015_v26  ;;  %v3739_v32 = vsub.f32 1.0, %v3738_v3  ;;  %vm3757_vm15 = vweird.f32 %v7038_v51 }
 0x645   : > { %v3667_v36 = vpop.f32.mrf.mxu3  ;;  %v7045_v1 = vld [vmem:[#allocation2 + $0x11] sm:$0xff]  ;;  %v3764_v53 = vor.u32 1.1754944e-38, %v3763_v8  ;;  %vm3762_vm3 = vcmp.eq.f32.partialorder %v3761_v57, 8.507059e+37 }
 0x646   : > { %v3844_v58 = vld [vmem:[#allocation2 + $0x10] sm:$0xff]  ;;  %3836 = vst.msk [vmem:[#allocation2 + $0x21] sm:$0xff] %vm497_vm1, %v3828_v54  ;;  %v3740_v59 = vmul.f32 %v5522_v33, %v3739_v32  ;;  %v7051_v15 = vadd.f32 %v7003_v11, %v3667_v36  ;;  %v3867_v26 = vpack.c.bf16 %v7045_v1, %v3857_v20 }
 0x647   : > { %v7047_v17 = vld [vmem:[#allocation2 + $0x12] sm:$0xff]  ;;  %v3853_v47 = vpack.c.bf16 %v3844_v58, %v3843_v18 }
 0x648   : > { %v3969_v39 = vpack.c.bf16 %v7047_v17, %v3959_v62  ;;  %v5524_v43 = vpop.eup %5523  ;;  %v3741_v2 = vadd.f32 %v5522_v33, %v3740_v59  ;;  %v5218_v61 = vmul.f32 -1.442695, %v7051_v15  ;;  %5223 = vmatmul.msk.bf16.vlgmr.msra.gmra.mxu0 %vm497_vm1, %v3867_v26 }
 0x649   : > { %v5526_v27 = vpop.eup %5525  ;;  %v7062_v22 = vadd.f32 1.0, %v5524_v43  ;;  %5227 = vmatmul.msk.bf16.vlgmr.msra.gmra.mxu1 %vm497_vm1, %v3853_v47 }
 0x64a   : > { %5232 = vmatmul.msk.bf16.vlgmr.msra.gmra.mxu2 %vm497_vm1, %v3969_v39  ;;  %v3745_v42 = vsel %vm3744_vm12, %v5522_v33, %v3741_v2  ;;  %v3753_v9 = vmul.f32 %v5526_v27, %v7038_v51  ;;  %5527 = vpow2.f32 %v5218_v61  ;;  %vm3758_vm14 = vweird.f32 %v5526_v27 }
 0x64b   : > { %v3750_v48 = vsel %vm3747_vm13, %v3749_v23, %v3745_v42  ;;  %5529 = vrcp.f32 %v7062_v22  ;;  %vm3759_vm2 = vmor %vm3757_vm15, %vm3758_vm14  ;;  %v3776_v18 = vand.u32 2147483647, %v7062_v22  ;;  %v3778_v62 = vand.u32 2147483648, %v7062_v22  ;;  %v5251_v23 = vld [vmem:[%s7652_s9 + $0x30] sm:$0x3] }
 0x64c   : > { %v3829_v10 = vmul.f32 %v3750_v48, %v7023_v56  ;;  %v3754_v41 = vsub.f32 1.0, %v3753_v9  ;;  %vm3772_vm5 = vweird.f32 %v7062_v22 }
 0x64d   : > { %v3670_v29 = vpop.f32.mrf.mxu3  ;;  %v4026_v12 = vld [vmem:[#allocation2 + $0x20] sm:$0xff]  ;;  %v3779_v61 = vor.u32 1.1754944e-38, %v3778_v62  ;;  %vm3777_vm7 = vcmp.eq.f32.partialorder %v3776_v18, 8.507059e+37 }
 0x64e   : > { %3837 = vst.msk [vmem:[#allocation2 + $0x31] sm:$0xff] %vm497_vm1, %v3829_v10  ;;  %v3755_v31 = vmul.f32 %v5526_v27, %v3754_v41  ;;  %v7073_v30 = vadd.f32 %v7003_v11, %v3670_v29  ;;  %v4035_v46 = vpack.c.bf16 %v4026_v12, %v3844_v58  ;;  %v7083_v32 = vld [vmem:[#allocation2 + $0x21] sm:$0xff]  ;;  %v4250_v41 = vsel %vm510_vm0, %v5251_v23, 0 }
 0x64f   : > { %v7099_v45 = vld [vmem:[#allocation2 + $0x22] sm:$0xff]  ;;  %4259 = vmatpush.bf16.msrb.mxu2 %v4250_v41 }
 0x650   : > { %v5528_v13 = vpop.eup %5527  ;;  %v3756_v49 = vadd.f32 %v5526_v27, %v3755_v31  ;;  %v5219_v56 = vmul.f32 -1.442695, %v7073_v30  ;;  %5237 = vmatmul.msk.bf16.vlgmr.msrb.gmra.mxu3 %vm497_vm1, %v4035_v46 }
 0x651   : > { %v5530_v33 = vpop.eup %5529  ;;  %v7078_v44 = vadd.f32 1.0, %v5528_v13 }
 0x652   : > { %v3760_v3 = vsel %vm3759_vm2, %v5526_v27, %v3756_v49  ;;  %v3768_v40 = vmul.f32 %v5530_v33, %v7062_v22  ;;  %5531 = vpow2.f32 %v5219_v56  ;;  %vm3773_vm4 = vweird.f32 %v5530_v33  ;;  %v5246_v49 = vld [vmem:[%s7652_s9 + $0x2e] sm:$0x3] }
 0x653   : > { %v3765_v20 = vsel %vm3762_vm3, %v3764_v53, %v3760_v3  ;;  %5533 = vrcp.f32 %v7078_v44  ;;  %vm3774_vm6 = vmor %vm3772_vm5, %vm3773_vm4  ;;  %v3793_v57 = vand.u32 2147483648, %v7078_v44  ;;  %vm3787_vm9 = vweird.f32 %v7078_v44 }
 0x654   : > { %v3830_v54 = vmul.f32 %v3765_v20, %v7027_v21  ;;  %v3769_v51 = vsub.f32 1.0, %v3768_v40  ;;  %v4184_v40 = vsel %vm510_vm0, %v5246_v49, 0 }
 0x655   : > { %v3672_v6 = vpop.f32.mrf.mxu3  ;;  %v7087_v63 = vld [vmem:[#allocation2 + $0x31] sm:$0xff]  ;;  %4193 = vmatpush.bf16.msrb.mxu1 %v4184_v40 }
 0x656   : > { %v3846_v36 = vld [vmem:[#allocation2 + $0x30] sm:$0xff]  ;;  %3838 = vst.msk [vmem:[#allocation2 + $0x41] sm:$0xff] %vm497_vm1, %v3830_v54  ;;  %v3770_v59 = vmul.f32 %v5530_v33, %v3769_v51  ;;  %v7093_v26 = vadd.f32 %v7003_v11, %v3672_v6  ;;  %v7097_v21 = vpack.c.bf16 %v7087_v63, %v7083_v32 }
 0x657   : > { %v7089_v58 = vld [vmem:[#allocation2 + $0x32] sm:$0xff]  ;;  %v7101_v47 = vpack.c.bf16 %v3846_v36, %v4026_v12  ;;  %v3791_v12 = vand.u32 2147483647, %v7078_v44 }
 0x658   : > { %v7105_v39 = vpack.c.bf16 %v7089_v58, %v7099_v45  ;;  %v5532_v34 = vpop.eup %5531  ;;  %v3771_v43 = vadd.f32 %v5530_v33, %v3770_v59  ;;  %v5220_v2 = vmul.f32 -1.442695, %v7093_v26  ;;  %5224 = vmatmul.msk.bf16.gmra.mxu0 %vm497_vm1, %v7097_v21 }
 0x659   : > { %v5534_v11 = vpop.eup %5533  ;;  %v7111_v27 = vadd.f32 1.0, %v5532_v34  ;;  %5228 = vmatmul.msk.bf16.gmra.mxu1 %vm497_vm1, %v7101_v47  ;;  %vm3792_vm12 = vcmp.eq.f32.partialorder %v3791_v12, 8.507059e+37 }
 0x65a   : > { %5233 = vmatmul.msk.bf16.gmra.mxu2 %vm497_vm1, %v7105_v39  ;;  %v3775_v22 = vsel %vm3774_vm6, %v5530_v33, %v3771_v43  ;;  %v3783_v42 = vmul.f32 %v5534_v11, %v7078_v44  ;;  %5535 = vpow2.f32 %v5220_v2  ;;  %vm3788_vm8 = vweird.f32 %v5534_v11 }
 0x65b   : > { %v3780_v9 = vsel %vm3777_vm7, %v3779_v61, %v3775_v22  ;;  %5537 = vrcp.f32 %v7111_v27  ;;  %vm3789_vm10 = vmor %vm3787_vm9, %vm3788_vm8  ;;  %v3794_v33 = vor.u32 1.1754944e-38, %v3793_v57  ;;  %v3806_v6 = vand.u32 2147483647, %v7111_v27 }
 0x65c   : > { %v3831_v48 = vmul.f32 %v3780_v9, %v7035_v60  ;;  %v3784_v10 = vsub.f32 1.0, %v3783_v42  ;;  %v5256_v60 = vld [vmem:[%s7652_s9 + $0x32] sm:$0x3]  ;;  %vm3802_vm14 = vweird.f32 %v7111_v27 }
 0x65d   : > { %v4028_v8 = vld [vmem:[#allocation2 + $0x40] sm:$0xff]  ;;  %v4316_v3 = vsel %vm510_vm0, %v5256_v60, 0  ;;  %vm3807_vm2 = vcmp.eq.f32.partialorder %v3806_v6, 8.507059e+37 }
 0x65e   : > { %3839 = vst.msk [vmem:[#allocation2 + $0x51] sm:$0xff] %vm497_vm1, %v3831_v48  ;;  %v3785_v29 = vmul.f32 %v5534_v11, %v3784_v10  ;;  %v4036_v31 = vpack.c.bf16 %v4028_v8, %v3846_v36  ;;  %4325 = vmatpush.bf16.msra.mxu3 %v4316_v3  ;;  %v7139_v62 = vld [vmem:[#allocation2 + $0x41] sm:$0xff]  ;;  %v3808_v36 = vand.u32 2147483648, %v7111_v27  ;;  %v5261_v48 = vld [vmem:[%s7652_s9 + $0x34] sm:$0x3] }
 0x65f   : > { %v7154_v61 = vld [vmem:[#allocation2 + $0x42] sm:$0xff] }
 0x660   : > { %v5536_v46 = vpop.eup %5535  ;;  %v3786_v13 = vadd.f32 %v5534_v11, %v3785_v29  ;;  %5238 = vmatmul.msk.bf16.gmra.mxu3 %vm497_vm1, %v4036_v31  ;;  %v3809_v9 = vor.u32 1.1754944e-38, %v3808_v36 }
 0x661   : > { %v5538_v56 = vpop.eup %5537  ;;  %v3706_v53 = vadd.f32 1.0, %v5536_v46 }
 0x662   : > { %v3790_v20 = vsel %vm3789_vm10, %v5534_v11, %v3786_v13  ;;  %v3798_v44 = vmul.f32 %v5538_v56, %v7111_v27  ;;  %vm3803_vm13 = vweird.f32 %v5538_v56  ;;  %v4382_v27 = vsel %vm510_vm0, %v5261_v48, 0 }
 0x663   : > { %v3795_v54 = vsel %vm3792_vm12, %v3794_v33, %v3790_v20  ;;  %5539 = vrcp.f32 %v3706_v53  ;;  %vm3804_vm15 = vmor %vm3802_vm14, %vm3803_vm13  ;;  %4391 = vmatpush.bf16.msra.mxu0 %v4382_v27  ;;  %v3823_v12 = vand.u32 2147483648, %v3706_v53  ;;  %v3821_v13 = vand.u32 2147483647, %v3706_v53 }
 0x664   : > { %v3832_v51 = vmul.f32 %v3795_v54, %v7051_v15  ;;  %v3799_v18 = vsub.f32 1.0, %v3798_v44  ;;  %vm3817_vm4 = vweird.f32 %v3706_v53 }
 0x665   : > { %v7143_v59 = vld [vmem:[#allocation2 + $0x51] sm:$0xff]  ;;  %vm3822_vm6 = vcmp.eq.f32.partialorder %v3821_v13, 8.507059e+37 }
 0x666   : > { %v3848_v34 = vld [vmem:[#allocation2 + $0x50] sm:$0xff]  ;;  %3840 = vst.msk [vmem:[#allocation2 + $0x61] sm:$0xff] %vm497_vm1, %v3832_v51  ;;  %v3800_v2 = vmul.f32 %v5538_v56, %v3799_v18  ;;  %v7150_v11 = vpack.c.bf16 %v7143_v59, %v7139_v62 }
 0x667   : > { %v7145_v43 = vld [vmem:[#allocation2 + $0x52] sm:$0xff]  ;;  %v7152_v15 = vpack.c.bf16 %v3848_v34, %v4028_v8 }
 0x668   : > { %v7158_v23 = vpack.c.bf16 %v7145_v43, %v7154_v61  ;;  %v3801_v22 = vadd.f32 %v5538_v56, %v3800_v2  ;;  %5225 = vmatmul.msk.bf16.gmra.mxu0 %vm497_vm1, %v7150_v11  ;;  %v4167_v2 = vpack.c.bf16 %v7099_v45, %v7047_v17  ;;  %v4102_v45 = vpack.c.bf16 %v7139_v62, %v7087_v63 }
 0x669   : > { %v5540_v42 = vpop.eup %5539  ;;  %5229 = vmatmul.msk.bf16.gmra.mxu1 %vm497_vm1, %v7152_v15 }
 0x66a   : > { %5234 = vmatmul.msk.bf16.gmra.mxu2 %vm497_vm1, %v7158_v23  ;;  %v3805_v10 = vsel %vm3804_vm15, %v5538_v56, %v3801_v22  ;;  %v3813_v41 = vmul.f32 %v5540_v42, %v3706_v53  ;;  %vm3818_vm3 = vweird.f32 %v5540_v42  ;;  %v3824_v56 = vor.u32 1.1754944e-38, %v3823_v12  ;;  %v7203_v22 = vld [vmem:[%s7649_s6] ss:$0 sm:$0xff] }
 0x66b   : > { %v3810_v57 = vsel %vm3807_vm2, %v3809_v9, %v3805_v10  ;;  %vm3819_vm5 = vmor %vm3817_vm4, %vm3818_vm3  ;;  %v7235_v63 = vadd.f32 %v7203_v22, %v6399_v38  ;;  %v7266_v12 = vadd.f32 %v7203_v22, %v6417_v4 }
 0x66c   : > { %v3833_v8 = vmul.f32 %v3810_v57, %v7073_v30  ;;  %v3814_v29 = vsub.f32 1.0, %v3813_v41 }
 0x66d   : > { %v4030_v31 = vld [vmem:[#allocation2 + $0x60] sm:$0xff] }
 0x66e   : > { %3841 = vst.msk [vmem:[#allocation2 + $0x71] sm:$0xff] %vm497_vm1, %v3833_v8  ;;  %v3815_v46 = vmul.f32 %v5540_v42, %v3814_v29  ;;  %v4037_v60 = vpack.c.bf16 %v4030_v31, %v3848_v34  ;;  %v3863_v40 = vld [vmem:[#allocation2 + $0x61] sm:$0xff]  ;;  %v4101_v34 = vpack.c.bf16 %v7083_v32, %v7045_v1  ;;  %v7213_v1 = vadd.f32 %v7203_v22, %v6382_v24 }
 0x66f   : > { %v3965_v20 = vld [vmem:[#allocation2 + $0x62] sm:$0xff] }
 0x670   : > { %v3816_v49 = vadd.f32 %v5540_v42, %v3815_v46  ;;  %5239 = vmatmul.msk.bf16.gmra.mxu3 %vm497_vm1, %v4037_v60  ;;  %v5067_v32 = vmul.f32 -1.442695, %v7213_v1  ;;  %v4169_v38 = vpack.c.bf16 %v3965_v20, %v7145_v43  ;;  %v7259_v43 = vadd.f32 %v7203_v22, %v6421_v5  ;;  %v4230_v5 = vld [vmem:[#allocation2 + $0x90] sm:$0xff] }
 0x672   : > { %v3820_v33 = vsel %vm3819_vm5, %v5540_v42, %v3816_v49  ;;  %v7207_v42 = vadd.f32 %v7203_v22, %v6392_v28  ;;  %v5072_v13 = vmul.f32 -1.442695, %v7259_v43 }
 0x673   : > { %v3825_v3 = vsel %vm3822_vm6, %v3824_v56, %v3820_v33  ;;  %v5071_v33 = vmul.f32 -1.442695, %v7266_v12 }
 0x674   : > { %v3834_v30 = vmul.f32 %v3825_v3, %v7093_v26  ;;  %v5068_v17 = vmul.f32 -1.442695, %v7207_v42 }
 0x675   : > { %v7175_v44 = vld [vmem:[#allocation2 + $0x71] sm:$0xff] }
 0x676   : > { %v3850_v54 = vld [vmem:[#allocation2 + $0x70] sm:$0xff]  ;;  %3842 = vst.msk [vmem:[#allocation2 + $0x81] sm:$0xff] %vm497_vm1, %v3834_v30  ;;  %v3870_v53 = vpack.c.bf16 %v7175_v44, %v3863_v40  ;;  %5541 = vpow2.f32 %v5068_v17 }
 0x677   : > { %v7177_v51 = vld [vmem:[#allocation2 + $0x72] sm:$0xff]  ;;  %v3856_v18 = vpack.c.bf16 %v3850_v54, %v4030_v31  ;;  %5543 = vpow2.f32 %v5067_v32 }
 0x678   : > { %v7182_v6 = vpack.c.bf16 %v7177_v51, %v3965_v20  ;;  %5226 = vmatmul.msk.bf16.gmra.mxu0 %vm497_vm1, %v3870_v53 }
 0x679   : > { %5230 = vmatmul.msk.bf16.gmra.mxu1 %vm497_vm1, %v3856_v18 }
 0x67a   : > { %5235 = vmatmul.msk.bf16.gmra.mxu2 %vm497_vm1, %v7182_v6 }
 0x67c   : > { %v5542_v24 = vpop.eup %5541 }
 0x67d   : > { %v7188_v26 = vld [vmem:[#allocation2 + $0x80] sm:$0xff]  ;;  %v5544_v28 = vpop.eup %5543  ;;  %v7229_v9 = vadd.f32 1.0, %v5542_v24 }
 0x67e   : > { %v4038_v36 = vpack.c.bf16 %v7188_v26, %v3850_v54  ;;  %v4098_v60 = vld [vmem:[#allocation2 + $0x81] sm:$0xff] }
 0x67f   : > { %5545 = vrcp.f32 %v7229_v9  ;;  %v7272_v49 = vld [vmem:[#allocation2 + $0x82] sm:$0xff]  ;;  %v4104_v3 = vpack.c.bf16 %v4098_v60, %v7175_v44  ;;  %v1535_v44 = vand.u32 2147483648, %v7229_v9  ;;  %vm1529_vm9 = vweird.f32 %v7229_v9 }
 0x680   : > { %5240 = vmatmul.msk.bf16.gmra.mxu3 %vm497_vm1, %v4038_v36  ;;  %v4170_v30 = vpack.c.bf16 %v7272_v49, %v7177_v51  ;;  %v1533_v51 = vand.u32 2147483647, %v7229_v9 }
 0x681   : > { %v1536_v24 = vor.u32 1.1754944e-38, %v1535_v44 }
 0x682   : > { %vm1534_vm14 = vcmp.eq.f32.partialorder %v1533_v51, 8.507059e+37 }
 0x685   : > { %v5546_v48 = vpop.eup %5545 }
 0x686   : > { %v1525_v27 = vmul.f32 %v5546_v48, %v7229_v9  ;;  %vm1530_vm7 = vweird.f32 %v5546_v48 }
 0x687   : > { %vm7294_vm10 = vmor %vm1529_vm9, %vm1530_vm7 }
 0x688   : > { %5242 = vmatmul.msk.bf16.vlgmr.msrb.gmra.mxu0 %vm497_vm1, %v4101_v34  ;;  %v1526_v29 = vsub.f32 1.0, %v1525_v27 }
 0x689   : > { %5247 = vmatmul.msk.bf16.vlgmr.msrb.gmra.mxu1 %vm497_vm1, %v4167_v2 }
 0x68a   : > { %5252 = vmatmul.msk.bf16.vlgmr.msrb.gmra.mxu2 %vm497_vm1, %v7101_v47  ;;  %v4168_v47 = vpack.c.bf16 %v7154_v61, %v7089_v58  ;;  %v7237_v58 = vadd.f32 1.0, %v5544_v28  ;;  %v1527_v56 = vmul.f32 %v5546_v48, %v1526_v29 }
 0x68c   : > { %5547 = vrcp.f32 %v7237_v58  ;;  %v1528_v20 = vadd.f32 %v5546_v48, %v1527_v56  ;;  %v1520_v36 = vand.u32 2147483648, %v7237_v58  ;;  %vm1514_vm12 = vweird.f32 %v7237_v58 }
 0x68d   : > { %v1518_v17 = vand.u32 2147483647, %v7237_v58 }
 0x68e   : > { %v1532_v32 = vsel %vm7294_vm10, %v5546_v48, %v1528_v20  ;;  %v7322_v48 = vadd.f32 %v7203_v22, %v6428_v7 }
 0x68f   : > { %vm1519_vm15 = vcmp.eq.f32.partialorder %v1518_v17, 8.507059e+37 }
 0x690   : > { %5257 = vmatmul.msk.bf16.vlgmr.msra.gmra.mxu3 %vm497_vm1, %v7097_v21  ;;  %v7227_v21 = vadd.f32 %v7203_v22, %v6407_v35  ;;  %v4607_v35 = vld [vmem:[%s7655_s12] sm:$0x3] }
 0x691   : > { %v4625_v61 = vsel %vm510_vm0, %v4607_v35, 0  ;;  %v7315_v35 = vadd.f32 %v7203_v22, %v6434_v52 }
 0x692   : > { %v5070_v62 = vmul.f32 -1.442695, %v7227_v21  ;;  %4634 = vmatpush.bf16.msra.mxu1 %v4625_v61  ;;  %v7252_v10 = vpop.eup %5547  ;;  %v1537_v61 = vsel %vm1534_vm14, %v1536_v24, %v1532_v32 }
 0x693   : > { %vm1515_vm8 = vweird.f32 %v7252_v10  ;;  %v1630_v27 = vmul.f32 %v1537_v61, %v7207_v42  ;;  %v5074_v52 = vmul.f32 -1.442695, %v7315_v35 }
 0x694   : > { %5549 = vpow2.f32 %v5070_v62  ;;  %vm7304_vm13 = vmor %vm1514_vm12, %vm1515_vm8 }
 0x698   : > { %5243 = vmatmul.msk.bf16.gmra.mxu0 %vm497_vm1, %v4102_v45 }
 0x699   : > { %5248 = vmatmul.msk.bf16.gmra.mxu1 %vm497_vm1, %v4168_v47 }
 0x69a   : > { %5253 = vmatmul.msk.bf16.gmra.mxu2 %vm497_vm1, %v7152_v15  ;;  %v5069_v15 = vmul.f32 -1.442695, %v7235_v63  ;;  %v5550_v41 = vpop.eup %5549 }
 0x69b   : > { %v7261_v8 = vadd.f32 1.0, %v5550_v41 }
 0x69c   : > { %5551 = vpow2.f32 %v5069_v15  ;;  %v1521_v15 = vor.u32 1.1754944e-38, %v1520_v36 }
 0x69d   : > { %5553 = vrcp.f32 %v7261_v8  ;;  %v1565_v56 = vand.u32 2147483648, %v7261_v8  ;;  %vm1559_vm4 = vweird.f32 %v7261_v8 }
 0x69f   : > { %v1566_v36 = vor.u32 1.1754944e-38, %v1565_v56 }
 0x6a0   : > { %5258 = vmatmul.msk.bf16.gmra.mxu3 %vm497_vm1, %v7150_v11  ;;  %v4103_v11 = vpack.c.bf16 %v3863_v40, %v7143_v59  ;;  %v1510_v59 = vmul.f32 %v7252_v10, %v7237_v58  ;;  %v4236_v40 = vpack.c.bf16 %v4230_v5, %v7188_v26 }
 0x6a2   : > { %v5552_v57 = vpop.eup %5551  ;;  %v1511_v46 = vsub.f32 1.0, %v1510_v59 }
 0x6a3   : > { %v7268_v31 = vadd.f32 1.0, %v5552_v57  ;;  %v7284_v54 = vpop.eup %5553 }
 0x6a4   : > { %v1512_v4 = vmul.f32 %v7252_v10, %v1511_v46  ;;  %v1555_v45 = vmul.f32 %v7284_v54, %v7261_v8  ;;  %v5073_v46 = vmul.f32 -1.442695, %v7322_v48  ;;  %vm1560_vm2 = vweird.f32 %v7284_v54 }
 0x6a5   : > { %5555 = vrcp.f32 %v7268_v31  ;;  %vm1544_vm5 = vweird.f32 %v7268_v31  ;;  %vm7350_vm6 = vmor %vm1559_vm4, %vm1560_vm2  ;;  %v1548_v44 = vand.u32 2147483647, %v7268_v31 }
 0x6a6   : > { %5557 = vpow2.f32 %v5072_v13 }
 0x6a7   : > { %5559 = vpow2.f32 %v5071_v33  ;;  %vm1549_vm9 = vcmp.eq.f32.partialorder %v1548_v44, 8.507059e+37 }
 0x6a8   : > { %5244 = vmatmul.msk.bf16.gmra.mxu0 %vm497_vm1, %v4103_v11 }
 0x6a9   : > { %5249 = vmatmul.msk.bf16.gmra.mxu1 %vm497_vm1, %v4169_v38  ;;  %v1556_v38 = vsub.f32 1.0, %v1555_v45 }
 0x6aa   : > { %5254 = vmatmul.msk.bf16.gmra.mxu2 %vm497_vm1, %v3856_v18  ;;  %v4296_v18 = vld [vmem:[#allocation2 + $0x91] sm:$0xff] }
 0x6ab   : > { %v7291_v26 = vpop.eup %5555  ;;  %v4302_v28 = vpack.c.bf16 %v4296_v18, %v4098_v60  ;;  %v1557_v29 = vmul.f32 %v7284_v54, %v1556_v38 }
 0x6ac   : > { %v5558_v2 = vpop.eup %5557  ;;  %v1540_v58 = vmul.f32 %v7291_v26, %v7268_v31  ;;  %vm1545_vm3 = vweird.f32 %v7291_v26 }
 0x6ad   : > { %v5560_v9 = vpop.eup %5559  ;;  %v7317_v11 = vadd.f32 1.0, %v5558_v2  ;;  %v1558_v5 = vadd.f32 %v7284_v54, %v1557_v29  ;;  %vm1546_vm7 = vmor %vm1544_vm5, %vm1545_vm3 }
 0x6ae   : > { %v7324_v41 = vadd.f32 1.0, %v5560_v9  ;;  %v1541_v57 = vsub.f32 1.0, %v1540_v58 }
 0x6af   : > { %5561 = vrcp.f32 %v7317_v11  ;;  %v1595_v29 = vand.u32 2147483648, %v7317_v11 }
 0x6b0   : > { %5259 = vmatmul.msk.bf16.gmra.mxu3 %vm497_vm1, %v3870_v53  ;;  %v1513_v53 = vadd.f32 %v7252_v10, %v1512_v4  ;;  %5563 = vrcp.f32 %v7324_v41  ;;  %v1542_v60 = vmul.f32 %v7291_v26, %v1541_v57  ;;  %v1550_v4 = vand.u32 2147483648, %v7268_v31 }
 0x6b1   : > { %5565 = vpow2.f32 %v5074_v52  ;;  %vm1574_vm14 = vweird.f32 %v7324_v41 }
 0x6b2   : > { %v1517_v62 = vsel %vm7304_vm13, %v7252_v10, %v1513_v53  ;;  %5567 = vpow2.f32 %v5073_v46  ;;  %v1543_v33 = vadd.f32 %v7291_v26, %v1542_v60  ;;  %v1562_v53 = vsel %vm7350_vm6, %v7284_v54, %v1558_v5 }
 0x6b3   : > { %v1522_v10 = vsel %vm1519_vm15, %v1521_v15, %v1517_v62  ;;  %v1551_v32 = vor.u32 1.1754944e-38, %v1550_v4  ;;  %vm1589_vm13 = vweird.f32 %v7317_v11 }
 0x6b4   : > { %v1629_v59 = vmul.f32 %v1522_v10, %v7213_v1  ;;  %v1547_v17 = vsel %vm1546_vm7, %v7291_v26, %v1543_v33 }
 0x6b5   : > { %v7339_v1 = vpop.eup %5561  ;;  %v1552_v24 = vsel %vm1549_vm9, %v1551_v32, %v1547_v17 }
 0x6b6   : > { %v4608_v22 = vpack.c.bf16 %v1630_v27, %v1629_v59  ;;  %v1631_v61 = vmul.f32 %v1552_v24, %v7235_v63  ;;  %vm1590_vm10 = vweird.f32 %v7339_v1 }
 0x6b7   : > { %vm1591_vm15 = vmor %vm1589_vm13, %vm1590_vm10 }
 0x6b8   : > { %5245 = vmatmul.msk.bf16.gmra.mxu0 %vm497_vm1, %v4104_v3  ;;  %v1563_v3 = vand.u32 2147483647, %v7261_v8  ;;  %v1585_v8 = vmul.f32 %v7339_v1, %v7317_v11 }
 0x6b9   : > { %5250 = vmatmul.msk.bf16.gmra.mxu1 %vm497_vm1, %v4170_v30 }
 0x6ba   : > { %5255 = vmatmul.msk.bf16.gmra.mxu2 %vm497_vm1, %v4236_v40  ;;  %vm1564_vm8 = vcmp.eq.f32.partialorder %v1563_v3, 8.507059e+37  ;;  %v1586_v47 = vsub.f32 1.0, %v1585_v8 }
 0x6bb   : > { %v1567_v45 = vsel %vm1564_vm8, %v1566_v36, %v1562_v53 }
 0x6bc   : > { %v1632_v9 = vmul.f32 %v1567_v45, %v7227_v21  ;;  %v1587_v38 = vmul.f32 %v7339_v1, %v1586_v47 }
 0x6be   : > { %v4609_v57 = vpack.c.bf16 %v1632_v9, %v1631_v61  ;;  %v1588_v59 = vadd.f32 %v7339_v1, %v1587_v38 }
 0x6c0   : > { %5260 = vmatmul.msk.bf16.gmra.mxu3 %vm497_vm1, %v4302_v28  ;;  %v1592_v5 = vsel %vm1591_vm15, %v7339_v1, %v1588_v59 }
 0x6c5   : > { %v3895_v13 = vpop.f32.mrf.mxu0 }
 0x6c6   : > { %v3939_v7 = vpop.f32.mrf.mxu1 }
 0x6c7   : > { %v3940_v42 = vadd.f32 %v3939_v7, %v3895_v13  ;;  %v1593_v13 = vand.u32 2147483647, %v7317_v11  ;;  %v1596_v11 = vor.u32 1.1754944e-38, %v1595_v29 }
 0x6c8   : > { %5262 = vmatmul.msk.bf16.vlgmr.msra.gmra.mxu0 %vm497_vm1, %v7105_v39  ;;  %v7346_v39 = vpop.eup %5563 }
 0x6c9   : > { %5275 = vmatmul.msk.bf16.vlgmr.msra.gmra.mxu1 %vm497_vm1, %v4608_v22  ;;  %v5566_v20 = vpop.eup %5565  ;;  %v1570_v31 = vmul.f32 %v7346_v39, %v7324_v41  ;;  %vm1575_vm12 = vweird.f32 %v7346_v39  ;;  %v1580_v22 = vand.u32 2147483648, %v7324_v41  ;;  %vm1594_vm3 = vcmp.eq.f32.partialorder %v1593_v13, 8.507059e+37 }
 0x6ca   : > { %v5568_v2 = vpop.eup %5567  ;;  %v7367_v54 = vadd.f32 1.0, %v5566_v20  ;;  %vm1576_vm2 = vmor %vm1574_vm14, %vm1575_vm12  ;;  %v1597_v44 = vsel %vm1594_vm3, %v1596_v11, %v1592_v5 }
 0x6cb   : > { %v7369_v28 = vadd.f32 1.0, %v5568_v2  ;;  %v1571_v62 = vsub.f32 1.0, %v1570_v31  ;;  %v1581_v20 = vor.u32 1.1754944e-38, %v1580_v22  ;;  %v1634_v53 = vmul.f32 %v1597_v44, %v7259_v43 }
 0x6cc   : > { %5569 = vrcp.f32 %v7367_v54  ;;  %v1625_v43 = vand.u32 2147483648, %v7367_v54  ;;  %vm1619_vm7 = vweird.f32 %v7367_v54 }
 0x6cd   : > { %v3997_v40 = vpop.f32.mrf.mxu2  ;;  %v7360_v18 = vpop.f32.mrf.mxu0  ;;  %5571 = vrcp.f32 %v7369_v28  ;;  %v1572_v52 = vmul.f32 %v7346_v39, %v1571_v62  ;;  %v1610_v61 = vand.u32 2147483648, %v7369_v28  ;;  %vm1604_vm9 = vweird.f32 %v7369_v28 }
 0x6ce   : > { %v4017_v51 = vadd.f32 %v3997_v40, %v3940_v42  ;;  %v7362_v34 = vpop.f32.mrf.mxu1  ;;  %v1578_v42 = vand.u32 2147483647, %v7324_v41  ;;  %v1608_v38 = vand.u32 2147483647, %v7369_v28 }
 0x6cf   : > { %v1573_v46 = vadd.f32 %v7346_v39, %v1572_v52  ;;  %v1626_v52 = vor.u32 1.1754944e-38, %v1625_v43  ;;  %v1611_v59 = vor.u32 1.1754944e-38, %v1610_v61 }
 0x6d0   : > { %vm1579_vm4 = vcmp.eq.f32.partialorder %v1578_v42, 8.507059e+37  ;;  %vm1609_vm13 = vcmp.eq.f32.partialorder %v1608_v38, 8.507059e+37 }
 0x6d1   : > { %v1577_v30 = vsel %vm1576_vm2, %v7346_v39, %v1573_v46 }
 0x6d2   : > { %v7386_v63 = vpop.eup %5569  ;;  %v1582_v1 = vsel %vm1579_vm4, %v1581_v20, %v1577_v30 }
 0x6d3   : > { %v4063_v58 = vpop.f32.mrf.mxu3  ;;  %v1615_v56 = vmul.f32 %v7386_v63, %v7367_v54  ;;  %v1633_v17 = vmul.f32 %v1582_v1, %v7266_v12  ;;  %vm1620_vm5 = vweird.f32 %v7386_v63  ;;  %v1623_v12 = vand.u32 2147483647, %v7367_v54 }
 0x6d4   : > { %v7375_v15 = vadd.f32 %v4063_v58, %v4017_v51  ;;  %vm1621_vm8 = vmor %vm1619_vm7, %vm1620_vm5 }
 0x6d5   : > { %v7373_v26 = vpop.f32.mrf.mxu2  ;;  %v3900_v10 = vpop.f32.mrf.mxu0  ;;  %v1616_v41 = vsub.f32 1.0, %v1615_v56  ;;  %v4610_v45 = vpack.c.bf16 %v1634_v53, %v1633_v17  ;;  %vm1624_vm12 = vcmp.eq.f32.partialorder %v1623_v12, 8.507059e+37 }
 0x6d6   : > { %v3944_v27 = vpop.f32.mrf.mxu1 }
 0x6d7   : > { %v3945_v21 = vadd.f32 %v3944_v27, %v3900_v10  ;;  %v1617_v31 = vmul.f32 %v7386_v63, %v1616_v41 }
 0x6d8   : > { %5263 = vmatmul.msk.bf16.gmra.mxu0 %vm497_vm1, %v7158_v23  ;;  %v5572_v23 = vpop.eup %5571 }
 0x6d9   : > { %5276 = vmatmul.msk.bf16.gmra.mxu1 %vm497_vm1, %v4609_v57  ;;  %v1600_v40 = vmul.f32 %v5572_v23, %v7369_v28  ;;  %v1618_v9 = vadd.f32 %v7386_v63, %v1617_v31  ;;  %vm1605_vm6 = vweird.f32 %v5572_v23 }
 0x6da   : > { %vm1606_vm10 = vmor %vm1604_vm9, %vm1605_vm6 }
 0x6db   : > { %v7393_v7 = vpop.f32.mrf.mxu3  ;;  %v1601_v8 = vsub.f32 1.0, %v1600_v40  ;;  %v1622_v10 = vsel %vm1621_vm8, %v7386_v63, %v1618_v9 }
 0x6dc   : > { %v1627_v29 = vsel %vm1624_vm12, %v1626_v52, %v1622_v10 }
 0x6dd   : > { %v4002_v60 = vpop.f32.mrf.mxu2  ;;  %v7401_v3 = vpop.f32.mrf.mxu0  ;;  %v1602_v47 = vmul.f32 %v5572_v23, %v1601_v8  ;;  %v1636_v13 = vmul.f32 %v1627_v29, %v7315_v35 }
 0x6de   : > { %v4019_v33 = vadd.f32 %v4002_v60, %v3945_v21  ;;  %v7403_v4 = vpop.f32.mrf.mxu1  ;;  %v4362_v60 = vld [vmem:[#allocation2 + $0x92] sm:$0xff] }
 0x6df   : > { %v1603_v62 = vadd.f32 %v5572_v23, %v1602_v47 }
 0x6e1   : > { %v1607_v54 = vsel %vm1606_vm10, %v5572_v23, %v1603_v62 }
 0x6e2   : > { %v1612_v46 = vsel %vm1609_vm13, %v1611_v59, %v1607_v54 }
 0x6e3   : > { %v4068_v51 = vpop.f32.mrf.mxu3  ;;  %v1635_v42 = vmul.f32 %v1612_v46, %v7322_v48 }
 0x6e4   : > { %v4085_v2 = vadd.f32 %v4068_v51, %v4019_v33  ;;  %v4368_v33 = vpack.c.bf16 %v4362_v60, %v7272_v49  ;;  %v4602_v49 = vld [vmem:[%s7654_s11] sm:$0x3] }
 0x6e5   : > { %v7408_v36 = vpop.f32.mrf.mxu2  ;;  %v3905_v39 = vpop.f32.mrf.mxu0  ;;  %v4611_v11 = vpack.c.bf16 %v1636_v13, %v1635_v42  ;;  %v4669_v17 = vsel %vm510_vm0, %v4602_v49, 0 }
 0x6e6   : > { %v3949_v32 = vpop.f32.mrf.mxu1  ;;  %4678 = vmatpush.bf16.msra.mxu2 %v4669_v17 }
 0x6e7   : > { %v3950_v24 = vadd.f32 %v3949_v32, %v3905_v39 }
 0x6e8   : > { %5264 = vmatmul.msk.bf16.gmra.mxu0 %vm497_vm1, %v7182_v6 }
 0x6e9   : > { %5277 = vmatmul.msk.bf16.gmra.mxu1 %vm497_vm1, %v4610_v45 }
 0x6eb   : > { %v7420_v58 = vpop.f32.mrf.mxu3 }
 0x6ed   : > { %v4007_v6 = vpop.f32.mrf.mxu2  ;;  %v7426_v57 = vpop.f32.mrf.mxu0 }
 0x6ee   : > { %v4021_v27 = vadd.f32 %v4007_v6, %v3950_v24  ;;  %v7428_v21 = vpop.f32.mrf.mxu1 }
 0x6f3   : > { %v4073_v22 = vpop.f32.mrf.mxu3 }
 0x6f4   : > { %v4087_v63 = vadd.f32 %v4073_v22, %v4021_v27  ;;  %v3942_v27 = vadd.f32 %v7362_v34, %v7360_v18 }
 0x6f5   : > { %v7431_v28 = vpop.f32.mrf.mxu2  ;;  %v3910_v5 = vpop.f32.mrf.mxu0 }
 0x6f6   : > { %v3954_v56 = vpop.f32.mrf.mxu1  ;;  %v4018_v52 = vadd.f32 %v7373_v26, %v3942_v27 }
 0x6f7   : > { %v3955_v23 = vadd.f32 %v3954_v56, %v3910_v5 }
 0x6f8   : > { %5265 = vmatmul.msk.bf16.gmra.mxu0 %vm497_vm1, %v4368_v33  ;;  %v4084_v59 = vadd.f32 %v7393_v7, %v4018_v52 }
 0x6f9   : > { %5278 = vmatmul.msk.bf16.gmra.mxu1 %vm497_vm1, %v4611_v11 }
 0x6fb   : > { %v7437_v30 = vpop.f32.mrf.mxu3 }
 0x6fd   : > { %v4012_v35 = vpop.f32.mrf.mxu2  ;;  %v7439_v20 = vpop.f32.mrf.mxu0 }
 0x6fe   : > { %v4023_v40 = vadd.f32 %v4012_v35, %v3955_v23  ;;  %v7446_v32 = vpop.f32.mrf.mxu1  ;;  %v3947_v23 = vadd.f32 %v7403_v4, %v7401_v3 }
 0x703   : > { %v4078_v44 = vpop.f32.mrf.mxu3 }
 0x704   : > { %v4089_v41 = vadd.f32 %v4078_v44, %v4023_v40 }
 0x705   : > { %v4129_v1 = vpop.f32.mrf.mxu0  ;;  %v7448_v45 = vpop.f32.mrf.mxu2 }
 0x706   : > { %v4149_v48 = vadd.f32 %v4129_v1, %v7375_v15  ;;  %v4195_v9 = vpop.f32.mrf.mxu1 }
 0x708   : > { %v4215_v54 = vadd.f32 %v4195_v9, %v4149_v48 }
 0x70b   : > { %v7452_v24 = vpop.f32.mrf.mxu3 }
 0x70d   : > { %v4131_v53 = vpop.f32.mrf.mxu0  ;;  %v4261_v43 = vpop.f32.mrf.mxu2 }
 0x70e   : > { %v4197_v61 = vpop.f32.mrf.mxu1  ;;  %v4281_v29 = vadd.f32 %v4261_v43, %v4215_v54  ;;  %v4150_v46 = vadd.f32 %v4131_v53, %v4084_v59 }
 0x710   : > { %v4216_v33 = vadd.f32 %v4197_v61, %v4150_v46 }
 0x713   : > { %v4327_v62 = vpop.f32.mrf.mxu3 }
 0x714   : > { %v4347_v13 = vadd.f32 %v4327_v62, %v4281_v29  ;;  %v3952_v29 = vadd.f32 %v7428_v21, %v7426_v57 }
 0x715   : > { %v4134_v8 = vpop.f32.mrf.mxu0  ;;  %v4263_v6 = vpop.f32.mrf.mxu2 }
 0x716   : > { %v4151_v51 = vadd.f32 %v4134_v8, %v4085_v2  ;;  %v4200_v22 = vpop.f32.mrf.mxu1  ;;  %v4282_v34 = vadd.f32 %v4263_v6, %v4216_v33 }
 0x718   : > { %v4217_v1 = vadd.f32 %v4200_v22, %v4151_v51 }
 0x71b   : > { %v4329_v38 = vpop.f32.mrf.mxu3 }
 0x71c   : > { %v4348_v7 = vadd.f32 %v4329_v38, %v4282_v34 }
 0x71d   : > { %v4136_v31 = vpop.f32.mrf.mxu0  ;;  %v4266_v60 = vpop.f32.mrf.mxu2 }
 0x71e   : > { %v4202_v35 = vpop.f32.mrf.mxu1  ;;  %v4283_v17 = vadd.f32 %v4266_v60, %v4217_v1  ;;  %v4022_v60 = vadd.f32 %v7431_v28, %v3952_v29 }
 0x720   : > { %v4088_v33 = vadd.f32 %v7437_v30, %v4022_v60 }
 0x723   : > { %v4332_v5 = vpop.f32.mrf.mxu3 }
 0x724   : > { %v4349_v62 = vadd.f32 %v4332_v5, %v4283_v17 }
 0x725   : > { %v4139_v39 = vpop.f32.mrf.mxu0  ;;  %v4268_v40 = vpop.f32.mrf.mxu2 }
 0x726   : > { %v7450_v47 = vadd.f32 %v4139_v39, %v4087_v63  ;;  %v7467_v63 = vld [vmem:[%s7653_s10 + $0x2] ss:$0 sm:$0xff] }
 0x72b   : > { %v4334_v48 = vpop.f32.mrf.mxu3 }
 0x72d   : > { %v7454_v15 = vpop.f32.mrf.mxu0  ;;  %v4271_v51 = vpop.f32.mrf.mxu2 }
 0x733   : > { %v4337_v27 = vpop.f32.mrf.mxu3 }
 0x735   : > { %v4144_v12 = vpop.f32.mrf.mxu0 }
 0x736   : > { %v7456_v2 = vadd.f32 %v4144_v12, %v4089_v41  ;;  %v4020_v41 = vadd.f32 %v7408_v36, %v3947_v23  ;;  %v4205_v36 = vpop.f32.mrf.mxu1 }
 0x738   : > { %v4086_v49 = vadd.f32 %v7420_v58, %v4020_v41 }
 0x73a   : > { %v4152_v43 = vadd.f32 %v4136_v31, %v4086_v49 }
 0x73c   : > { %v4218_v12 = vadd.f32 %v4202_v35, %v4152_v43  ;;  %v4154_v35 = vadd.f32 %v7454_v15, %v4088_v33 }
 0x73d   : > { %v7458_v10 = vpop.f32.mrf.mxu0 }
 0x73e   : > { %v4284_v38 = vadd.f32 %v4268_v40, %v4218_v12 }
 0x740   : > { %v4350_v59 = vadd.f32 %v4334_v48, %v4284_v38 }
 0x745   : > { %v4393_v42 = vpop.f32.mrf.mxu0 }
 0x746   : > { %v4413_v56 = vadd.f32 %v4393_v42, %v4347_v13  ;;  %v4219_v42 = vadd.f32 %v4205_v36, %v7450_v47 }
 0x748   : > { %v7470_v18 = vadd.f32 %v7467_v63, %v4413_v56  ;;  %v4285_v34 = vadd.f32 %v4271_v51, %v4219_v42 }
 0x74a   : > { %v5267_v26 = vmul.f32 -1.442695, %v7470_v18  ;;  %v4351_v28 = vadd.f32 %v4337_v27, %v4285_v34 }
 0x74c   : > { %5573 = vpow2.f32 %v5267_v26 }
 0x74d   : > { %v4395_v11 = vpop.f32.mrf.mxu0 }
 0x74e   : > { %v4414_v44 = vadd.f32 %v4395_v11, %v4348_v7  ;;  %v4207_v7 = vpop.f32.mrf.mxu1  ;;  %v4273_v11 = vpop.f32.mrf.mxu2 }
 0x74f   : > { %v4220_v17 = vadd.f32 %v4207_v7, %v4154_v35 }
 0x750   : > { %v7477_v53 = vadd.f32 %v7467_v63, %v4414_v44  ;;  %v4339_v44 = vpop.f32.mrf.mxu3 }
 0x752   : > { %v5574_v8 = vpop.eup %5573  ;;  %v5268_v39 = vmul.f32 -1.442695, %v7477_v53 }
 0x753   : > { %v4458_v9 = vadd.f32 1.0, %v5574_v8 }
 0x754   : > { %5575 = vpow2.f32 %v5268_v39 }
 0x755   : > { %5577 = vrcp.f32 %v4458_v9  ;;  %v4398_v3 = vpop.f32.mrf.mxu0  ;;  %v4477_v40 = vand.u32 2147483648, %v4458_v9  ;;  %vm4471_vm14 = vweird.f32 %v4458_v9  ;;  %v4475_v41 = vand.u32 2147483647, %v4458_v9 }
 0x756   : > { %v4415_v4 = vadd.f32 %v4398_v3, %v4349_v62 }
 0x757   : > { %v4478_v39 = vor.u32 1.1754944e-38, %v4477_v40  ;;  %vm4476_vm2 = vcmp.eq.f32.partialorder %v4475_v41, 8.507059e+37 }
 0x758   : > { %v7482_v61 = vadd.f32 %v7467_v63, %v4415_v4  ;;  %v4286_v4 = vadd.f32 %v4273_v11, %v4220_v17  ;;  %v4342_v42 = vpop.f32.mrf.mxu3 }
 0x75a   : > { %v5576_v6 = vpop.eup %5575  ;;  %v5269_v58 = vmul.f32 -1.442695, %v7482_v61  ;;  %v4352_v27 = vadd.f32 %v4339_v44, %v4286_v4 }
 0x75b   : > { %v5578_v52 = vpop.eup %5577  ;;  %v4459_v54 = vadd.f32 1.0, %v5576_v6 }
 0x75c   : > { %v4467_v31 = vmul.f32 %v5578_v52, %v4458_v9  ;;  %5579 = vpow2.f32 %v5269_v58  ;;  %vm4472_vm0 = vweird.f32 %v5578_v52 }
 0x75d   : > { %5581 = vrcp.f32 %v4459_v54  ;;  %v4400_v46 = vpop.f32.mrf.mxu0  ;;  %vm7497_vm15 = vmor %vm4471_vm14, %vm4472_vm0  ;;  %v4490_v43 = vand.u32 2147483647, %v4459_v54  ;;  %v4492_v62 = vand.u32 2147483648, %v4459_v54  ;;  %vm4486_vm4 = vweird.f32 %v4459_v54 }
 0x75e   : > { %v4468_v13 = vsub.f32 1.0, %v4467_v31  ;;  %v4416_v22 = vadd.f32 %v4400_v46, %v4350_v59  ;;  %v4210_v59 = vpop.f32.mrf.mxu1  ;;  %v4276_v31 = vpop.f32.mrf.mxu2 }
 0x75f   : > { %vm4491_vm6 = vcmp.eq.f32.partialorder %v4490_v43, 8.507059e+37  ;;  %v4493_v58 = vor.u32 1.1754944e-38, %v4492_v62 }
 0x760   : > { %v4469_v5 = vmul.f32 %v5578_v52, %v4468_v13  ;;  %v7490_v56 = vadd.f32 %v7467_v63, %v4416_v22  ;;  %v4344_v43 = vpop.f32.mrf.mxu3 }
 0x762   : > { %v5580_v26 = vpop.eup %5579  ;;  %v4470_v23 = vadd.f32 %v5578_v52, %v4469_v5  ;;  %v5270_v57 = vmul.f32 -1.442695, %v7490_v56 }
 0x763   : > { %v5582_v21 = vpop.eup %5581  ;;  %v7495_v47 = vadd.f32 1.0, %v5580_v26 }
 0x764   : > { %v4482_v1 = vmul.f32 %v5582_v21, %v4459_v54  ;;  %5583 = vpow2.f32 %v5270_v57  ;;  %v4474_v8 = vsel %vm7497_vm15, %v5578_v52, %v4470_v23  ;;  %vm4487_vm3 = vweird.f32 %v5582_v21 }
 0x765   : > { %5585 = vrcp.f32 %v7495_v47  ;;  %v4403_v48 = vpop.f32.mrf.mxu0  ;;  %v4479_v12 = vsel %vm4476_vm2, %v4478_v39, %v4474_v8  ;;  %vm4488_vm5 = vmor %vm4486_vm4, %vm4487_vm3  ;;  %v3957_v54 = vadd.f32 %v7446_v32, %v7439_v20  ;;  %vm4501_vm8 = vweird.f32 %v7495_v47 }
 0x766   : > { %v4483_v15 = vsub.f32 1.0, %v4482_v1  ;;  %v4417_v49 = vadd.f32 %v4403_v48, %v4351_v28  ;;  %v4586_v29 = vmul.f32 %v4479_v12, %v7470_v18  ;;  %v4221_v18 = vadd.f32 %v4210_v59, %v7456_v2  ;;  %v4212_v1 = vpop.f32.mrf.mxu1  ;;  %v4278_v30 = vpop.f32.mrf.mxu2 }
 0x767   : > { %v4024_v26 = vadd.f32 %v7448_v45, %v3957_v54  ;;  %v4507_v28 = vand.u32 2147483648, %v7495_v47 }
 0x768   : > { %v4484_v9 = vmul.f32 %v5582_v21, %v4483_v15  ;;  %v7505_v3 = vadd.f32 %v7467_v63, %v4417_v49  ;;  %v4594_v7 = vadd.f32 %v4586_v29, %v6927_v14  ;;  %v4287_v57 = vadd.f32 %v4276_v31, %v4221_v18 }
 0x769   : > { %v4090_v32 = vadd.f32 %v7452_v24, %v4024_v26  ;;  %v4505_v24 = vand.u32 2147483647, %v7495_v47  ;;  %v4508_v49 = vor.u32 1.1754944e-38, %v4507_v28 }
 0x76a   : > { %v5584_v36 = vpop.eup %5583  ;;  %v4485_v51 = vadd.f32 %v5582_v21, %v4484_v9  ;;  %v5271_v6 = vmul.f32 -1.442695, %v7505_v3 }
 0x76b   : > { %v7508_v38 = vpop.eup %5585  ;;  %v7510_v52 = vadd.f32 1.0, %v5584_v36  ;;  %v4156_v14 = vadd.f32 %v7458_v10, %v4090_v32  ;;  %vm4506_vm10 = vcmp.eq.f32.partialorder %v4505_v24, 8.507059e+37 }
 0x76c   : > { %v4489_v46 = vsel %vm4488_vm5, %v5582_v21, %v4485_v51  ;;  %v4497_v13 = vmul.f32 %v7508_v38, %v7495_v47  ;;  %5587 = vpow2.f32 %v5271_v6  ;;  %vm4502_vm7 = vweird.f32 %v7508_v38 }
 0x76d   : > { %v4494_v22 = vsel %vm4491_vm6, %v4493_v58, %v4489_v46  ;;  %5589 = vrcp.f32 %v7510_v52  ;;  %v4405_v60 = vpop.f32.mrf.mxu0  ;;  %vm7539_vm9 = vmor %vm4501_vm8, %vm4502_vm7  ;;  %v4222_v15 = vadd.f32 %v4212_v1, %v4156_v14  ;;  %v4520_v17 = vand.u32 2147483647, %v7510_v52 }
 0x76e   : > { %v4587_v5 = vmul.f32 %v4494_v22, %v7477_v53  ;;  %v4498_v33 = vsub.f32 1.0, %v4497_v13  ;;  %v4418_v34 = vadd.f32 %v4405_v60, %v4352_v27  ;;  %v4522_v39 = vand.u32 2147483648, %v7510_v52 }
 0x76f   : > { %v4288_v4 = vadd.f32 %v4278_v30, %v4222_v15  ;;  %vm4516_vm13 = vweird.f32 %v7510_v52  ;;  %vm4521_vm14 = vcmp.eq.f32.partialorder %v4520_v17, 8.507059e+37 }
 0x770   : > { %v4595_v11 = vadd.f32 %v4587_v5, %v6930_v50  ;;  %v4499_v23 = vmul.f32 %v7508_v38, %v4498_v33  ;;  %v7525_v20 = vadd.f32 %v7467_v63, %v4418_v34  ;;  %v4353_v50 = vadd.f32 %v4342_v42, %v4287_v57 }
 0x771   : > { %v4354_v27 = vadd.f32 %v4344_v43, %v4288_v4  ;;  %v4523_v58 = vor.u32 1.1754944e-38, %v4522_v39 }
 0x772   : > { %v5588_v21 = vpop.eup %5587  ;;  %v4603_v53 = vpack.c.bf16 %v4595_v11, %v4594_v7  ;;  %v4500_v35 = vadd.f32 %v7508_v38, %v4499_v23  ;;  %v5272_v45 = vmul.f32 -1.442695, %v7525_v20 }
 0x773   : > { %v5590_v2 = vpop.eup %5589  ;;  %v7533_v40 = vadd.f32 1.0, %v5588_v21 }
 0x774   : > { %v4512_v44 = vmul.f32 %v5590_v2, %v7510_v52  ;;  %5591 = vpow2.f32 %v5272_v45  ;;  %5279 = vmatmul.msk.bf16.vlgmr.msra.gmra.mxu2 %vm497_vm1, %v4603_v53  ;;  %v4504_v48 = vsel %vm7539_vm9, %v7508_v38, %v4500_v35  ;;  %vm4517_vm12 = vweird.f32 %v5590_v2 }
 0x775   : > { %5593 = vrcp.f32 %v7533_v40  ;;  %v4408_v10 = vpop.f32.mrf.mxu0  ;;  %v4509_v12 = vsel %vm4506_vm10, %v4508_v49, %v4504_v48  ;;  %vm4518_vm0 = vmor %vm4516_vm13, %vm4517_vm12  ;;  %v4537_v23 = vand.u32 2147483648, %v7533_v40  ;;  %vm4531_vm2 = vweird.f32 %v7533_v40 }
 0x776   : > { %v4513_v8 = vsub.f32 1.0, %v4512_v44  ;;  %v4419_v47 = vadd.f32 %v4408_v10, %v4353_v50  ;;  %v4588_v31 = vmul.f32 %v4509_v12, %v7482_v61 }
 0x777   : > { %v4538_v57 = vor.u32 1.1754944e-38, %v4537_v23 }
 0x778   : > { %v4514_v62 = vmul.f32 %v5590_v2, %v4513_v8  ;;  %v7550_v9 = vadd.f32 %v7467_v63, %v4419_v47  ;;  %v4596_v42 = vadd.f32 %v4588_v31, %v6959_v25  ;;  %v4535_v25 = vand.u32 2147483647, %v7533_v40 }
 0x77a   : > { %v5592_v36 = vpop.eup %5591  ;;  %v4515_v51 = vadd.f32 %v5590_v2, %v4514_v62  ;;  %v5273_v6 = vmul.f32 -1.442695, %v7550_v9  ;;  %vm4536_vm4 = vcmp.eq.f32.partialorder %v4535_v25, 8.507059e+37 }
 0x77b   : > { %v5594_v38 = vpop.eup %5593  ;;  %v4463_v59 = vadd.f32 1.0, %v5592_v36 }
 0x77c   : > { %v4519_v29 = vsel %vm4518_vm0, %v5590_v2, %v4515_v51  ;;  %v4527_v46 = vmul.f32 %v5594_v38, %v7533_v40  ;;  %5595 = vpow2.f32 %v5273_v6  ;;  %vm4532_vm15 = vweird.f32 %v5594_v38 }
 0x77d   : > { %v4524_v13 = vsel %vm4521_vm14, %v4523_v58, %v4519_v29  ;;  %5597 = vrcp.f32 %v4463_v59  ;;  %v4410_v54 = vpop.f32.mrf.mxu0  ;;  %vm4533_vm3 = vmor %vm4531_vm2, %vm4532_vm15  ;;  %v4552_v21 = vand.u32 2147483648, %v4463_v59  ;;  %v4550_v35 = vand.u32 2147483647, %v4463_v59 }
 0x77e   : > { %v4589_v22 = vmul.f32 %v4524_v13, %v7490_v56  ;;  %v4528_v52 = vsub.f32 1.0, %v4527_v46  ;;  %v4420_v60 = vadd.f32 %v4410_v54, %v4354_v27  ;;  %vm4546_vm6 = vweird.f32 %v4463_v59  ;;  %v4636_v13 = vpop.f32.mrf.mxu1 }
 0x77f   : > { %v4553_v28 = vor.u32 1.1754944e-38, %v4552_v21  ;;  %vm4551_vm8 = vcmp.eq.f32.partialorder %v4550_v35, 8.507059e+37 }
 0x780   : > { %v4597_v5 = vadd.f32 %v4589_v22, %v6962_v0  ;;  %v4529_v33 = vmul.f32 %v5594_v38, %v4528_v52  ;;  %v7560_v34 = vadd.f32 %v7467_v63, %v4420_v60  ;;  %v7580_v22 = vld [vmem:[%s7656_s13] ss:$0 sm:$0xff] }
 0x782   : > { %v5596_v61 = vpop.eup %5595  ;;  %v4530_v26 = vadd.f32 %v5594_v38, %v4529_v33  ;;  %v5274_v18 = vmul.f32 -1.442695, %v7560_v34  ;;  %v4604_v7 = vpack.c.bf16 %v4597_v5, %v4596_v42 }
 0x783   : > { %v5598_v11 = vpop.eup %5597  ;;  %v4464_v56 = vadd.f32 1.0, %v5596_v61 }
 0x784   : > { %v4542_v32 = vmul.f32 %v5598_v11, %v4463_v59  ;;  %5599 = vpow2.f32 %v5274_v18  ;;  %5280 = vmatmul.msk.bf16.gmra.mxu2 %vm497_vm1, %v4604_v7  ;;  %v4534_v0 = vsel %vm4533_vm3, %v5594_v38, %v4530_v26  ;;  %vm4547_vm5 = vweird.f32 %v5598_v11 }
 0x785   : > { %5601 = vrcp.f32 %v4464_v56  ;;  %v4539_v45 = vsel %vm4536_vm4, %v4538_v57, %v4534_v0  ;;  %vm4548_vm7 = vmor %vm4546_vm6, %vm4547_vm5  ;;  %v4567_v39 = vand.u32 2147483648, %v4464_v56  ;;  %vm4561_vm10 = vweird.f32 %v4464_v56 }
 0x786   : > { %v4543_v63 = vsub.f32 1.0, %v4542_v32  ;;  %v4590_v24 = vmul.f32 %v4539_v45, %v7505_v3  ;;  %v4565_v3 = vand.u32 2147483647, %v4464_v56  ;;  %v4638_v54 = vpop.f32.mrf.mxu1 }
 0x788   : > { %v4544_v53 = vmul.f32 %v5598_v11, %v4543_v63  ;;  %v4598_v48 = vadd.f32 %v4590_v24, %v6981_v37  ;;  %vm4566_vm13 = vcmp.eq.f32.partialorder %v4565_v3, 8.507059e+37 }
 0x78a   : > { %v5600_v2 = vpop.eup %5599  ;;  %v4545_v14 = vadd.f32 %v5598_v11, %v4544_v53 }
 0x78b   : > { %v5602_v50 = vpop.eup %5601  ;;  %v4465_v40 = vadd.f32 1.0, %v5600_v2 }
 0x78c   : > { %v4549_v44 = vsel %vm4548_vm7, %v5598_v11, %v4545_v14  ;;  %v4557_v41 = vmul.f32 %v5602_v50, %v4464_v56  ;;  %vm4562_vm9 = vweird.f32 %v5602_v50 }
 0x78d   : > { %v4554_v10 = vsel %vm4551_vm8, %v4553_v28, %v4549_v44  ;;  %5603 = vrcp.f32 %v4465_v40  ;;  %vm4563_vm12 = vmor %vm4561_vm10, %vm4562_vm9  ;;  %v4582_v12 = vand.u32 2147483648, %v4465_v40  ;;  %vm4576_vm14 = vweird.f32 %v4465_v40 }
 0x78e   : > { %v4591_v1 = vmul.f32 %v4554_v10, %v7525_v20  ;;  %v4558_v30 = vsub.f32 1.0, %v4557_v41  ;;  %v4568_v20 = vor.u32 1.1754944e-38, %v4567_v39  ;;  %v4641_v5 = vpop.f32.mrf.mxu1 }
 0x78f   : > { %v4583_v6 = vor.u32 1.1754944e-38, %v4582_v12 }
 0x790   : > { %v4599_v8 = vadd.f32 %v4591_v1, %v6984_v16  ;;  %v4559_v47 = vmul.f32 %v5602_v50, %v4558_v30  ;;  %v4580_v16 = vand.u32 2147483647, %v4465_v40 }
 0x792   : > { %v4560_v15 = vadd.f32 %v5602_v50, %v4559_v47  ;;  %v4605_v49 = vpack.c.bf16 %v4599_v8, %v4598_v48  ;;  %vm4581_vm2 = vcmp.eq.f32.partialorder %v4580_v16, 8.507059e+37 }
 0x793   : > { %v5604_v17 = vpop.eup %5603 }
 0x794   : > { %v4572_v43 = vmul.f32 %v5604_v17, %v4465_v40  ;;  %5281 = vmatmul.msk.bf16.gmra.mxu2 %vm497_vm1, %v4605_v49  ;;  %v4564_v62 = vsel %vm4563_vm12, %v5602_v50, %v4560_v15  ;;  %vm4577_vm0 = vweird.f32 %v5604_v17 }
 0x795   : > { %v4569_v36 = vsel %vm4566_vm13, %v4568_v20, %v4564_v62  ;;  %vm4578_vm15 = vmor %vm4576_vm14, %vm4577_vm0 }
 0x796   : > { %v4573_v4 = vsub.f32 1.0, %v4572_v43  ;;  %v4592_v38 = vmul.f32 %v4569_v36, %v7550_v9  ;;  %v4643_v18 = vpop.f32.mrf.mxu1 }
 0x798   : > { %v4574_v37 = vmul.f32 %v5604_v17, %v4573_v4  ;;  %v4600_v31 = vadd.f32 %v4592_v38, %v6992_v55 }
 0x79a   : > { %v4575_v51 = vadd.f32 %v5604_v17, %v4574_v37 }
 0x79c   : > { %v4579_v27 = vsel %vm4578_vm15, %v5604_v17, %v4575_v51 }
 0x79d   : > { %v4584_v58 = vsel %vm4581_vm2, %v4583_v6, %v4579_v27 }
 0x79e   : > { %v4593_v59 = vmul.f32 %v4584_v58, %v7560_v34  ;;  %v4646_v35 = vpop.f32.mrf.mxu1 }
 0x7a0   : > { %v4601_v29 = vadd.f32 %v4593_v59, %v6995_v19 }
 0x7a2   : > { %v4606_v46 = vpack.c.bf16 %v4601_v29, %v4600_v31 }
 0x7a4   : > { %5282 = vmatmul.msk.bf16.gmra.mxu2 %vm497_vm1, %v4606_v46 }
 0x7a6   : > { %v4648_v62 = vpop.f32.mrf.mxu1 }
 0x7f7   : > { %v4680_v9 = vpop.f32.mrf.mxu2 }
 0x7f8   : > { %v4681_v52 = vadd.f32 %v4680_v9, %v4636_v13 }
 0x7fa   : > { %v4704_v60 = vadd.f32 %v7580_v22, %v4681_v52 }
 0x7fc   : > { %v5283_v42 = vmul.f32 -1.442695, %v4704_v60 }
 0x7fe   : > { %5605 = vpow2.f32 %v5283_v42 }
 0x7ff   : > { %v4682_v55 = vpop.f32.mrf.mxu2 }
 0x800   : > { %v4683_v33 = vadd.f32 %v4682_v55, %v4638_v54 }
 0x802   : > { %v7584_v19 = vadd.f32 %v7580_v22, %v4683_v33 }
 0x804   : > { %v5606_v34 = vpop.eup %5605  ;;  %v5284_v61 = vmul.f32 -1.442695, %v7584_v19 }
 0x805   : > { %v4736_v26 = vadd.f32 1.0, %v5606_v34 }
 0x806   : > { %5607 = vpow2.f32 %v5284_v61 }
 0x807   : > { %5609 = vrcp.f32 %v4736_v26  ;;  %v4685_v7 = vpop.f32.mrf.mxu2  ;;  %v4755_v45 = vand.u32 2147483648, %v4736_v26  ;;  %v4753_v14 = vand.u32 2147483647, %v4736_v26  ;;  %vm4749_vm3 = vweird.f32 %v4736_v26 }
 0x808   : > { %v4686_v11 = vadd.f32 %v4685_v7, %v4641_v5  ;;  %v4651_v5 = vpop.f32.mrf.mxu1 }
 0x809   : > { %v4756_v41 = vor.u32 1.1754944e-38, %v4755_v45  ;;  %vm4754_vm5 = vcmp.eq.f32.partialorder %v4753_v14, 8.507059e+37 }
 0x80a   : > { %v7588_v23 = vadd.f32 %v7580_v22, %v4686_v11 }
 0x80c   : > { %v5608_v56 = vpop.eup %5607  ;;  %v5285_v25 = vmul.f32 -1.442695, %v7588_v23 }
 0x80d   : > { %v5610_v32 = vpop.eup %5609  ;;  %v4737_v0 = vadd.f32 1.0, %v5608_v56 }
 0x80e   : > { %v4745_v63 = vmul.f32 %v5610_v32, %v4736_v26  ;;  %5611 = vpow2.f32 %v5285_v25  ;;  %vm4750_vm1 = vweird.f32 %v5610_v32 }
 0x80f   : > { %5613 = vrcp.f32 %v4737_v0  ;;  %v4687_v57 = vpop.f32.mrf.mxu2  ;;  %vm4751_vm4 = vmor %vm4749_vm3, %vm4750_vm1  ;;  %v4770_v17 = vand.u32 2147483648, %v4737_v0  ;;  %v4768_v3 = vand.u32 2147483647, %v4737_v0  ;;  %vm4764_vm7 = vweird.f32 %v4737_v0 }
 0x810   : > { %v4746_v21 = vsub.f32 1.0, %v4745_v63  ;;  %v4688_v53 = vadd.f32 %v4687_v57, %v4643_v18  ;;  %v4653_v14 = vpop.f32.mrf.mxu1 }
 0x811   : > { %v4771_v16 = vor.u32 1.1754944e-38, %v4770_v17  ;;  %vm4769_vm9 = vcmp.eq.f32.partialorder %v4768_v3, 8.507059e+37 }
 0x812   : > { %v4747_v2 = vmul.f32 %v5610_v32, %v4746_v21  ;;  %v7592_v50 = vadd.f32 %v7580_v22, %v4688_v53 }
 0x814   : > { %v5612_v28 = vpop.eup %5611  ;;  %v4748_v40 = vadd.f32 %v5610_v32, %v4747_v2  ;;  %v5286_v24 = vmul.f32 -1.442695, %v7592_v50 }
 0x815   : > { %v5614_v44 = vpop.eup %5613  ;;  %v4738_v10 = vadd.f32 1.0, %v5612_v28 }
 0x816   : > { %v4752_v1 = vsel %vm4751_vm4, %v5610_v32, %v4748_v40  ;;  %v4760_v30 = vmul.f32 %v5614_v44, %v4737_v0  ;;  %5615 = vpow2.f32 %v5286_v24  ;;  %vm4765_vm6 = vweird.f32 %v5614_v44 }
 0x817   : > { %v4757_v48 = vsel %vm4754_vm5, %v4756_v41, %v4752_v1  ;;  %5617 = vrcp.f32 %v4738_v10  ;;  %v4690_v8 = vpop.f32.mrf.mxu2  ;;  %vm4766_vm8 = vmor %vm4764_vm7, %vm4765_vm6  ;;  %v4785_v29 = vand.u32 2147483648, %v4738_v10  ;;  %v4783_v13 = vand.u32 2147483647, %v4738_v10 }
 0x818   : > { %v4864_v47 = vmul.f32 %v4757_v48, %v4704_v60  ;;  %v4761_v15 = vsub.f32 1.0, %v4760_v30  ;;  %v4691_v49 = vadd.f32 %v4690_v8, %v4646_v35  ;;  %vm4779_vm12 = vweird.f32 %v4738_v10 }
 0x819   : > { %v4786_v55 = vor.u32 1.1754944e-38, %v4785_v29  ;;  %vm4784_vm0 = vcmp.eq.f32.partialorder %v4783_v13, 8.507059e+37 }
 0x81a   : > { %4872 = vst.msk [vmem:[%s7599_s16] sm:$0xff] %vm1234_vm11, %v4864_v47  ;;  %v4762_v39 = vmul.f32 %v5614_v44, %v4761_v15  ;;  %v7604_v43 = vadd.f32 %v7580_v22, %v4691_v49 }
 0x81c   : > { %v5616_v4 = vpop.eup %5615  ;;  %v4763_v20 = vadd.f32 %v5614_v44, %v4762_v39  ;;  %v5287_v12 = vmul.f32 -1.442695, %v7604_v43 }
 0x81d   : > { %v5618_v37 = vpop.eup %5617  ;;  %v4739_v36 = vadd.f32 1.0, %v5616_v4 }
 0x81e   : > { %v4767_v51 = vsel %vm4766_vm8, %v5614_v44, %v4763_v20  ;;  %v4775_v6 = vmul.f32 %v5618_v37, %v4738_v10  ;;  %5619 = vpow2.f32 %v5287_v12  ;;  %vm4780_vm10 = vweird.f32 %v5618_v37 }
 0x81f   : > { %v4772_v38 = vsel %vm4769_vm9, %v4771_v16, %v4767_v51  ;;  %5621 = vrcp.f32 %v4739_v36  ;;  %v4692_v27 = vpop.f32.mrf.mxu2  ;;  %vm4781_vm13 = vmor %vm4779_vm12, %vm4780_vm10  ;;  %v4800_v56 = vand.u32 2147483648, %v4739_v36  ;;  %v4798_v32 = vand.u32 2147483647, %v4739_v36 }
 0x820   : > { %v4865_v58 = vmul.f32 %v4772_v38, %v7584_v19  ;;  %v4776_v59 = vsub.f32 1.0, %v4775_v6  ;;  %v4693_v31 = vadd.f32 %v4692_v27, %v4648_v62  ;;  %vm4794_vm15 = vweird.f32 %v4739_v36 }
 0x821   : > { %vm4799_vm1 = vcmp.eq.f32.partialorder %v4798_v32, 8.507059e+37 }
 0x822   : > { %4873 = vst.msk [vmem:[%s7599_s16 + $0x8] sm:$0xff] %vm1234_vm11, %v4865_v58  ;;  %v4777_v46 = vmul.f32 %v5618_v37, %v4776_v59  ;;  %v7611_v54 = vadd.f32 %v7580_v22, %v4693_v31 }
 0x824   : > { %v5620_v9 = vpop.eup %5619  ;;  %v4778_v52 = vadd.f32 %v5618_v37, %v4777_v46  ;;  %v5288_v60 = vmul.f32 -1.442695, %v7611_v54 }
 0x825   : > { %v5622_v42 = vpop.eup %5621  ;;  %v4740_v33 = vadd.f32 1.0, %v5620_v9 }
 0x826   : > { %v4782_v19 = vsel %vm4781_vm13, %v5618_v37, %v4778_v52  ;;  %v4790_v34 = vmul.f32 %v5622_v42, %v4739_v36  ;;  %5623 = vpow2.f32 %v5288_v60  ;;  %vm4795_vm14 = vweird.f32 %v5622_v42 }
 0x827   : > { %v4787_v61 = vsel %vm4784_vm0, %v4786_v55, %v4782_v19  ;;  %5625 = vrcp.f32 %v4740_v33  ;;  %v4695_v26 = vpop.f32.mrf.mxu2  ;;  %vm4796_vm2 = vmor %vm4794_vm15, %vm4795_vm14  ;;  %v4815_v10 = vand.u32 2147483648, %v4740_v33  ;;  %v4813_v30 = vand.u32 2147483647, %v4740_v33 }
 0x828   : > { %v4866_v18 = vmul.f32 %v4787_v61, %v7588_v23  ;;  %v4791_v7 = vsub.f32 1.0, %v4790_v34  ;;  %v4696_v11 = vadd.f32 %v4695_v26, %v4651_v5  ;;  %v4801_v23 = vor.u32 1.1754944e-38, %v4800_v56 }
 0x829   : > { %vm4809_vm4 = vweird.f32 %v4740_v33  ;;  %vm4814_vm6 = vcmp.eq.f32.partialorder %v4813_v30, 8.507059e+37 }
 0x82a   : > { %4874 = vst.msk [vmem:[%s7599_s16 + $0x10] sm:$0xff] %vm1234_vm11, %v4866_v18  ;;  %v4792_v25 = vmul.f32 %v5622_v42, %v4791_v7  ;;  %v7618_v0 = vadd.f32 %v7580_v22, %v4696_v11 }
 0x82c   : > { %v5624_v63 = vpop.eup %5623  ;;  %v4793_v57 = vadd.f32 %v5622_v42, %v4792_v25  ;;  %v5289_v21 = vmul.f32 -1.442695, %v7618_v0 }
 0x82d   : > { %v5626_v53 = vpop.eup %5625  ;;  %v4741_v35 = vadd.f32 1.0, %v5624_v63 }
 0x82e   : > { %v4797_v45 = vsel %vm4796_vm2, %v5622_v42, %v4793_v57  ;;  %v4805_v2 = vmul.f32 %v5626_v53, %v4740_v33  ;;  %5627 = vpow2.f32 %v5289_v21  ;;  %vm4810_vm3 = vweird.f32 %v5626_v53 }
 0x82f   : > { %v4802_v28 = vsel %vm4799_vm1, %v4801_v23, %v4797_v45  ;;  %5629 = vrcp.f32 %v4741_v35  ;;  %v4697_v40 = vpop.f32.mrf.mxu2  ;;  %vm4811_vm5 = vmor %vm4809_vm4, %vm4810_vm3  ;;  %v4830_v20 = vand.u32 2147483648, %v4741_v35  ;;  %v4828_v37 = vand.u32 2147483647, %v4741_v35 }
 0x830   : > { %v4867_v24 = vmul.f32 %v4802_v28, %v7592_v50  ;;  %v4806_v44 = vsub.f32 1.0, %v4805_v2  ;;  %v4698_v41 = vadd.f32 %v4697_v40, %v4653_v14  ;;  %v4816_v50 = vor.u32 1.1754944e-38, %v4815_v10 }
 0x831   : > { %vm4824_vm8 = vweird.f32 %v4741_v35  ;;  %v4831_v6 = vor.u32 1.1754944e-38, %v4830_v20  ;;  %vm4829_vm10 = vcmp.eq.f32.partialorder %v4828_v37, 8.507059e+37 }
 0x832   : > { %4875 = vst.msk [vmem:[%s7599_s16 + $0x18] sm:$0xff] %vm1234_vm11, %v4867_v24  ;;  %v4807_v1 = vmul.f32 %v5626_v53, %v4806_v44  ;;  %v7625_v48 = vadd.f32 %v7580_v22, %v4698_v41 }
 0x834   : > { %v5628_v8 = vpop.eup %5627  ;;  %v4808_v47 = vadd.f32 %v5626_v53, %v4807_v1  ;;  %v5290_v15 = vmul.f32 -1.442695, %v7625_v48 }
 0x835   : > { %v5630_v49 = vpop.eup %5629  ;;  %v4742_v17 = vadd.f32 1.0, %v5628_v8 }
 0x836   : > { %v4812_v39 = vsel %vm4811_vm5, %v5626_v53, %v4808_v47  ;;  %v4820_v3 = vmul.f32 %v5630_v49, %v4741_v35  ;;  %5631 = vpow2.f32 %v5290_v15  ;;  %vm4825_vm7 = vweird.f32 %v5630_v49 }
 0x837   : > { %v4817_v62 = vsel %vm4814_vm6, %v4816_v50, %v4812_v39  ;;  %5633 = vrcp.f32 %v4742_v17  ;;  %vm4826_vm9 = vmor %vm4824_vm8, %vm4825_vm7  ;;  %v4845_v29 = vand.u32 2147483648, %v4742_v17  ;;  %v4843_v13 = vand.u32 2147483647, %v4742_v17 }
 0x838   : > { %v4868_v4 = vmul.f32 %v4817_v62, %v7604_v43  ;;  %v4821_v22 = vsub.f32 1.0, %v4820_v3  ;;  %vm4839_vm13 = vweird.f32 %v4742_v17 }
 0x839   : > { %v4846_v60 = vor.u32 1.1754944e-38, %v4845_v29  ;;  %vm4844_vm14 = vcmp.eq.f32.partialorder %v4843_v13, 8.507059e+37 }
 0x83a   : > { %4876 = vst.msk [vmem:[%s7599_s16 + $0x20] sm:$0xff] %vm1234_vm11, %v4868_v4  ;;  %v4822_v12 = vmul.f32 %v5630_v49, %v4821_v22 }
 0x83c   : > { %v5632_v16 = vpop.eup %5631  ;;  %v4823_v36 = vadd.f32 %v5630_v49, %v4822_v12 }
 0x83d   : > { %v5634_v51 = vpop.eup %5633  ;;  %v4743_v38 = vadd.f32 1.0, %v5632_v16 }
 0x83e   : > { %v4827_v27 = vsel %vm4826_vm9, %v5630_v49, %v4823_v36  ;;  %v4835_v58 = vmul.f32 %v5634_v51, %v4742_v17  ;;  %vm4840_vm12 = vweird.f32 %v5634_v51 }
 0x83f   : > { %v4832_v59 = vsel %vm4829_vm10, %v4831_v6, %v4827_v27  ;;  %5635 = vrcp.f32 %v4743_v38  ;;  %vm4841_vm0 = vmor %vm4839_vm13, %vm4840_vm12  ;;  %v4860_v19 = vand.u32 2147483648, %v4743_v38  ;;  %v4858_v61 = vand.u32 2147483647, %v4743_v38 }
 0x840   : > { %v4869_v43 = vmul.f32 %v4832_v59, %v7611_v54  ;;  %v4836_v31 = vsub.f32 1.0, %v4835_v58  ;;  %vm4854_vm2 = vweird.f32 %v4743_v38 }
 0x841   : > { %v4861_v18 = vor.u32 1.1754944e-38, %v4860_v19  ;;  %vm4859_vm3 = vcmp.eq.f32.partialorder %v4858_v61, 8.507059e+37 }
 0x842   : > { %4877 = vst.msk [vmem:[%s7599_s16 + $0x28] sm:$0xff] %vm1234_vm11, %v4869_v43  ;;  %v4837_v46 = vmul.f32 %v5634_v51, %v4836_v31 }
 0x844   : > { %v4838_v9 = vadd.f32 %v5634_v51, %v4837_v46 }
 0x845   : > { %v5636_v52 = vpop.eup %5635 }
 0x846   : > { %v4842_v42 = vsel %vm4841_vm0, %v5634_v51, %v4838_v9  ;;  %v4850_v5 = vmul.f32 %v5636_v52, %v4743_v38  ;;  %vm4855_vm15 = vweird.f32 %v5636_v52 }
 0x847   : > { %v4847_v55 = vsel %vm4844_vm14, %v4846_v60, %v4842_v42  ;;  %vm4856_vm1 = vmor %vm4854_vm2, %vm4855_vm15 }
 0x848   : > { %v4870_v54 = vmul.f32 %v4847_v55, %v7618_v0  ;;  %v4851_v33 = vsub.f32 1.0, %v4850_v5 }
 0x84a   : > { %4878 = vst.msk [vmem:[%s7599_s16 + $0x30] sm:$0xff] %vm1234_vm11, %v4870_v54  ;;  %v4852_v34 = vmul.f32 %v5636_v52, %v4851_v33 }
 0x84c   : > { %v4853_v26 = vadd.f32 %v5636_v52, %v4852_v34 }
 0x84e   : > { %v4857_v7 = vsel %vm4856_vm1, %v5636_v52, %v4853_v26 }
 0x84f   : > { %v4862_v11 = vsel %vm4859_vm3, %v4861_v18, %v4857_v7 }
 0x850   : > { %v4871_v56 = vmul.f32 %v4862_v11, %v7625_v48 }
 0x852   : > { %4879 = vst.msk [vmem:[%s7599_s16 + $0x38] sm:$0xff] %vm1234_vm11, %v4871_v56 }
 0x853 PF: > { %s24_s29 = sadd.s32 1, %s5643_s29  }
 0x854   : > { %p21_p4 = scmp.ge.s32.totalorder %s24_s29, 4  }
 0x856   :  { %23 = sbr.rel (!%p21_p4) target bundleno = 1 (0x1), region = 153 }

</bundles_post_ra>
